<compile_context>
chip_gen: v6e
topology: v6e:2x2x1
jax: 0.10.0
libtpu: 0.0.40
codegen_flags: <defaults>
</compile_context>

<pallas_src>
import functools

import numpy as np

import jax
import jax.numpy as jnp
from jax.experimental import pallas as pl
from jax.experimental.pallas import tpu as pltpu


def _round_up(x, m):
    return (x + m - 1) // m * m


def _pad2(x, rows, cols, dtype):
    r, c = x.shape
    if (r, c) != (rows, cols):
        x = jnp.pad(x, ((0, rows - r), (0, cols - c)))
    return x.astype(dtype)


# ---------------------------------------------------------------------------
# Fused single-step GEMM + bias + activation Pallas kernel (the hot path).
# ---------------------------------------------------------------------------
def _gemm_bias_act_kernel(a_ref, b_ref, bias_ref, o_ref, *, act):
    acc = jnp.dot(a_ref[...], b_ref[...], preferred_element_type=jnp.float32)
    acc = acc + bias_ref[...]                       # broadcast over rows or lanes
    if act == "relu":
        acc = jnp.maximum(acc, 0.0)
    elif act == "sigmoid":
        acc = jax.nn.sigmoid(acc)
    o_ref[...] = acc.astype(o_ref.dtype)


def _fused_gemm(a_p, b_p, bias_p, *, act, bias_along_rows):
    """act((Mp,Kp) @ (Kp,Np) + bias) on pre-padded operands.
    bias_p is (1, Np) (broadcast over rows) or, with bias_along_rows=True,
    (Mp, 1) (broadcast over lanes).  Returns the padded (Mp, Np) f32 output."""
    Mp, Kp = a_p.shape
    Kp2, Np = b_p.shape
    assert Kp == Kp2 and Kp % 128 == 0 and Mp % 8 == 0 and Np % 128 == 0
    assert Kp <= 2048, "single-K-step kernel: K too large for this model"

    tm = Mp if Mp <= 512 else 512
    while Mp % tm:
        tm -= 8
    tn = Np if Np <= 512 else 512
    while Np % tn:                  # keep tn a multiple of 128 that divides Np
        tn -= 128

    if bias_along_rows:
        bias_spec = pl.BlockSpec((tm, 1), lambda i, j: (i, 0))
    else:
        bias_spec = pl.BlockSpec((1, tn), lambda i, j: (0, j))

    kernel = functools.partial(_gemm_bias_act_kernel, act=act)
    return pl.pallas_call(
        kernel,
        out_shape=jax.ShapeDtypeStruct((Mp, Np), jnp.float32),
        grid_spec=pltpu.PrefetchScalarGridSpec(
            num_scalar_prefetch=0,
            grid=(Mp // tm, Np // tn),
            in_specs=[
                pl.BlockSpec((tm, Kp), lambda i, j: (i, 0)),
                pl.BlockSpec((Kp, tn), lambda i, j: (0, j)),
                bias_spec,
            ],
            out_specs=pl.BlockSpec((tm, tn), lambda i, j: (i, j)),
        ),
        compiler_params=pltpu.CompilerParams(
            dimension_semantics=("parallel", "parallel"),
            vmem_limit_bytes=32 * 1024 * 1024),
    )(a_p, b_p, bias_p)


# ---------------------------------------------------------------------------
# Weight preparation (hoisted out of the jitted forward).
# ---------------------------------------------------------------------------
def _prep_conv_weight(w, b):
    """PyTorch Conv3d weight (Cout, Cin, k, k, k) -> GEMM-ready padded bf16
    operand + padded f32 bias.  Orientation (weight as RHS vs LHS of the GEMM)
    is chosen by the same Cout>=128 rule used in conv3d_apply."""
    Cout, Cin, k = w.shape[0], w.shape[1], w.shape[2]
    Kdim = Cin * k ** 3
    Kp = _round_up(Kdim, 128)
    wm = w.reshape(Cout, Kdim)
    bf = b.astype(jnp.float32)
    if Cout >= 128:
        # Direct GEMM: out(M, Cout) = col(M, K) @ W^T(K, Cout); weight = B operand.
        Np = _round_up(Cout, 128)
        w_p = _pad2(wm.T, Kp, Np, jnp.bfloat16)
        bias_p = _pad2(bf.reshape(1, Cout), 1, Np, jnp.float32)
    else:
        # Transposed GEMM: out^T(Cout, M) = W(Cout, K) @ col^T(K, M); weight = A.
        Mp = _round_up(Cout, 8)
        w_p = _pad2(wm, Mp, Kp, jnp.bfloat16)
        bias_p = _pad2(bf.reshape(Cout, 1), Mp, 1, jnp.float32)
    return w_p, bias_p


def _convT_as_subpixel_conv_weights(w):
    """Rewrite ConvTranspose3d(k=4, s=2, p=1) weights (Cin, Cout, 4, 4, 4) as the
    weights of an equivalent stride-1 Conv3d(Cin -> 8*Cout, k=3, p=1) whose
    output channels enumerate (rd, rh, rw, co); a pixel shuffle interleaves the
    8 residues.  Per axis: y[2q + r] = sum_t W[r, t] * xpad[q + t] with
    W[r, t] = w[3 - 2t + r] for t in {r, r+1}, else 0."""
    Cin, Cout = w.shape[0], w.shape[1]
    r = np.arange(2)[:, None]
    t = np.arange(3)[None, :]
    ok = (t - r >= 0) & (t - r <= 1)                           # (2, 3)
    kk = np.where(ok, 3 - 2 * t + r, 0)                        # (2, 3)
    KD = kk[:, None, None, :, None, None]
    KH = kk[None, :, None, None, :, None]
    KW = kk[None, None, :, None, None, :]
    OK = (ok[:, None, None, :, None, None]
          & ok[None, :, None, None, :, None]
          & ok[None, None, :, None, None, :])                  # (2,2,2,3,3,3)
    KD, KH, KW = np.broadcast_arrays(KD, KH, KW)
    wt = w[:, :, KD, KH, KW] * jnp.asarray(OK, w.dtype)        # (Cin,Cout,2,2,2,3,3,3)
    wt = jnp.transpose(wt, (2, 3, 4, 1, 0, 5, 6, 7))           # (rd,rh,rw,Cout,Cin,3,3,3)
    return wt.reshape(8 * Cout, Cin, 3, 3, 3)


def prepare_params(p):
    """One-time conversion of PyTorch-layout params into GEMM-ready operands."""
    prep = {}
    for name in ("e1", "e2", "e3"):
        prep[f"{name}_w"], prep[f"{name}_b"] = _prep_conv_weight(
            p[f"{name}_w"], p[f"{name}_b"])
    for name in ("d1", "d2", "d3"):
        wc = _convT_as_subpixel_conv_weights(p[f"{name}_w"])
        bc = jnp.tile(p[f"{name}_b"], 8)   # bias per (residue, co) channel
        prep[f"{name}_w"], prep[f"{name}_b"] = _prep_conv_weight(wc, bc)
    return prep


# ---------------------------------------------------------------------------
# Conv3d via im2col + fused Pallas GEMM (orientation chosen for lane density).
# ---------------------------------------------------------------------------
def conv3d_apply(x, w_p, bias_p, *, cout, cin, k, stride, padding, act):
    """x: (N, Cin, D, H, W); w_p/bias_p: prepared GEMM operands."""
    N, Cin, D, H, W = x.shape
    assert Cin == cin
    Do = (D + 2 * padding - k) // stride + 1
    Ho = (H + 2 * padding - k) // stride + 1
    Wo = (W + 2 * padding - k) // stride + 1
    xp = x if padding == 0 else jnp.pad(
        x, ((0, 0), (0, 0),
            (padding, padding), (padding, padding), (padding, padding)))
    taps = []
    for kd in range(k):
        for kh in range(k):
            for kw in range(k):
                taps.append(xp[:, :,
                               kd:kd + stride * Do:stride,
                               kh:kh + stride * Ho:stride,
                               kw:kw + stride * Wo:stride])
    col = jnp.stack(taps, axis=2)                    # (N, Cin, k^3, Do, Ho, Wo)
    M = N * Do * Ho * Wo
    Kdim = cin * k ** 3

    if cout >= 128:
        # Channels already lane-dense: rows = spatial, lanes = channels.
        Kp, Np = w_p.shape
        a = col.transpose(0, 3, 4, 5, 1, 2).reshape(M, Kdim)
        a_p = _pad2(a, _round_up(M, 8), Kp, jnp.bfloat16)
        out = _fused_gemm(a_p, w_p, bias_p, act=act, bias_along_rows=False)
        out = out[:M, :cout]
        return out.reshape(N, Do, Ho, Wo, cout).transpose(0, 4, 1, 2, 3)

    # Small Cout: transpose the GEMM so the big spatial dim lands on lanes.
    Mp, Kp = w_p.shape
    bmat = col.transpose(1, 2, 0, 3, 4, 5).reshape(Kdim, M)
    b_p = _pad2(bmat, Kp, _round_up(M, 128), jnp.bfloat16)
    out = _fused_gemm(w_p, b_p, bias_p, act=act, bias_along_rows=True)
    out = out[:cout, :M]
    return out.reshape(cout, N, Do, Ho, Wo).transpose(1, 0, 2, 3, 4)


# ---------------------------------------------------------------------------
# ConvTranspose3d(k=4, s=2, p=1) via sub-pixel conv + 3-D pixel shuffle.
# ---------------------------------------------------------------------------
def conv_transpose3d_apply(x, w_p, bias_p, *, cout, cin, act):
    N, _, D, H, W = x.shape
    y = conv3d_apply(x, w_p, bias_p, cout=8 * cout, cin=cin, k=3,
                     stride=1, padding=1, act=act)   # (N, 8*Cout, D, H, W)
    # 3-D pixel shuffle (depth-to-space); channel index = (rd, rh, rw, co).
    y = y.reshape(N, 2, 2, 2, cout, D, H, W)
    y = y.transpose(0, 4, 5, 1, 6, 2, 7, 3)          # (N, Cout, D, rd, H, rh, W, rw)
    return y.reshape(N, cout, 2 * D, 2 * H, 2 * W)


# ---------------------------------------------------------------------------
# Full Autoencoder3D forward (takes prepare_params() output).
# ---------------------------------------------------------------------------
def forward_pallas(x, prep):
    # encoder: Conv(1->16) ReLU, Conv(16->32), Conv(32->1) ReLU
    h = conv3d_apply(x, prep["e1_w"], prep["e1_b"],
                     cout=16, cin=1, k=3, stride=2, padding=1, act="relu")
    h = conv3d_apply(h, prep["e2_w"], prep["e2_b"],
                     cout=32, cin=16, k=3, stride=2, padding=1, act="none")
    h = conv3d_apply(h, prep["e3_w"], prep["e3_b"],
                     cout=1, cin=32, k=3, stride=2, padding=1, act="relu")
    # decoder: ConvT(1->32) ReLU, ConvT(32->16) ReLU, ConvT(16->1) Sigmoid
    h = conv_transpose3d_apply(h, prep["d1_w"], prep["d1_b"],
                               cout=32, cin=1, act="relu")
    h = conv_transpose3d_apply(h, prep["d2_w"], prep["d2_b"],
                               cout=16, cin=32, act="relu")
    h = conv_transpose3d_apply(h, prep["d3_w"], prep["d3_b"],
                               cout=1, cin=16, act="sigmoid")
    if h.shape != x.shape:
        # TODO(synk): F.interpolate(mode='trilinear', align_corners=False)
        # fallback kept in plain JAX; never triggers for power-of-two spatial dims.
        h = jax.image.resize(h, x.shape, method="trilinear")
    return h


# ---------------------------------------------------------------------------
# Pure-lax reference (for correctness check of the Pallas implementation).
# ---------------------------------------------------------------------------
def _ref_conv3d(x, w, b, stride, padding):
    y = jax.lax.conv_general_dilated(
        x, w, window_strides=(stride,) * 3, padding=[(padding, padding)] * 3,
        dimension_numbers=("NCDHW", "OIDHW", "NCDHW"),
        precision=jax.lax.Precision.HIGHEST)
    return y + b.reshape(1, -1, 1, 1, 1)


def _ref_convT3d(x, w, b, stride, padding):
    k = w.shape[2]
    w_c = jnp.flip(w, axis=(2, 3, 4)).transpose(1, 0, 2, 3, 4)
    y = jax.lax.conv_general_dilated(
        x, w_c, window_strides=(1, 1, 1),
        padding=[(k - 1 - padding, k - 1 - padding)] * 3,
        lhs_dilation=(stride,) * 3,
        dimension_numbers=("NCDHW", "OIDHW", "NCDHW"),
        precision=jax.lax.Precision.HIGHEST)
    return y + b.reshape(1, -1, 1, 1, 1)


def forward_ref(x, p):
    h = jax.nn.relu(_ref_conv3d(x, p["e1_w"], p["e1_b"], 2, 1))
    h = _ref_conv3d(h, p["e2_w"], p["e2_b"], 2, 1)
    h = jax.nn.relu(_ref_conv3d(h, p["e3_w"], p["e3_b"], 2, 1))
    h = jax.nn.relu(_ref_convT3d(h, p["d1_w"], p["d1_b"], 2, 1))
    h = jax.nn.relu(_ref_convT3d(h, p["d2_w"], p["d2_b"], 2, 1))
    h = jax.nn.sigmoid(_ref_convT3d(h, p["d3_w"], p["d3_b"], 2, 1))
    return h


def init_params(key):
    def w_init(k, shape, fan_in):
        return jax.random.normal(k, shape, jnp.float32) / jnp.sqrt(float(fan_in))

    ks = jax.random.split(key, 12)
    return {
        # encoder (Conv3d weight layout: (Cout, Cin, k, k, k))
        "e1_w": w_init(ks[0], (16, 1, 3, 3, 3), 1 * 27),
        "e1_b": 0.01 * jax.random.normal(ks[1], (16,), jnp.float32),
        "e2_w": w_init(ks[2], (32, 16, 3, 3, 3), 16 * 27),
        "e2_b": 0.01 * jax.random.normal(ks[3], (32,), jnp.float32),
        "e3_w": w_init(ks[4], (1, 32, 3, 3, 3), 32 * 27),
        "e3_b": 0.01 * jax.random.normal(ks[5], (1,), jnp.float32),
        # decoder (ConvTranspose3d weight layout: (Cin, Cout, k, k, k))
        "d1_w": w_init(ks[6], (1, 32, 4, 4, 4), 1 * 64),
        "d1_b": 0.01 * jax.random.normal(ks[7], (32,), jnp.float32),
        "d2_w": w_init(ks[8], (32, 16, 4, 4, 4), 32 * 64),
        "d2_b": 0.01 * jax.random.normal(ks[9], (16,), jnp.float32),
        "d3_w": w_init(ks[10], (16, 1, 4, 4, 4), 16 * 64),
        "d3_b": 0.01 * jax.random.normal(ks[11], (1,), jnp.float32),
    }


if __name__ == "__main__":
    key = jax.random.PRNGKey(0)
    kx, kp = jax.random.split(key)
    # NCDHW input: batch=2, channels=1 (module requirement), spatial=16^3.
    x = jax.random.normal(kx, (2, 1, 16, 16, 16), jnp.float32)
    params = init_params(kp)

    # One-time weight preparation (GEMM layout, bf16, TPU-tile padding).
    prep = prepare_params(params)

    out = jax.block_until_ready(jax.jit(forward_pallas)(x, prep))
    assert out.shape == x.shape, (out.shape, x.shape)

    ref = jax.block_until_ready(jax.jit(forward_ref)(x, params))
    # bf16 MXU operands (f32 accumulation) vs a Precision.HIGHEST f32 reference.
    err = float(jnp.max(jnp.abs(out - ref)))
    assert err < 3e-2, err
    assert bool(jnp.all((out >= 0.0) & (out <= 1.0)))  # sigmoid range

    print("KERNEL_OK")
</pallas_src>

<mosaic_0001>
module attributes {stable_mosaic.version = 11 : i64} {
  func.func @_gemm_bias_act_kernel(%arg0: i32, %arg1: i32, %arg2: memref<16x128xbf16, #tpu.memory_space<vmem>>, %arg3: memref<128x512xbf16, #tpu.memory_space<vmem>>, %arg4: memref<16x1xf32, #tpu.memory_space<vmem>>, %arg5: memref<16x512xf32, #tpu.memory_space<vmem>>) attributes {dimension_semantics = [#tpu.dimension_semantics<parallel>, #tpu.dimension_semantics<parallel>], iteration_bounds = array<i64: 1, 2>, scalar_prefetch = 0 : i64, scratch_operands = 0 : i64, tpu.core_type = #tpu.core_type<tc>, window_params = [{transform_indices = @transform_0, window_bounds = array<i64: 16, 128>}, {transform_indices = @transform_1, window_bounds = array<i64: 128, 512>}, {transform_indices = @transform_2, window_bounds = array<i64: 16, 1>}, {transform_indices = @transform_3, window_bounds = array<i64: 16, 512>}]} {
    %c0 = arith.constant 0 : index
    %c0_0 = arith.constant 0 : index
    %0 = vector.load %arg2[%c0, %c0_0] : memref<16x128xbf16, #tpu.memory_space<vmem>>, vector<16x128xbf16>
    %c0_1 = arith.constant 0 : index
    %c0_2 = arith.constant 0 : index
    %1 = vector.load %arg3[%c0_1, %c0_2] : memref<128x512xbf16, #tpu.memory_space<vmem>>, vector<128x512xbf16>
    %cst = arith.constant dense<0.000000e+00> : vector<16x512xf32>
    %2 = tpu.matmul %0, %1, %cst {dimension_numbers = #tpu.dot_dimension_numbers<[1], [0], [0], [1], [0, 0, 1, 1], [], []>} : vector<16x128xbf16>, vector<128x512xbf16>, vector<16x512xf32> -> vector<16x512xf32>
    %c0_3 = arith.constant 0 : index
    %c0_4 = arith.constant 0 : index
    %3 = vector.load %arg4[%c0_3, %c0_4] : memref<16x1xf32, #tpu.memory_space<vmem>>, vector<16x1xf32>
    %4 = vector.broadcast %3 : vector<16x1xf32> to vector<16x512xf32>
    %5 = arith.addf %2, %4 : vector<16x512xf32>
    %cst_5 = arith.constant 0.000000e+00 : f32
    %6 = vector.broadcast %cst_5 : f32 to vector<16x512xf32>
    %7 = arith.maximumf %5, %6 : vector<16x512xf32>
    %c0_6 = arith.constant 0 : index
    %c0_7 = arith.constant 0 : index
    %8 = vector.load %arg5[%c0_6, %c0_7] : memref<16x512xf32, #tpu.memory_space<vmem>>, vector<16x512xf32>
    tpu.vector_store %arg5[%c0_6, %c0_7], %7 {strides = array<i32>} : memref<16x512xf32, #tpu.memory_space<vmem>>, vector<16x512xf32>,
    return
  }
  func.func @transform_0(%arg0: i32, %arg1: i32) -> (i32, i32) {
    %c0_i32 = arith.constant 0 : i32
    %c0_i32_0 = arith.constant 0 : i32
    return %arg0, %c0_i32 : i32, i32
  }
  func.func @transform_1(%arg0: i32, %arg1: i32) -> (i32, i32) {
    %c0_i32 = arith.constant 0 : i32
    %c0_i32_0 = arith.constant 0 : i32
    return %c0_i32, %arg1 : i32, i32
  }
  func.func @transform_2(%arg0: i32, %arg1: i32) -> (i32, i32) {
    %c0_i32 = arith.constant 0 : i32
    %c0_i32_0 = arith.constant 0 : i32
    return %arg0, %c0_i32 : i32, i32
  }
  func.func @transform_3(%arg0: i32, %arg1: i32) -> (i32, i32) {
    %c0_i32 = arith.constant 0 : i32
    return %arg0, %arg1 : i32, i32
  }
}

module attributes {stable_mosaic.version = 11 : i64} {
  func.func @_gemm_bias_act_kernel(%arg0: i32, %arg1: i32, %arg2: memref<32x512xbf16, #tpu.memory_space<vmem>>, %arg3: memref<512x128xbf16, #tpu.memory_space<vmem>>, %arg4: memref<32x1xf32, #tpu.memory_space<vmem>>, %arg5: memref<32x128xf32, #tpu.memory_space<vmem>>) attributes {dimension_semantics = [#tpu.dimension_semantics<parallel>, #tpu.dimension_semantics<parallel>], iteration_bounds = array<i64: 1, 1>, scalar_prefetch = 0 : i64, scratch_operands = 0 : i64, tpu.core_type = #tpu.core_type<tc>, window_params = [{transform_indices = @transform_0, window_bounds = array<i64: 32, 512>}, {transform_indices = @transform_1, window_bounds = array<i64: 512, 128>}, {transform_indices = @transform_2, window_bounds = array<i64: 32, 1>}, {transform_indices = @transform_3, window_bounds = array<i64: 32, 128>}]} {
    %c0 = arith.constant 0 : index
    %c0_0 = arith.constant 0 : index
    %0 = vector.load %arg2[%c0, %c0_0] : memref<32x512xbf16, #tpu.memory_space<vmem>>, vector<32x512xbf16>
    %c0_1 = arith.constant 0 : index
    %c0_2 = arith.constant 0 : index
    %1 = vector.load %arg3[%c0_1, %c0_2] : memref<512x128xbf16, #tpu.memory_space<vmem>>, vector<512x128xbf16>
    %cst = arith.constant dense<0.000000e+00> : vector<32x128xf32>
    %2 = tpu.matmul %0, %1, %cst {dimension_numbers = #tpu.dot_dimension_numbers<[1], [0], [0], [1], [0, 0, 1, 1], [], []>} : vector<32x512xbf16>, vector<512x128xbf16>, vector<32x128xf32> -> vector<32x128xf32>
    %c0_3 = arith.constant 0 : index
    %c0_4 = arith.constant 0 : index
    %3 = vector.load %arg4[%c0_3, %c0_4] : memref<32x1xf32, #tpu.memory_space<vmem>>, vector<32x1xf32>
    %4 = vector.broadcast %3 : vector<32x1xf32> to vector<32x128xf32>
    %5 = arith.addf %2, %4 : vector<32x128xf32>
    %c0_5 = arith.constant 0 : index
    %c0_6 = arith.constant 0 : index
    %6 = vector.load %arg5[%c0_5, %c0_6] : memref<32x128xf32, #tpu.memory_space<vmem>>, vector<32x128xf32>
    tpu.vector_store %arg5[%c0_5, %c0_6], %5 {strides = array<i32>} : memref<32x128xf32, #tpu.memory_space<vmem>>, vector<32x128xf32>,
    return
  }
  func.func @transform_0(%arg0: i32, %arg1: i32) -> (i32, i32) {
    %c0_i32 = arith.constant 0 : i32
    %c0_i32_0 = arith.constant 0 : i32
    return %arg0, %c0_i32 : i32, i32
  }
  func.func @transform_1(%arg0: i32, %arg1: i32) -> (i32, i32) {
    %c0_i32 = arith.constant 0 : i32
    %c0_i32_0 = arith.constant 0 : i32
    return %c0_i32, %arg1 : i32, i32
  }
  func.func @transform_2(%arg0: i32, %arg1: i32) -> (i32, i32) {
    %c0_i32 = arith.constant 0 : i32
    %c0_i32_0 = arith.constant 0 : i32
    return %arg0, %c0_i32 : i32, i32
  }
  func.func @transform_3(%arg0: i32, %arg1: i32) -> (i32, i32) {
    %c0_i32 = arith.constant 0 : i32
    return %arg0, %arg1 : i32, i32
  }
}

module attributes {stable_mosaic.version = 11 : i64} {
  func.func @_gemm_bias_act_kernel(%arg0: i32, %arg1: i32, %arg2: memref<8x896xbf16, #tpu.memory_space<vmem>>, %arg3: memref<896x128xbf16, #tpu.memory_space<vmem>>, %arg4: memref<8x1xf32, #tpu.memory_space<vmem>>, %arg5: memref<8x128xf32, #tpu.memory_space<vmem>>) attributes {dimension_semantics = [#tpu.dimension_semantics<parallel>, #tpu.dimension_semantics<parallel>], iteration_bounds = array<i64: 1, 1>, scalar_prefetch = 0 : i64, scratch_operands = 0 : i64, tpu.core_type = #tpu.core_type<tc>, window_params = [{transform_indices = @transform_0, window_bounds = array<i64: 8, 896>}, {transform_indices = @transform_1, window_bounds = array<i64: 896, 128>}, {transform_indices = @transform_2, window_bounds = array<i64: 8, 1>}, {transform_indices = @transform_3, window_bounds = array<i64: 8, 128>}]} {
    %c0 = arith.constant 0 : index
    %c0_0 = arith.constant 0 : index
    %0 = vector.load %arg2[%c0, %c0_0] : memref<8x896xbf16, #tpu.memory_space<vmem>>, vector<8x896xbf16>
    %c0_1 = arith.constant 0 : index
    %c0_2 = arith.constant 0 : index
    %1 = vector.load %arg3[%c0_1, %c0_2] : memref<896x128xbf16, #tpu.memory_space<vmem>>, vector<896x128xbf16>
    %cst = arith.constant dense<0.000000e+00> : vector<8x128xf32>
    %2 = tpu.matmul %0, %1, %cst {dimension_numbers = #tpu.dot_dimension_numbers<[1], [0], [0], [1], [0, 0, 1, 1], [], []>} : vector<8x896xbf16>, vector<896x128xbf16>, vector<8x128xf32> -> vector<8x128xf32>
    %c0_3 = arith.constant 0 : index
    %c0_4 = arith.constant 0 : index
    %3 = vector.load %arg4[%c0_3, %c0_4] : memref<8x1xf32, #tpu.memory_space<vmem>>, vector<8x1xf32>
    %4 = vector.broadcast %3 : vector<8x1xf32> to vector<8x128xf32>
    %5 = arith.addf %2, %4 : vector<8x128xf32>
    %cst_5 = arith.constant 0.000000e+00 : f32
    %6 = vector.broadcast %cst_5 : f32 to vector<8x128xf32>
    %7 = arith.maximumf %5, %6 : vector<8x128xf32>
    %c0_6 = arith.constant 0 : index
    %c0_7 = arith.constant 0 : index
    %8 = vector.load %arg5[%c0_6, %c0_7] : memref<8x128xf32, #tpu.memory_space<vmem>>, vector<8x128xf32>
    tpu.vector_store %arg5[%c0_6, %c0_7], %7 {strides = array<i32>} : memref<8x128xf32, #tpu.memory_space<vmem>>, vector<8x128xf32>,
    return
  }
  func.func @transform_0(%arg0: i32, %arg1: i32) -> (i32, i32) {
    %c0_i32 = arith.constant 0 : i32
    %c0_i32_0 = arith.constant 0 : i32
    return %arg0, %c0_i32 : i32, i32
  }
  func.func @transform_1(%arg0: i32, %arg1: i32) -> (i32, i32) {
    %c0_i32 = arith.constant 0 : i32
    %c0_i32_0 = arith.constant 0 : i32
    return %c0_i32, %arg1 : i32, i32
  }
  func.func @transform_2(%arg0: i32, %arg1: i32) -> (i32, i32) {
    %c0_i32 = arith.constant 0 : i32
    %c0_i32_0 = arith.constant 0 : i32
    return %arg0, %c0_i32 : i32, i32
  }
  func.func @transform_3(%arg0: i32, %arg1: i32) -> (i32, i32) {
    %c0_i32 = arith.constant 0 : i32
    return %arg0, %arg1 : i32, i32
  }
}

module attributes {stable_mosaic.version = 11 : i64} {
  func.func @_gemm_bias_act_kernel(%arg0: i32, %arg1: i32, %arg2: memref<16x128xbf16, #tpu.memory_space<vmem>>, %arg3: memref<128x256xbf16, #tpu.memory_space<vmem>>, %arg4: memref<1x256xf32, #tpu.memory_space<vmem>>, %arg5: memref<16x256xf32, #tpu.memory_space<vmem>>) attributes {dimension_semantics = [#tpu.dimension_semantics<parallel>, #tpu.dimension_semantics<parallel>], iteration_bounds = array<i64: 1, 1>, scalar_prefetch = 0 : i64, scratch_operands = 0 : i64, tpu.core_type = #tpu.core_type<tc>, window_params = [{transform_indices = @transform_0, window_bounds = array<i64: 16, 128>}, {transform_indices = @transform_1, window_bounds = array<i64: 128, 256>}, {transform_indices = @transform_2, window_bounds = array<i64: 1, 256>}, {transform_indices = @transform_3, window_bounds = array<i64: 16, 256>}]} {
    %c0 = arith.constant 0 : index
    %c0_0 = arith.constant 0 : index
    %0 = vector.load %arg2[%c0, %c0_0] : memref<16x128xbf16, #tpu.memory_space<vmem>>, vector<16x128xbf16>
    %c0_1 = arith.constant 0 : index
    %c0_2 = arith.constant 0 : index
    %1 = vector.load %arg3[%c0_1, %c0_2] : memref<128x256xbf16, #tpu.memory_space<vmem>>, vector<128x256xbf16>
    %cst = arith.constant dense<0.000000e+00> : vector<16x256xf32>
    %2 = tpu.matmul %0, %1, %cst {dimension_numbers = #tpu.dot_dimension_numbers<[1], [0], [0], [1], [0, 0, 1, 1], [], []>} : vector<16x128xbf16>, vector<128x256xbf16>, vector<16x256xf32> -> vector<16x256xf32>
    %c0_3 = arith.constant 0 : index
    %c0_4 = arith.constant 0 : index
    %3 = vector.load %arg4[%c0_3, %c0_4] : memref<1x256xf32, #tpu.memory_space<vmem>>, vector<1x256xf32>
    %4 = vector.broadcast %3 : vector<1x256xf32> to vector<16x256xf32>
    %5 = arith.addf %2, %4 : vector<16x256xf32>
    %cst_5 = arith.constant 0.000000e+00 : f32
    %6 = vector.broadcast %cst_5 : f32 to vector<16x256xf32>
    %7 = arith.maximumf %5, %6 : vector<16x256xf32>
    %c0_6 = arith.constant 0 : index
    %c0_7 = arith.constant 0 : index
    %8 = vector.load %arg5[%c0_6, %c0_7] : memref<16x256xf32, #tpu.memory_space<vmem>>, vector<16x256xf32>
    tpu.vector_store %arg5[%c0_6, %c0_7], %7 {strides = array<i32>} : memref<16x256xf32, #tpu.memory_space<vmem>>, vector<16x256xf32>,
    return
  }
  func.func @transform_0(%arg0: i32, %arg1: i32) -> (i32, i32) {
    %c0_i32 = arith.constant 0 : i32
    %c0_i32_0 = arith.constant 0 : i32
    return %arg0, %c0_i32 : i32, i32
  }
  func.func @transform_1(%arg0: i32, %arg1: i32) -> (i32, i32) {
    %c0_i32 = arith.constant 0 : i32
    %c0_i32_0 = arith.constant 0 : i32
    return %c0_i32, %arg1 : i32, i32
  }
  func.func @transform_2(%arg0: i32, %arg1: i32) -> (i32, i32) {
    %c0_i32 = arith.constant 0 : i32
    %c0_i32_0 = arith.constant 0 : i32
    return %c0_i32, %arg1 : i32, i32
  }
  func.func @transform_3(%arg0: i32, %arg1: i32) -> (i32, i32) {
    %c0_i32 = arith.constant 0 : i32
    return %arg0, %arg1 : i32, i32
  }
}

module attributes {stable_mosaic.version = 11 : i64} {
  func.func @_gemm_bias_act_kernel(%arg0: i32, %arg1: i32, %arg2: memref<128x896xbf16, #tpu.memory_space<vmem>>, %arg3: memref<896x128xbf16, #tpu.memory_space<vmem>>, %arg4: memref<1x128xf32, #tpu.memory_space<vmem>>, %arg5: memref<128x128xf32, #tpu.memory_space<vmem>>) attributes {dimension_semantics = [#tpu.dimension_semantics<parallel>, #tpu.dimension_semantics<parallel>], iteration_bounds = array<i64: 1, 1>, scalar_prefetch = 0 : i64, scratch_operands = 0 : i64, tpu.core_type = #tpu.core_type<tc>, window_params = [{transform_indices = @transform_0, window_bounds = array<i64: 128, 896>}, {transform_indices = @transform_1, window_bounds = array<i64: 896, 128>}, {transform_indices = @transform_2, window_bounds = array<i64: 1, 128>}, {transform_indices = @transform_3, window_bounds = array<i64: 128, 128>}]} {
    %c0 = arith.constant 0 : index
    %c0_0 = arith.constant 0 : index
    %0 = vector.load %arg2[%c0, %c0_0] : memref<128x896xbf16, #tpu.memory_space<vmem>>, vector<128x896xbf16>
    %c0_1 = arith.constant 0 : index
    %c0_2 = arith.constant 0 : index
    %1 = vector.load %arg3[%c0_1, %c0_2] : memref<896x128xbf16, #tpu.memory_space<vmem>>, vector<896x128xbf16>
    %cst = arith.constant dense<0.000000e+00> : vector<128x128xf32>
    %2 = tpu.matmul %0, %1, %cst {dimension_numbers = #tpu.dot_dimension_numbers<[1], [0], [0], [1], [0, 0, 1, 1], [], []>} : vector<128x896xbf16>, vector<896x128xbf16>, vector<128x128xf32> -> vector<128x128xf32>
    %c0_3 = arith.constant 0 : index
    %c0_4 = arith.constant 0 : index
    %3 = vector.load %arg4[%c0_3, %c0_4] : memref<1x128xf32, #tpu.memory_space<vmem>>, vector<1x128xf32>
    %4 = vector.broadcast %3 : vector<1x128xf32> to vector<128x128xf32>
    %5 = arith.addf %2, %4 : vector<128x128xf32>
    %cst_5 = arith.constant 0.000000e+00 : f32
    %6 = vector.broadcast %cst_5 : f32 to vector<128x128xf32>
    %7 = arith.maximumf %5, %6 : vector<128x128xf32>
    %c0_6 = arith.constant 0 : index
    %c0_7 = arith.constant 0 : index
    %8 = vector.load %arg5[%c0_6, %c0_7] : memref<128x128xf32, #tpu.memory_space<vmem>>, vector<128x128xf32>
    tpu.vector_store %arg5[%c0_6, %c0_7], %7 {strides = array<i32>} : memref<128x128xf32, #tpu.memory_space<vmem>>, vector<128x128xf32>,
    return
  }
  func.func @transform_0(%arg0: i32, %arg1: i32) -> (i32, i32) {
    %c0_i32 = arith.constant 0 : i32
    %c0_i32_0 = arith.constant 0 : i32
    return %arg0, %c0_i32 : i32, i32
  }
  func.func @transform_1(%arg0: i32, %arg1: i32) -> (i32, i32) {
    %c0_i32 = arith.constant 0 : i32
    %c0_i32_0 = arith.constant 0 : i32
    return %c0_i32, %arg1 : i32, i32
  }
  func.func @transform_2(%arg0: i32, %arg1: i32) -> (i32, i32) {
    %c0_i32 = arith.constant 0 : i32
    %c0_i32_0 = arith.constant 0 : i32
    return %c0_i32, %arg1 : i32, i32
  }
  func.func @transform_3(%arg0: i32, %arg1: i32) -> (i32, i32) {
    %c0_i32 = arith.constant 0 : i32
    return %arg0, %arg1 : i32, i32
  }
}

module attributes {stable_mosaic.version = 11 : i64} {
  func.func @_gemm_bias_act_kernel(%arg0: i32, %arg1: i32, %arg2: memref<8x512xbf16, #tpu.memory_space<vmem>>, %arg3: memref<512x512xbf16, #tpu.memory_space<vmem>>, %arg4: memref<8x1xf32, #tpu.memory_space<vmem>>, %arg5: memref<8x512xf32, #tpu.memory_space<vmem>>) attributes {dimension_semantics = [#tpu.dimension_semantics<parallel>, #tpu.dimension_semantics<parallel>], iteration_bounds = array<i64: 1, 2>, scalar_prefetch = 0 : i64, scratch_operands = 0 : i64, tpu.core_type = #tpu.core_type<tc>, window_params = [{transform_indices = @transform_0, window_bounds = array<i64: 8, 512>}, {transform_indices = @transform_1, window_bounds = array<i64: 512, 512>}, {transform_indices = @transform_2, window_bounds = array<i64: 8, 1>}, {transform_indices = @transform_3, window_bounds = array<i64: 8, 512>}]} {
    %c0 = arith.constant 0 : index
    %c0_0 = arith.constant 0 : index
    %0 = vector.load %arg2[%c0, %c0_0] : memref<8x512xbf16, #tpu.memory_space<vmem>>, vector<8x512xbf16>
    %c0_1 = arith.constant 0 : index
    %c0_2 = arith.constant 0 : index
    %1 = vector.load %arg3[%c0_1, %c0_2] : memref<512x512xbf16, #tpu.memory_space<vmem>>, vector<512x512xbf16>
    %cst = arith.constant dense<0.000000e+00> : vector<8x512xf32>
    %2 = tpu.matmul %0, %1, %cst {dimension_numbers = #tpu.dot_dimension_numbers<[1], [0], [0], [1], [0, 0, 1, 1], [], []>} : vector<8x512xbf16>, vector<512x512xbf16>, vector<8x512xf32> -> vector<8x512xf32>
    %c0_3 = arith.constant 0 : index
    %c0_4 = arith.constant 0 : index
    %3 = vector.load %arg4[%c0_3, %c0_4] : memref<8x1xf32, #tpu.memory_space<vmem>>, vector<8x1xf32>
    %4 = vector.broadcast %3 : vector<8x1xf32> to vector<8x512xf32>
    %5 = arith.addf %2, %4 : vector<8x512xf32>
    %6 = arith.negf %5 : vector<8x512xf32>
    %7 = math.exp %6 : vector<8x512xf32>
    %cst_5 = arith.constant 1.000000e+00 : f32
    %8 = vector.broadcast %cst_5 : f32 to vector<8x512xf32>
    %9 = arith.addf %8, %7 : vector<8x512xf32>
    %10 = arith.divf %8, %9 : vector<8x512xf32>
    %c0_6 = arith.constant 0 : index
    %c0_7 = arith.constant 0 : index
    %11 = vector.load %arg5[%c0_6, %c0_7] : memref<8x512xf32, #tpu.memory_space<vmem>>, vector<8x512xf32>
    tpu.vector_store %arg5[%c0_6, %c0_7], %10 {strides = array<i32>} : memref<8x512xf32, #tpu.memory_space<vmem>>, vector<8x512xf32>,
    return
  }
  func.func @transform_0(%arg0: i32, %arg1: i32) -> (i32, i32) {
    %c0_i32 = arith.constant 0 : i32
    %c0_i32_0 = arith.constant 0 : i32
    return %arg0, %c0_i32 : i32, i32
  }
  func.func @transform_1(%arg0: i32, %arg1: i32) -> (i32, i32) {
    %c0_i32 = arith.constant 0 : i32
    %c0_i32_0 = arith.constant 0 : i32
    return %c0_i32, %arg1 : i32, i32
  }
  func.func @transform_2(%arg0: i32, %arg1: i32) -> (i32, i32) {
    %c0_i32 = arith.constant 0 : i32
    %c0_i32_0 = arith.constant 0 : i32
    return %arg0, %c0_i32 : i32, i32
  }
  func.func @transform_3(%arg0: i32, %arg1: i32) -> (i32, i32) {
    %c0_i32 = arith.constant 0 : i32
    return %arg0, %arg1 : i32, i32
  }
}

</mosaic_0001>

<bundles_post_ra>
// kernel: forward_pallas.6
= control target key start
LH: loop header
LB: loop body
LE: loop exit
PB: predicated region body
PF: predicated region fallthrough
CT: control target
= control target key end

     0   :  { %s969_s12 = smov 0   ;;  %s971_s13 = smov 0   ;;  %s1174_s0 = inlined_call_operand.vmem [shape: bf16[16,128], index: 0, kind: input, shape index: {}]   ;;  %s1175_s1 = inlined_call_operand.vmem [shape: bf16[128,1024], index: 1, kind: input, shape index: {}]   ;;  %s1176_s2 = inlined_call_operand.vmem [shape: f32[16,1], index: 2, kind: input, shape index: {}]   ;;  %s1177_s3 = inlined_call_operand.vmem [shape: f32[16,1024], index: 3, kind: output, shape index: {}]  }
   0x1   :  { %s973_s14 = smov 0   ;;  %s975_s15 = smov 0  }
   0x2   :  { %s977_s16 = smov 0  }
   0x3 LB: > { %s22_s17 = sadd.s32 1, %s942_s15  ;;  %s765_s18 = sadd.s32 4294967295, %s946_s16   ;;  %s946_s16 = sphi %s977_s16, %s13_s16   ;;  %s942_s15 = sphi %s975_s15, %s1182_s15   ;;  %s938_s14 = sphi %s973_s14, %s1181_s14   ;;  %s934_s13 = sphi %s971_s13, %s1180_s13   ;;  %s930_s12 = sphi %s969_s12, %s1179_s12  }
   0x4   : > { %p23_p0 = scmp.ge.s32.totalorder %s22_s17, 2  ;;  %p65_p1 = scmp.ne.s32.totalorder %s934_s13, %s930_s12 }
   0x5   : > { %p66_p2 = scmp.eq.s32.totalorder %s946_s16, 0  ;;  %p123_p4 = scmp.eq.s32.totalorder %s765_s18, 1 }
   0x6   : > { %s1184_s17 = smov (%p23_p0, %s22_s17), 0  ;;  %s58_s20 = sadd.s32 1, %s934_s13 }
   0x7   : > { %p67_p3 = por %p66_p2, %p65_p1  ;;  %s55_s19 = ssub.s32 %s942_s15, %s1184_s17 }
   0x8   : > { %p56_p5 = scmp.eq.s32.totalorder %s55_s19, 0  ;;  %p1004_p6 = por %p123_p4, %p65_p1 }
   0x9   : > { %p770_p7 = scmp.ge.s32.totalorder %s946_s16, 2 }
   0xa   : > { %s1009_s22 = scalar_select %p56_p5, %s934_s13, %s58_s20  }
   0xb   : > { %163 = sbr.rel (%p770_p7) target bundleno = 36 (0x24), region = 24 }
  0x10   : > { %166 = sbr.rel (!%p67_p3) target bundleno = 36 (0x24), region = 28  ;;  %s168_s23 = sand.u32 (%p67_p3), 1, %s934_s13  }
  0x11   : > { %s815_s24 = sshll.u32 (%p67_p3), %s942_s15, 4  ;;  %s771_s25 = sshll.u32 (%p67_p3), %s168_s23, 8 }
  0x12   : > { %s1017_s28 = scalar_lea.vmem (%p67_p3), %s1175_s1, %s815_s24  ;;  %s1022_s29 = scalar_lea.vmem (%p67_p3), [#allocation2], %s771_s25 }
  0x13   : > { %v186_v0 = vld [vmem:[%s1017_s28] sm:$0xff] (%p67_p3)  ;;  %v188_v1 = vld [vmem:[%s1017_s28 + $0x8] sm:$0xff] (%p67_p3) }
  0x14   : > { %v190_v2 = vld [vmem:[%s1017_s28 + $0x20] sm:$0xff] (%p67_p3)  ;;  %187 = vst [vmem:[%s1022_s29] sm:$0xff] (%p67_p3), %v186_v0  ;;  %189 = vst [vmem:[%s1022_s29 + $0x8] sm:$0xff] (%p67_p3), %v188_v1  ;;  %v192_v3 = vld [vmem:[%s1017_s28 + $0x28] sm:$0xff] (%p67_p3) }
  0x15   : > { %191 = vst [vmem:[%s1022_s29 + $0x10] sm:$0xff] %v190_v2  ;;  %v194_v4 = vld [vmem:[%s1017_s28 + $0x40] sm:$0xff]  ;;  %v196_v5 = vld [vmem:[%s1017_s28 + $0x48] sm:$0xff]  ;;  %193 = vst [vmem:[%s1022_s29 + $0x18] sm:$0xff] %v192_v3 }
  0x16   : > { %195 = vst [vmem:[%s1022_s29 + $0x20] sm:$0xff] %v194_v4  ;;  %197 = vst [vmem:[%s1022_s29 + $0x28] sm:$0xff] %v196_v5  ;;  %v198_v6 = vld [vmem:[%s1017_s28 + $0x60] sm:$0xff]  ;;  %v200_v7 = vld [vmem:[%s1017_s28 + $0x68] sm:$0xff] }
  0x17   : > { %v202_v8 = vld [vmem:[%s1017_s28 + $0x80] sm:$0xff]  ;;  %199 = vst [vmem:[%s1022_s29 + $0x30] sm:$0xff] %v198_v6  ;;  %201 = vst [vmem:[%s1022_s29 + $0x38] sm:$0xff] %v200_v7  ;;  %v204_v9 = vld [vmem:[%s1017_s28 + $0x88] sm:$0xff] }
  0x18   : > { %203 = vst [vmem:[%s1022_s29 + $0x40] sm:$0xff] %v202_v8  ;;  %v206_v10 = vld [vmem:[%s1017_s28 + $0xa0] sm:$0xff]  ;;  %v208_v11 = vld [vmem:[%s1017_s28 + $0xa8] sm:$0xff]  ;;  %205 = vst [vmem:[%s1022_s29 + $0x48] sm:$0xff] %v204_v9 }
  0x19   : > { %207 = vst [vmem:[%s1022_s29 + $0x50] sm:$0xff] %v206_v10  ;;  %209 = vst [vmem:[%s1022_s29 + $0x58] sm:$0xff] %v208_v11  ;;  %v210_v12 = vld [vmem:[%s1017_s28 + $0xc0] sm:$0xff]  ;;  %v212_v13 = vld [vmem:[%s1017_s28 + $0xc8] sm:$0xff] }
  0x1a   : > { %v214_v14 = vld [vmem:[%s1017_s28 + $0xe0] sm:$0xff]  ;;  %211 = vst [vmem:[%s1022_s29 + $0x60] sm:$0xff] %v210_v12  ;;  %213 = vst [vmem:[%s1022_s29 + $0x68] sm:$0xff] %v212_v13  ;;  %v216_v15 = vld [vmem:[%s1017_s28 + $0xe8] sm:$0xff] }
  0x1b   : > { %215 = vst [vmem:[%s1022_s29 + $0x70] sm:$0xff] %v214_v14  ;;  %v218_v16 = vld [vmem:[%s1017_s28 + $0x100] sm:$0xff]  ;;  %v220_v17 = vld [vmem:[%s1017_s28 + $0x108] sm:$0xff]  ;;  %217 = vst [vmem:[%s1022_s29 + $0x78] sm:$0xff] %v216_v15 }
  0x1c   : > { %219 = vst [vmem:[%s1022_s29 + $0x80] sm:$0xff] %v218_v16  ;;  %221 = vst [vmem:[%s1022_s29 + $0x88] sm:$0xff] %v220_v17  ;;  %v222_v18 = vld [vmem:[%s1017_s28 + $0x120] sm:$0xff]  ;;  %v224_v19 = vld [vmem:[%s1017_s28 + $0x128] sm:$0xff] }
  0x1d   : > { %v226_v20 = vld [vmem:[%s1017_s28 + $0x140] sm:$0xff]  ;;  %223 = vst [vmem:[%s1022_s29 + $0x90] sm:$0xff] %v222_v18  ;;  %225 = vst [vmem:[%s1022_s29 + $0x98] sm:$0xff] %v224_v19  ;;  %v228_v21 = vld [vmem:[%s1017_s28 + $0x148] sm:$0xff] }
  0x1e   : > { %227 = vst [vmem:[%s1022_s29 + $0xa0] sm:$0xff] %v226_v20  ;;  %v230_v22 = vld [vmem:[%s1017_s28 + $0x160] sm:$0xff]  ;;  %v232_v23 = vld [vmem:[%s1017_s28 + $0x168] sm:$0xff]  ;;  %229 = vst [vmem:[%s1022_s29 + $0xa8] sm:$0xff] %v228_v21 }
  0x1f   : > { %231 = vst [vmem:[%s1022_s29 + $0xb0] sm:$0xff] %v230_v22  ;;  %233 = vst [vmem:[%s1022_s29 + $0xb8] sm:$0xff] %v232_v23  ;;  %v234_v24 = vld [vmem:[%s1017_s28 + $0x180] sm:$0xff]  ;;  %v236_v25 = vld [vmem:[%s1017_s28 + $0x188] sm:$0xff] }
  0x20   : > { %v238_v26 = vld [vmem:[%s1017_s28 + $0x1a0] sm:$0xff]  ;;  %235 = vst [vmem:[%s1022_s29 + $0xc0] sm:$0xff] %v234_v24  ;;  %237 = vst [vmem:[%s1022_s29 + $0xc8] sm:$0xff] %v236_v25  ;;  %v240_v27 = vld [vmem:[%s1017_s28 + $0x1a8] sm:$0xff] }
  0x21   : > { %239 = vst [vmem:[%s1022_s29 + $0xd0] sm:$0xff] %v238_v26  ;;  %v242_v28 = vld [vmem:[%s1017_s28 + $0x1c0] sm:$0xff]  ;;  %v244_v29 = vld [vmem:[%s1017_s28 + $0x1c8] sm:$0xff]  ;;  %241 = vst [vmem:[%s1022_s29 + $0xd8] sm:$0xff] %v240_v27 }
  0x22   : > { %243 = vst [vmem:[%s1022_s29 + $0xe0] sm:$0xff] %v242_v28  ;;  %245 = vst [vmem:[%s1022_s29 + $0xe8] sm:$0xff] %v244_v29  ;;  %v246_v30 = vld [vmem:[%s1017_s28 + $0x1e0] sm:$0xff]  ;;  %v248_v31 = vld [vmem:[%s1017_s28 + $0x1e8] sm:$0xff] }
  0x23   : > { %247 = vst [vmem:[%s1022_s29 + $0xf0] sm:$0xff] %v246_v30  ;;  %249 = vst [vmem:[%s1022_s29 + $0xf8] sm:$0xff] %v248_v31 }
  0x24 PF: > { %p774_p8 = scmp.ge.s32.totalorder %s946_s16, 1  ;;  %p254_p9 = scmp.lt.s32.totalorder %s946_s16, 3 }
  0x26   : > { %p255_p10 = pnand %p774_p8, %p254_p9 }
  0x27   : > { %s261_s30 = sand.u32 (!%p255_p10), 1, %s930_s12  }
  0x28   : > { %258 = sbr.rel (%p255_p10) target bundleno = 292 (0x124), region = 51  ;;  %s775_s4 = sshll.u32 (!%p255_p10), %s261_s30, 8 }
  0x29   : > { %s1093_s7 = scalar_lea.vmem (!%p255_p10), [#allocation2], %s775_s4  ;;  %s776_s18 = sshll.u32 (!%p255_p10), %s261_s30, 6 }
  0x2a   : > { %s1135_s19 = scalar_lea.vmem (!%p255_p10), [#allocation3], %s776_s18 }
  0x2d   : > { %v948_v32 = vmov 0   ;;  %v343_v33 = vld [vmem:[%s1176_s2] sm:$0xff]  ;;  %v344_v35 = vld [vmem:[%s1176_s2 + $0x8] sm:$0xff]  ;;  %s816_s12 = sshll.u32 (%p1004_p6), %s938_s14, 5 }
  0x2e   : > { %553 = vmatprep.mubr.bf16.mxu0 %v948_v32  ;;  %596 = vmatprep.mubr.bf16.mxu1 %v948_v32  ;;  %v859_v34 = vld [vmem:[%s1093_s7 + $0xe4] ss:$16 sps:$4 sm:$0xff]   ;;  %v861_v36 = vld [vmem:[%s1093_s7 + $0xec] ss:$16 sps:$4 sm:$0xff]   ;;  %v863_v37 = vld [vmem:[%s1093_s7 + $0xe0] ss:$16 sps:$4 sm:$0xff]   ;;  %s635_s24 = scalar_lea.vmem (%p1004_p6), %s1177_s3, %s816_s12 }
  0x2f   : > { %858 = vset.pattern.permute.xlu0 %v948_v32  ;;  %521 = vmatprep.subr.bf16.mxu0 %v859_v34  ;;  %v864_v38 = vld [vmem:[%s1093_s7 + $0xe8] ss:$16 sps:$4 sm:$0xff]   ;;  %v865_v39 = vld [vmem:[%s1093_s7 + $0xc4] ss:$16 sps:$4 sm:$0xff]   ;;  %v867_v40 = vld [vmem:[%s1093_s7 + $0xcc] ss:$16 sps:$4 sm:$0xff]  }
  0x30   : > { %347 = vperm.xlu0 %858, %v343_v33   ;;  %564 = vmatprep.subr.bf16.mxu1 %v861_v36  ;;  %v869_v41 = vld [vmem:[%s1093_s7 + $0xc0] ss:$16 sps:$4 sm:$0xff]   ;;  %v870_v42 = vld [vmem:[%s1093_s7 + $0xc8] ss:$16 sps:$4 sm:$0xff]   ;;  %v871_v43 = vld [vmem:[%s1093_s7 + $0xa4] ss:$16 sps:$4 sm:$0xff]  }
  0x31   : > { %522 = vmatpush1.bf16.msra.mxu0 %v863_v37  ;;  %565 = vmatpush1.bf16.msra.mxu1 %v864_v38  ;;  %v873_v44 = vld [vmem:[%s1093_s7 + $0xac] ss:$16 sps:$4 sm:$0xff]   ;;  %v875_v45 = vld [vmem:[%s1093_s7 + $0xa0] ss:$16 sps:$4 sm:$0xff]   ;;  %v876_v46 = vld [vmem:[%s1093_s7 + $0xa8] ss:$16 sps:$4 sm:$0xff]  }
  0x32   : > { %523 = vmatprep.subr.bf16.mxu0 %v865_v39  ;;  %566 = vmatprep.subr.bf16.mxu1 %v867_v40  ;;  %v877_v47 = vld [vmem:[%s1093_s7 + $0x84] ss:$16 sps:$4 sm:$0xff]   ;;  %v879_v48 = vld [vmem:[%s1093_s7 + $0x8c] ss:$16 sps:$4 sm:$0xff]   ;;  %v881_v49 = vld [vmem:[%s1093_s7 + $0x80] ss:$16 sps:$4 sm:$0xff]  }
  0x33   : > { %v882_v50 = vld [vmem:[%s1093_s7 + $0x88] ss:$16 sps:$4 sm:$0xff]   ;;  %v883_v51 = vld [vmem:[%s1093_s7 + $0x64] ss:$16 sps:$4 sm:$0xff]   ;;  %v885_v52 = vld [vmem:[%s1093_s7 + $0x6c] ss:$16 sps:$4 sm:$0xff]  }
  0x34   : > { %352 = vperm.xlu0 %858, %v344_v35   ;;  %v887_v53 = vld [vmem:[%s1093_s7 + $0x60] ss:$16 sps:$4 sm:$0xff]   ;;  %v888_v54 = vld [vmem:[%s1093_s7 + $0x68] ss:$16 sps:$4 sm:$0xff]   ;;  %v889_v55 = vld [vmem:[%s1093_s7 + $0x44] ss:$16 sps:$4 sm:$0xff]  }
  0x35   : > { %524 = vmatpush1.bf16.msra.mxu0 %v869_v41  ;;  %567 = vmatpush1.bf16.msra.mxu1 %v870_v42  ;;  %v891_v56 = vld [vmem:[%s1093_s7 + $0x4c] ss:$16 sps:$4 sm:$0xff]   ;;  %v893_v57 = vld [vmem:[%s1093_s7 + $0x40] ss:$16 sps:$4 sm:$0xff]   ;;  %v894_v58 = vld [vmem:[%s1093_s7 + $0x48] ss:$16 sps:$4 sm:$0xff]  }
  0x36   : > { %525 = vmatprep.subr.bf16.mxu0 %v871_v43  ;;  %568 = vmatprep.subr.bf16.mxu1 %v873_v44  ;;  %v895_v59 = vld [vmem:[%s1093_s7 + $0x24] ss:$16 sps:$4 sm:$0xff]   ;;  %v897_v60 = vld [vmem:[%s1093_s7 + $0x2c] ss:$16 sps:$4 sm:$0xff]   ;;  %v899_v61 = vld [vmem:[%s1093_s7 + $0x20] ss:$16 sps:$4 sm:$0xff]  }
  0x37   : > { %v900_v62 = vld [vmem:[%s1093_s7 + $0x28] ss:$16 sps:$4 sm:$0xff]   ;;  %v901_v63 = vld [vmem:[%s1093_s7 + $0x4] ss:$16 sps:$4 sm:$0xff]   ;;  %v903_v0 = vld [vmem:[%s1093_s7 + $0xc] ss:$16 sps:$4 sm:$0xff]  }
  0x38   : > { %v905_v1 = vld [vmem:[%s1093_s7] ss:$16 sps:$4 sm:$0xff]   ;;  %v906_v2 = vld [vmem:[%s1093_s7 + $0x8] ss:$16 sps:$4 sm:$0xff]  }
  0x39   : > { %526 = vmatpush1.bf16.msra.mxu0 %v875_v45  ;;  %569 = vmatpush1.bf16.msra.mxu1 %v876_v46  ;;  %v907_v3 = vld [vmem:[%s1174_s0] sm:$0xff]  }
  0x3a   : > { %527 = vmatprep.subr.bf16.mxu0 %v877_v47  ;;  %570 = vmatprep.subr.bf16.mxu1 %v879_v48 }
  0x3d   : > { %528 = vmatpush1.bf16.msra.mxu0 %v881_v49  ;;  %571 = vmatpush1.bf16.msra.mxu1 %v882_v50 }
  0x3e   : > { %529 = vmatprep.subr.bf16.mxu0 %v883_v51  ;;  %572 = vmatprep.subr.bf16.mxu1 %v885_v52 }
  0x41   : > { %530 = vmatpush1.bf16.msra.mxu0 %v887_v53  ;;  %573 = vmatpush1.bf16.msra.mxu1 %v888_v54 }
  0x42   : > { %531 = vmatprep.subr.bf16.mxu0 %v889_v55  ;;  %574 = vmatprep.subr.bf16.mxu1 %v891_v56 }
  0x45   : > { %532 = vmatpush1.bf16.msra.mxu0 %v893_v57  ;;  %575 = vmatpush1.bf16.msra.mxu1 %v894_v58 }
  0x46   : > { %533 = vmatprep.subr.bf16.mxu0 %v895_v59  ;;  %576 = vmatprep.subr.bf16.mxu1 %v897_v60 }
  0x49   : > { %534 = vmatpush1.bf16.msra.mxu0 %v899_v61  ;;  %577 = vmatpush1.bf16.msra.mxu1 %v900_v62 }
  0x4a   : > { %535 = vmatprep.subr.bf16.mxu0 %v901_v63  ;;  %578 = vmatprep.subr.bf16.mxu1 %v903_v0 }
  0x4d   : > { %536 = vmatpush1.bf16.msra.mxu0 %v905_v1  ;;  %579 = vmatpush1.bf16.msra.mxu1 %v906_v2 }
  0x50   : > { %554 = vmatmul.mubr.bf16.vlgmr.msra.gmra.mxu0 %v907_v3  ;;  %597 = vmatmul.mubr.bf16.vlgmr.msra.gmra.mxu1 %v907_v3 }
  0xab   : > { %v348_v4 = vpop.permute.xlu0 %347 }
  0xaf   : > { %v353_v13 = vpop.permute.xlu0 %352 }
 0x110   : > { %v555_v5 = vpop.f32.mrf.mxu0  ;;  %v598_v6 = vpop.f32.mrf.mxu1 }
 0x111   : > { %v556_v7 = vadd.f32 %v555_v5, %v348_v4  ;;  %v599_v8 = vadd.f32 %v598_v6, %v348_v4 }
 0x112   : > { %v557_v9 = vpop.f32.mrf.mxu0  ;;  %v600_v10 = vpop.f32.mrf.mxu1 }
 0x113   : > { %v607_v11 = vmax.f32 %v556_v7, 0.0  ;;  %v609_v12 = vmax.f32 %v599_v8, 0.0  ;;  %v558_v14 = vadd.f32 %v557_v9, %v348_v4  ;;  %v601_v15 = vadd.f32 %v600_v10, %v348_v4 }
 0x114   : > { %v559_v16 = vpop.f32.mrf.mxu0  ;;  %v602_v17 = vpop.f32.mrf.mxu1 }
 0x115   : > { %615 = vst [vmem:[%s1135_s19] sm:$0xff] %v607_v11  ;;  %617 = vst [vmem:[%s1135_s19 + $0x10] sm:$0xff] %v609_v12  ;;  %v608_v18 = vmax.f32 %v558_v14, 0.0  ;;  %v610_v19 = vmax.f32 %v601_v15, 0.0  ;;  %v560_v20 = vadd.f32 %v559_v16, %v353_v13  ;;  %v603_v21 = vadd.f32 %v602_v17, %v353_v13 }
 0x116   : > { %v561_v22 = vpop.f32.mrf.mxu0  ;;  %v604_v23 = vpop.f32.mrf.mxu1 }
 0x117   : > { %616 = vst [vmem:[%s1135_s19 + $0x8] sm:$0xff] %v608_v18  ;;  %618 = vst [vmem:[%s1135_s19 + $0x18] sm:$0xff] %v610_v19  ;;  %v611_v24 = vmax.f32 %v560_v20, 0.0  ;;  %v613_v25 = vmax.f32 %v603_v21, 0.0  ;;  %v562_v26 = vadd.f32 %v561_v22, %v353_v13  ;;  %v605_v27 = vadd.f32 %v604_v23, %v353_v13  ;;  %629 = sbr.rel (!%p1004_p6) target bundleno = 292 (0x124), region = 59 }
 0x119   : > { %619 = vst [vmem:[%s1135_s19 + $0x20] sm:$0xff] %v611_v24  ;;  %621 = vst [vmem:[%s1135_s19 + $0x30] sm:$0xff] %v613_v25  ;;  %v612_v28 = vmax.f32 %v562_v26, 0.0  ;;  %v614_v29 = vmax.f32 %v605_v27, 0.0 }
 0x11b   : > { %620 = vst [vmem:[%s1135_s19 + $0x28] sm:$0xff] %v612_v28  ;;  %622 = vst [vmem:[%s1135_s19 + $0x38] sm:$0xff] %v614_v29 }
 0x11c   : > { %v648_v30 = vld [vmem:[%s1135_s19] sm:$0xff]  ;;  %v652_v32 = vld [vmem:[%s1135_s19 + $0x10] sm:$0xff] }
 0x11d   : > { %649 = vst [vmem:[%s635_s24] sm:$0xff] %v648_v30  ;;  %653 = vst [vmem:[%s635_s24 + $0x10] sm:$0xff] %v652_v32 }
 0x11e   : > { %v650_v31 = vld [vmem:[%s1135_s19 + $0x8] sm:$0xff]  ;;  %v654_v33 = vld [vmem:[%s1135_s19 + $0x18] sm:$0xff] }
 0x11f   : > { %651 = vst [vmem:[%s635_s24 + $0x8] sm:$0xff] %v650_v31  ;;  %655 = vst [vmem:[%s635_s24 + $0x18] sm:$0xff] %v654_v33 }
 0x120   : > { %v656_v34 = vld [vmem:[%s1135_s19 + $0x20] sm:$0xff]  ;;  %v660_v36 = vld [vmem:[%s1135_s19 + $0x30] sm:$0xff] }
 0x121   : > { %657 = vst [vmem:[%s635_s24 + $0x40] sm:$0xff] %v656_v34  ;;  %661 = vst [vmem:[%s635_s24 + $0x50] sm:$0xff] %v660_v36 }
 0x122   : > { %v658_v35 = vld [vmem:[%s1135_s19 + $0x28] sm:$0xff]  ;;  %v662_v37 = vld [vmem:[%s1135_s19 + $0x38] sm:$0xff] }
 0x123   : > { %659 = vst [vmem:[%s635_s24 + $0x48] sm:$0xff] %v658_v35  ;;  %663 = vst [vmem:[%s635_s24 + $0x58] sm:$0xff] %v662_v37 }
 0x124 PF: > { %s13_s16 = sadd.s32 1, %s946_s16   ;;  %s1179_s12 = smov %s934_s13 }
 0x125   : > { %p10_p11 = scmp.ge.s32.totalorder %s13_s16, 4   ;;  %s1180_s13 = smov %s1009_s22 }
 0x126   : > { %s1181_s14 = smov %s942_s15  ;;  %s1182_s15 = smov %s1184_s17 }
 0x127   :  { %12 = sbr.rel (!%p10_p11) target bundleno = 3 (0x3), region = 119 }

// kernel: forward_pallas.7
= control target key start
LH: loop header
LB: loop body
LE: loop exit
PB: predicated region body
PF: predicated region fallthrough
CT: control target
= control target key end

     0   :  { %v592_v1 = vmov 0   ;;  %s757_s1 = inlined_call_operand.vmem [shape: bf16[512,128], index: 1, kind: input, shape index: {}]   ;;  %s758_s0 = inlined_call_operand.vmem [shape: bf16[32,512], index: 0, kind: input, shape index: {}]   ;;  %s759_s2 = inlined_call_operand.vmem [shape: f32[32,1], index: 2, kind: input, shape index: {}]   ;;  %s760_s3 = inlined_call_operand.vmem [shape: f32[32,128], index: 3, kind: output, shape index: {}]  }
   0x1   :  { %v548_v0 = vld [vmem:[%s757_s1 + $0x78] sm:$0xff]   ;;  %546 = vset.pattern.permute.xlu0 %v592_v1  ;;  %547 = vset.pattern.permute.xlu1 %v592_v1  ;;  %v552_v5 = vld [vmem:[%s757_s1 + $0x70] sm:$0xff]   ;;  %v556_v9 = vld [vmem:[%s757_s1 + $0x68] sm:$0xff]  }
   0x2   :  { %v549_v2 = vld [vmem:[%s757_s1 + $0xf8] sm:$0xff]   ;;  %489 = vmatprep.subr.bf16.mxu0 %v548_v0  ;;  %v553_v6 = vld [vmem:[%s757_s1 + $0xf0] sm:$0xff]   ;;  %v557_v10 = vld [vmem:[%s757_s1 + $0xe8] sm:$0xff]  }
   0x3   :  { %v550_v3 = vld [vmem:[%s757_s1 + $0x38] sm:$0xff]   ;;  %517 = vmatprep.subr.bf16.mxu1 %v549_v2  ;;  %v554_v7 = vld [vmem:[%s757_s1 + $0x30] sm:$0xff]   ;;  %v558_v11 = vld [vmem:[%s757_s1 + $0x28] sm:$0xff]  }
   0x4   :  { %v551_v4 = vld [vmem:[%s757_s1 + $0xb8] sm:$0xff]   ;;  %490 = vmatpush3.bf16.msra.mxu0 %v550_v3  ;;  %v555_v8 = vld [vmem:[%s757_s1 + $0xb0] sm:$0xff]   ;;  %v559_v12 = vld [vmem:[%s757_s1 + $0xa8] sm:$0xff]  }
   0x5   :  { %518 = vmatpush3.bf16.msra.mxu1 %v551_v4  ;;  %491 = vmatprep.subr.bf16.mxu0 %v552_v5  ;;  %v560_v13 = vld [vmem:[%s757_s1 + $0x60] sm:$0xff]   ;;  %v564_v17 = vld [vmem:[%s757_s1 + $0x58] sm:$0xff]   ;;  %v568_v21 = vld [vmem:[%s757_s1 + $0x50] sm:$0xff]  }
   0x6   :  { %519 = vmatprep.subr.bf16.mxu1 %v553_v6  ;;  %v561_v14 = vld [vmem:[%s757_s1 + $0xe0] sm:$0xff]   ;;  %v565_v18 = vld [vmem:[%s757_s1 + $0xd8] sm:$0xff]   ;;  %v569_v22 = vld [vmem:[%s757_s1 + $0xd0] sm:$0xff]  }
   0x7   :  { %v562_v15 = vld [vmem:[%s757_s1 + $0x20] sm:$0xff]   ;;  %v566_v19 = vld [vmem:[%s757_s1 + $0x18] sm:$0xff]   ;;  %v570_v23 = vld [vmem:[%s757_s1 + $0x10] sm:$0xff]  }
   0x8   :  { %492 = vmatpush3.bf16.msra.mxu0 %v554_v7  ;;  %v563_v16 = vld [vmem:[%s757_s1 + $0xa0] sm:$0xff]   ;;  %v567_v20 = vld [vmem:[%s757_s1 + $0x98] sm:$0xff]   ;;  %v571_v24 = vld [vmem:[%s757_s1 + $0x90] sm:$0xff]  }
   0x9   :  { %520 = vmatpush3.bf16.msra.mxu1 %v555_v8  ;;  %493 = vmatprep.subr.bf16.mxu0 %v556_v9  ;;  %v572_v25 = vld [vmem:[%s757_s1 + $0x48] sm:$0xff]   ;;  %v576_v29 = vld [vmem:[%s757_s1 + $0x40] sm:$0xff]   ;;  %v89_v40 = vld [vmem:[%s759_s2 + $0x10] sm:$0xff] }
   0xa   :  { %521 = vmatprep.subr.bf16.mxu1 %v557_v10  ;;  %v573_v26 = vld [vmem:[%s757_s1 + $0xc8] sm:$0xff]   ;;  %v577_v30 = vld [vmem:[%s757_s1 + $0xc0] sm:$0xff]   ;;  %103 = vperm.xlu1 %547, %v89_v40   ;;  %v90_v43 = vld [vmem:[%s759_s2 + $0x18] sm:$0xff] }
   0xb   :  { %v574_v27 = vld [vmem:[%s757_s1 + $0x8] sm:$0xff]   ;;  %v578_v31 = vld [vmem:[%s757_s1] sm:$0xff]  }
   0xc   :  { %494 = vmatpush3.bf16.msra.mxu0 %v558_v11  ;;  %v575_v28 = vld [vmem:[%s757_s1 + $0x88] sm:$0xff]   ;;  %v579_v32 = vld [vmem:[%s757_s1 + $0x80] sm:$0xff]  }
   0xd   :  { %522 = vmatpush3.bf16.msra.mxu1 %v559_v12  ;;  %495 = vmatprep.subr.bf16.mxu0 %v560_v13  ;;  %v580_v33 = vld [vmem:[%s758_s0] ss:$16 sps:$4 sm:$0xff]   ;;  %v582_v34 = vld [vmem:[%s758_s0 + $0x4] ss:$16 sps:$4 sm:$0xff]   ;;  %v583_v35 = vld [vmem:[%s758_s0 + $0x8] ss:$16 sps:$4 sm:$0xff]  }
   0xe   :  { %523 = vmatprep.subr.bf16.mxu1 %v561_v14  ;;  %v585_v36 = vld [vmem:[%s758_s0 + $0xc] ss:$16 sps:$4 sm:$0xff]   ;;  %375 = vmatprep.mubr.bf16.mxu0 %v582_v34  ;;  %v586_v37 = vld [vmem:[%s758_s0 + $0x24] ss:$16 sps:$4 sm:$0xff]   ;;  %v590_v42 = vld [vmem:[%s758_s0 + $0x20] ss:$16 sps:$4 sm:$0xff]  }
   0xf   :  { %424 = vmatprep.mubr.bf16.mxu1 %v585_v36  ;;  %v588_v38 = vld [vmem:[%s758_s0 + $0x2c] ss:$16 sps:$4 sm:$0xff]   ;;  %v87_v39 = vld [vmem:[%s759_s2] sm:$0xff]  ;;  %v591_v44 = vld [vmem:[%s758_s0 + $0x28] ss:$16 sps:$4 sm:$0xff]   ;;  %108 = vperm.xlu1 %547, %v90_v43  }
  0x10   :  { %496 = vmatpush3.bf16.msra.mxu0 %v562_v15  ;;  %93 = vperm.xlu0 %546, %v87_v39   ;;  %v88_v41 = vld [vmem:[%s759_s2 + $0x8] sm:$0xff] }
  0x11   :  { %524 = vmatpush3.bf16.msra.mxu1 %v563_v16  ;;  %497 = vmatprep.subr.bf16.mxu0 %v564_v17 }
  0x12   :  { %525 = vmatprep.subr.bf16.mxu1 %v565_v18 }
  0x14   :  { %498 = vmatpush3.bf16.msra.mxu0 %v566_v19  ;;  %98 = vperm.xlu0 %546, %v88_v41  }
  0x15   :  { %526 = vmatpush3.bf16.msra.mxu1 %v567_v20  ;;  %499 = vmatprep.subr.bf16.mxu0 %v568_v21 }
  0x16   :  { %527 = vmatprep.subr.bf16.mxu1 %v569_v22 }
  0x18   :  { %500 = vmatpush3.bf16.msra.mxu0 %v570_v23 }
  0x19   :  { %528 = vmatpush3.bf16.msra.mxu1 %v571_v24  ;;  %501 = vmatprep.subr.bf16.mxu0 %v572_v25 }
  0x1a   :  { %529 = vmatprep.subr.bf16.mxu1 %v573_v26 }
  0x1c   :  { %502 = vmatpush3.bf16.msra.mxu0 %v574_v27 }
  0x1d   :  { %530 = vmatpush3.bf16.msra.mxu1 %v575_v28  ;;  %503 = vmatprep.subr.bf16.mxu0 %v576_v29 }
  0x1e   :  { %531 = vmatprep.subr.bf16.mxu1 %v577_v30 }
  0x20   :  { %504 = vmatpush3.bf16.msra.mxu0 %v578_v31 }
  0x21   :  { %532 = vmatpush3.bf16.msra.mxu1 %v579_v32 }
  0x23   :  { %376 = vmatmul.mubr.bf16.vlgmr.msra.gmra.mxu0 %v580_v33 }
  0x24   :  { %425 = vmatmul.mubr.bf16.vlgmr.msra.gmra.mxu1 %v583_v35  ;;  %383 = vmatprep.mubr.bf16.mxu0 %v586_v37 }
  0x25   :  { %432 = vmatprep.mubr.bf16.mxu1 %v588_v38 }
  0x2b   :  { %384 = vmatmul.mubr.bf16.gmra.mxu0 %v590_v42 }
  0x2c   :  { %433 = vmatmul.mubr.bf16.gmra.mxu1 %v591_v44 }
  0x85   :  { %v104_v0 = vpop.permute.xlu1 %103 }
  0x8a   :  { %v109_v13 = vpop.permute.xlu1 %108 }
  0x8b   :  { %v94_v46 = vpop.permute.xlu0 %93 }
  0x8f   :  { %v99_v56 = vpop.permute.xlu0 %98 }
  0xe3   :  { %v505_v45 = vpop.f32.mrf.mxu0 }
  0xe4   :  { %v533_v47 = vpop.f32.mrf.mxu1 }
  0xe5   :  { %v506_v48 = vpop.f32.mrf.mxu0 }
  0xe6   :  { %v507_v49 = vadd.f32 %v506_v48, %v505_v45  ;;  %v534_v50 = vpop.f32.mrf.mxu1 }
  0xe7   :  { %v508_v51 = vpop.f32.mrf.mxu0  ;;  %v535_v52 = vadd.f32 %v534_v50, %v533_v47 }
  0xe8   :  { %v378_v53 = vadd.f32 %v507_v49, %v94_v46  ;;  %v536_v54 = vpop.f32.mrf.mxu1 }
  0xe9   :  { %v509_v55 = vpop.f32.mrf.mxu0 }
  0xea   :  { %v427_v57 = vadd.f32 %v535_v52, %v378_v53  ;;  %v510_v58 = vadd.f32 %v509_v55, %v508_v51  ;;  %v537_v59 = vpop.f32.mrf.mxu1 }
  0xeb   :  { %v511_v60 = vpop.f32.mrf.mxu0  ;;  %v538_v61 = vadd.f32 %v537_v59, %v536_v54 }
  0xec   :  { %441 = vst [vmem:[%s760_s3] sm:$0xff] %v427_v57  ;;  %v381_v62 = vadd.f32 %v510_v58, %v99_v56  ;;  %v539_v63 = vpop.f32.mrf.mxu1 }
  0xed   :  { %v512_v1 = vpop.f32.mrf.mxu0 }
  0xee   :  { %v430_v2 = vadd.f32 %v538_v61, %v381_v62  ;;  %v513_v3 = vadd.f32 %v512_v1, %v511_v60  ;;  %v540_v4 = vpop.f32.mrf.mxu1 }
  0xef   :  { %v514_v5 = vpop.f32.mrf.mxu0  ;;  %v541_v7 = vadd.f32 %v540_v4, %v539_v63 }
  0xf0   :  { %442 = vst [vmem:[%s760_s3 + $0x8] sm:$0xff] %v430_v2  ;;  %v386_v6 = vadd.f32 %v513_v3, %v104_v0  ;;  %v542_v8 = vpop.f32.mrf.mxu1 }
  0xf1   :  { %v515_v9 = vpop.f32.mrf.mxu0 }
  0xf2   :  { %v435_v10 = vadd.f32 %v541_v7, %v386_v6  ;;  %v516_v11 = vadd.f32 %v515_v9, %v514_v5  ;;  %v543_v12 = vpop.f32.mrf.mxu1 }
  0xf3   :  { %v544_v15 = vadd.f32 %v543_v12, %v542_v8 }
  0xf4   :  { %443 = vst [vmem:[%s760_s3 + $0x10] sm:$0xff] %v435_v10  ;;  %v389_v14 = vadd.f32 %v516_v11, %v109_v13 }
  0xf6   :  { %v438_v16 = vadd.f32 %v544_v15, %v389_v14 }
  0xf8   :  { %444 = vst [vmem:[%s760_s3 + $0x18] sm:$0xff] %v438_v16 }

// kernel: forward_pallas.8
= control target key start
LH: loop header
LB: loop body
LE: loop exit
PB: predicated region body
PF: predicated region fallthrough
CT: control target
= control target key end

     0   :  { %v889_v1 = vmov 0   ;;  %v890_v40 = vmov 0.0   ;;  %vm891_vm0 = vmmov 0   ;;  %s1098_s1 = inlined_call_operand.vmem [shape: bf16[896,128], index: 1, kind: input, shape index: {}]   ;;  %s1099_s0 = inlined_call_operand.vmem [shape: bf16[8,896], index: 0, kind: input, shape index: {}]   ;;  %s1100_s2 = inlined_call_operand.vmem [shape: f32[8,1], index: 2, kind: input, shape index: {}]   ;;  %s1101_s3 = inlined_call_operand.vmem [shape: f32[8,128], index: 3, kind: output, shape index: {}]  }
   0x1   :  { %v826_v0 = vld [vmem:[%s1098_s1 + $0x78] sm:$0xff]   ;;  %825 = vset.pattern.permute.xlu0 %v889_v1  ;;  %v830_v5 = vld [vmem:[%s1098_s1 + $0x70] sm:$0xff]   ;;  %v834_v9 = vld [vmem:[%s1098_s1 + $0x68] sm:$0xff]  }
   0x2   :  { %v827_v2 = vld [vmem:[%s1098_s1 + $0xf8] sm:$0xff]   ;;  %727 = vmatprep.subr.bf16.mxu0 %v826_v0  ;;  %v831_v6 = vld [vmem:[%s1098_s1 + $0xf0] sm:$0xff]   ;;  %v835_v10 = vld [vmem:[%s1098_s1 + $0xe8] sm:$0xff]  }
   0x3   :  { %v828_v3 = vld [vmem:[%s1098_s1 + $0x38] sm:$0xff]   ;;  %749 = vmatprep.subr.bf16.mxu1 %v827_v2  ;;  %v832_v7 = vld [vmem:[%s1098_s1 + $0x30] sm:$0xff]   ;;  %v836_v11 = vld [vmem:[%s1098_s1 + $0x28] sm:$0xff]  }
   0x4   :  { %v829_v4 = vld [vmem:[%s1098_s1 + $0xb8] sm:$0xff]   ;;  %728 = vmatpush3.bf16.msra.mxu0 %v828_v3  ;;  %v833_v8 = vld [vmem:[%s1098_s1 + $0xb0] sm:$0xff]   ;;  %v837_v12 = vld [vmem:[%s1098_s1 + $0xa8] sm:$0xff]  }
   0x5   :  { %750 = vmatpush3.bf16.msra.mxu1 %v829_v4  ;;  %729 = vmatprep.subr.bf16.mxu0 %v830_v5  ;;  %v838_v13 = vld [vmem:[%s1098_s1 + $0x60] sm:$0xff]   ;;  %v842_v17 = vld [vmem:[%s1098_s1 + $0x58] sm:$0xff]   ;;  %v846_v21 = vld [vmem:[%s1098_s1 + $0x50] sm:$0xff]  }
   0x6   :  { %751 = vmatprep.subr.bf16.mxu1 %v831_v6  ;;  %v839_v14 = vld [vmem:[%s1098_s1 + $0xe0] sm:$0xff]   ;;  %v843_v18 = vld [vmem:[%s1098_s1 + $0xd8] sm:$0xff]   ;;  %v847_v22 = vld [vmem:[%s1098_s1 + $0xd0] sm:$0xff]  }
   0x7   :  { %v840_v15 = vld [vmem:[%s1098_s1 + $0x20] sm:$0xff]   ;;  %v844_v19 = vld [vmem:[%s1098_s1 + $0x18] sm:$0xff]   ;;  %v848_v23 = vld [vmem:[%s1098_s1 + $0x10] sm:$0xff]  }
   0x8   :  { %730 = vmatpush3.bf16.msra.mxu0 %v832_v7  ;;  %v841_v16 = vld [vmem:[%s1098_s1 + $0xa0] sm:$0xff]   ;;  %v845_v20 = vld [vmem:[%s1098_s1 + $0x98] sm:$0xff]   ;;  %v849_v24 = vld [vmem:[%s1098_s1 + $0x90] sm:$0xff]  }
   0x9   :  { %752 = vmatpush3.bf16.msra.mxu1 %v833_v8  ;;  %731 = vmatprep.subr.bf16.mxu0 %v834_v9  ;;  %v850_v25 = vld [vmem:[%s1098_s1 + $0x48] sm:$0xff]   ;;  %v854_v29 = vld [vmem:[%s1098_s1 + $0x40] sm:$0xff]   ;;  %v862_v39 = vld [vmem:[%s1098_s1 + $0x178] sm:$0xff]  }
   0xa   :  { %753 = vmatprep.subr.bf16.mxu1 %v835_v10  ;;  %v851_v26 = vld [vmem:[%s1098_s1 + $0xc8] sm:$0xff]   ;;  %v855_v30 = vld [vmem:[%s1098_s1 + $0xc0] sm:$0xff]   ;;  %v863_v41 = vld [vmem:[%s1098_s1 + $0x138] sm:$0xff]  }
   0xb   :  { %v852_v27 = vld [vmem:[%s1098_s1 + $0x8] sm:$0xff]   ;;  %v856_v31 = vld [vmem:[%s1098_s1] sm:$0xff]   ;;  %v864_v42 = vld [vmem:[%s1098_s1 + $0x1b8] sm:$0xff]  }
   0xc   :  { %732 = vmatpush3.bf16.msra.mxu0 %v836_v11  ;;  %v853_v28 = vld [vmem:[%s1098_s1 + $0x88] sm:$0xff]   ;;  %v857_v32 = vld [vmem:[%s1098_s1 + $0x80] sm:$0xff]   ;;  %v865_v43 = vld [vmem:[%s1098_s1 + $0x170] sm:$0xff]  }
   0xd   :  { %754 = vmatpush3.bf16.msra.mxu1 %v837_v12  ;;  %733 = vmatprep.subr.bf16.mxu0 %v838_v13  ;;  %v15_v33 = vld [vmem:[%s1099_s0] sm:$0xff]  ;;  %v16_v34 = vld [vmem:[%s1099_s0 + $0x8] sm:$0xff]  ;;  %v866_v44 = vld [vmem:[%s1098_s1 + $0x130] sm:$0xff]  }
   0xe   :  { %755 = vmatprep.subr.bf16.mxu1 %v839_v14  ;;  %v664_v35 = vcombine.low %v15_v33, %v15_v33  ;;  %v665_v36 = vcombine.high %v15_v33, %v15_v33  ;;  %v666_v37 = vcombine.low %v16_v34, %v16_v34  ;;  %v667_v38 = vcombine.high %v16_v34, %v16_v34  ;;  %v867_v45 = vld [vmem:[%s1098_s1 + $0x1b0] sm:$0xff]   ;;  %v868_v46 = vld [vmem:[%s1098_s1 + $0x168] sm:$0xff]   ;;  %v871_v49 = vld [vmem:[%s1098_s1 + $0x160] sm:$0xff]  }
   0xf   :  { %v870_v47 = vld [vmem:[%s1098_s1 + $0x1a8] sm:$0xff]   ;;  %v873_v50 = vld [vmem:[%s1098_s1 + $0x1a0] sm:$0xff]   ;;  %v874_v52 = vld [vmem:[%s1098_s1 + $0x158] sm:$0xff]  }
  0x10   :  { %734 = vmatpush3.bf16.msra.mxu0 %v840_v15  ;;  %530 = vmatprep.mubr.bf16.mxu0 %v665_v36  ;;  %v869_v48 = vld [vmem:[%s1098_s1 + $0x128] sm:$0xff]   ;;  %v872_v51 = vld [vmem:[%s1098_s1 + $0x120] sm:$0xff]   ;;  %v876_v53 = vld [vmem:[%s1098_s1 + $0x198] sm:$0xff]  }
  0x11   :  { %756 = vmatpush3.bf16.msra.mxu1 %v841_v16  ;;  %735 = vmatprep.subr.bf16.mxu0 %v842_v17  ;;  %v875_v54 = vld [vmem:[%s1098_s1 + $0x118] sm:$0xff]   ;;  %v877_v55 = vld [vmem:[%s1098_s1 + $0x150] sm:$0xff]   ;;  %v880_v58 = vld [vmem:[%s1098_s1 + $0x148] sm:$0xff]  }
  0x12   :  { %757 = vmatprep.subr.bf16.mxu1 %v843_v18  ;;  %570 = vmatprep.mubr.bf16.mxu1 %v667_v38  ;;  %v879_v56 = vld [vmem:[%s1098_s1 + $0x190] sm:$0xff]   ;;  %v882_v60 = vld [vmem:[%s1098_s1 + $0x188] sm:$0xff]   ;;  %v131_v62 = vld [vmem:[%s1100_s2] sm:$0xff] }
  0x13   :  { %v878_v57 = vld [vmem:[%s1098_s1 + $0x110] sm:$0xff]   ;;  %v881_v63 = vld [vmem:[%s1098_s1 + $0x108] sm:$0xff]   ;;  %v883_v0 = vld [vmem:[%s1098_s1 + $0x140] sm:$0xff]   ;;  %134 = vperm.xlu0 %825, %v131_v62  }
  0x14   :  { %736 = vmatpush3.bf16.msra.mxu0 %v844_v19  ;;  %v17_v59 = vld [vmem:[%s1099_s0 + $0x10] sm:$0xff]  ;;  %v885_v1 = vld [vmem:[%s1098_s1 + $0x180] sm:$0xff]   ;;  %v888_v3 = vld [vmem:[%s1099_s0 + $0x18] ss:$0 sps:$4 sm:$0xff]  }
  0x15   :  { %758 = vmatpush3.bf16.msra.mxu1 %v845_v20  ;;  %737 = vmatprep.subr.bf16.mxu0 %v846_v21  ;;  %v669_v61 = vcombine.high %v17_v59, %v17_v59  ;;  %v884_v2 = vld [vmem:[%s1098_s1 + $0x100] sm:$0xff]   ;;  %v668_v4 = vcombine.low %v17_v59, %v17_v59 }
  0x16   :  { %759 = vmatprep.subr.bf16.mxu1 %v847_v22 }
  0x18   :  { %738 = vmatpush3.bf16.msra.mxu0 %v848_v23 }
  0x19   :  { %760 = vmatpush3.bf16.msra.mxu1 %v849_v24  ;;  %739 = vmatprep.subr.bf16.mxu0 %v850_v25 }
  0x1a   :  { %761 = vmatprep.subr.bf16.mxu1 %v851_v26 }
  0x1c   :  { %740 = vmatpush3.bf16.msra.mxu0 %v852_v27 }
  0x1d   :  { %762 = vmatpush3.bf16.msra.mxu1 %v853_v28  ;;  %741 = vmatprep.subr.bf16.mxu0 %v854_v29 }
  0x1e   :  { %763 = vmatprep.subr.bf16.mxu1 %v855_v30 }
  0x20   :  { %742 = vmatpush3.bf16.msra.mxu0 %v856_v31 }
  0x21   :  { %764 = vmatpush3.bf16.msra.mxu1 %v857_v32  ;;  %771 = vmatprep.subr.bf16.mxu0 %v862_v39 }
  0x22   :  { %802 = vmatprep.subr.bf16.mxu1 %v890_v40 }
  0x23   :  { %531 = vmatmul.mubr.bf16.vlgmr.msra.gmra.mxu0 %v664_v35 }
  0x24   :  { %571 = vmatmul.mubr.bf16.vlgmr.msra.gmra.mxu1 %v666_v37  ;;  %772 = vmatpush3.bf16.msra.mxu0 %v863_v41 }
  0x25   :  { %803 = vmatpush3.bf16.msra.mxu1 %v864_v42  ;;  %773 = vmatprep.subr.bf16.mxu0 %v865_v43 }
  0x26   :  { %804 = vmatprep.subr.bf16.mxu1 %v890_v40  ;;  %818 = vmatprep.mubr.msk.bf16.mxu1 %vm891_vm0, %v890_v40 }
  0x27   :  { %610 = vmatprep.mubr.bf16.mxu0 %v669_v61 }
  0x28   :  { %774 = vmatpush3.bf16.msra.mxu0 %v866_v44 }
  0x29   :  { %805 = vmatpush3.bf16.msra.mxu1 %v867_v45  ;;  %775 = vmatprep.subr.bf16.mxu0 %v868_v46 }
  0x2a   :  { %806 = vmatprep.subr.bf16.mxu1 %v890_v40 }
  0x2c   :  { %776 = vmatpush3.bf16.msra.mxu0 %v869_v48 }
  0x2d   :  { %807 = vmatpush3.bf16.msra.mxu1 %v870_v47  ;;  %777 = vmatprep.subr.bf16.mxu0 %v871_v49 }
  0x2e   :  { %808 = vmatprep.subr.bf16.mxu1 %v890_v40 }
  0x30   :  { %778 = vmatpush3.bf16.msra.mxu0 %v872_v51 }
  0x31   :  { %809 = vmatpush3.bf16.msra.mxu1 %v873_v50  ;;  %779 = vmatprep.subr.bf16.mxu0 %v874_v52 }
  0x32   :  { %810 = vmatprep.subr.bf16.mxu1 %v890_v40 }
  0x34   :  { %780 = vmatpush3.bf16.msra.mxu0 %v875_v54 }
  0x35   :  { %811 = vmatpush3.bf16.msra.mxu1 %v876_v53  ;;  %781 = vmatprep.subr.bf16.mxu0 %v877_v55 }
  0x36   :  { %812 = vmatprep.subr.bf16.mxu1 %v890_v40 }
  0x38   :  { %782 = vmatpush3.bf16.msra.mxu0 %v878_v57 }
  0x39   :  { %813 = vmatpush3.bf16.msra.mxu1 %v879_v56  ;;  %783 = vmatprep.subr.bf16.mxu0 %v880_v58 }
  0x3a   :  { %814 = vmatprep.subr.bf16.mxu1 %v890_v40 }
  0x3c   :  { %784 = vmatpush3.bf16.msra.mxu0 %v881_v63 }
  0x3d   :  { %815 = vmatpush3.bf16.msra.mxu1 %v882_v60  ;;  %785 = vmatprep.subr.bf16.mxu0 %v883_v0 }
  0x3e   :  { %816 = vmatprep.subr.bf16.mxu1 %v890_v40 }
  0x40   :  { %786 = vmatpush3.bf16.msra.mxu0 %v884_v2 }
  0x41   :  { %817 = vmatpush3.bf16.msra.mxu1 %v885_v1 }
  0x43   :  { %611 = vmatmul.mubr.bf16.vlgmr.msra.gmra.mxu0 %v668_v4 }
  0x44   :  { %819 = vmatmul.mubr.bf16.vlgmr.msra.gmra.mxu1 %v888_v3 }
  0x8e   :  { %v135_v14 = vpop.permute.xlu0 %134 }
  0xe3   :  { %v743_v5 = vpop.f32.mrf.mxu0 }
  0xe4   :  { %v765_v6 = vpop.f32.mrf.mxu1 }
  0xe5   :  { %v744_v7 = vpop.f32.mrf.mxu0 }
  0xe6   :  { %v766_v8 = vpop.f32.mrf.mxu1  ;;  %v745_v13 = vadd.f32 %v744_v7, %v743_v5 }
  0xe7   :  { %v746_v9 = vpop.f32.mrf.mxu0  ;;  %v767_v15 = vadd.f32 %v766_v8, %v765_v6 }
  0xe8   :  { %v768_v10 = vpop.f32.mrf.mxu1  ;;  %v533_v16 = vadd.f32 %v745_v13, %v135_v14 }
  0xe9   :  { %v747_v11 = vpop.f32.mrf.mxu0 }
  0xea   :  { %v769_v12 = vpop.f32.mrf.mxu1  ;;  %v573_v21 = vadd.f32 %v767_v15, %v533_v16 }
 0x103   :  { %v787_v18 = vpop.f32.mrf.mxu0 }
 0x104   :  { %v652_v17 = vpop.f32.mrf.mxu1 }
 0x105   :  { %v788_v20 = vpop.f32.mrf.mxu0 }
 0x106   :  { %v820_v19 = vpop.f32.mrf.mxu1  ;;  %v789_v22 = vadd.f32 %v788_v20, %v787_v18 }
 0x107   :  { %v790_v24 = vpop.f32.mrf.mxu0 }
 0x108   :  { %v655_v23 = vpop.f32.mrf.mxu1  ;;  %v613_v25 = vadd.f32 %v789_v22, %v573_v21 }
 0x109   :  { %v791_v27 = vpop.f32.mrf.mxu0 }
 0x10a   :  { %v821_v26 = vpop.f32.mrf.mxu1  ;;  %v653_v28 = vadd.f32 %v652_v17, %v613_v25 }
 0x10c   :  { %v658_v29 = vmax.f32 %v653_v28, 0.0 }
 0x10e   :  { %659 = vst [vmem:[%s1101_s3] sm:$0xff] %v658_v29 }

// kernel: forward_pallas.9
= control target key start
LH: loop header
LB: loop body
LE: loop exit
PB: predicated region body
PF: predicated region fallthrough
CT: control target
= control target key end

     0   :  { %v229_v1 = vmov 0   ;;  %v35_v18 = vlaneseq  ;;  %s316_s1 = inlined_call_operand.vmem [shape: bf16[128,256], index: 1, kind: input, shape index: {}]   ;;  %s317_s0 = inlined_call_operand.vmem [shape: bf16[16,128], index: 0, kind: input, shape index: {}]   ;;  %s318_s2 = inlined_call_operand.vmem [shape: f32[1,256], index: 2, kind: input, shape index: {}]   ;;  %s319_s3 = inlined_call_operand.vmem [shape: f32[16,256], index: 3, kind: output, shape index: {}]  }
   0x1   :  { %v204_v0 = vld [vmem:[%s316_s1 + $0x74] ss:$8 sps:$4 sm:$0xff]   ;;  %163 = vmatprep.mubr.bf16.mxu0 %v229_v1  ;;  %v206_v2 = vld [vmem:[%s316_s1 + $0x70] ss:$8 sps:$4 sm:$0xff]   ;;  %v207_v3 = vld [vmem:[%s316_s1 + $0x64] ss:$8 sps:$4 sm:$0xff]  }
   0x2   :  { %131 = vmatprep.subr.bf16.mxu0 %v204_v0  ;;  %v209_v4 = vld [vmem:[%s316_s1 + $0x60] ss:$8 sps:$4 sm:$0xff]   ;;  %v210_v5 = vld [vmem:[%s316_s1 + $0x54] ss:$8 sps:$4 sm:$0xff]   ;;  %v212_v6 = vld [vmem:[%s316_s1 + $0x50] ss:$8 sps:$4 sm:$0xff]  }
   0x3   :  { %132 = vmatpush1.bf16.msra.mxu0 %v206_v2  ;;  %v213_v7 = vld [vmem:[%s316_s1 + $0x44] ss:$8 sps:$4 sm:$0xff]   ;;  %v215_v8 = vld [vmem:[%s316_s1 + $0x40] ss:$8 sps:$4 sm:$0xff]   ;;  %v216_v9 = vld [vmem:[%s316_s1 + $0x34] ss:$8 sps:$4 sm:$0xff]  }
   0x4   :  { %133 = vmatprep.subr.bf16.mxu0 %v207_v3  ;;  %v218_v10 = vld [vmem:[%s316_s1 + $0x30] ss:$8 sps:$4 sm:$0xff]   ;;  %v219_v11 = vld [vmem:[%s316_s1 + $0x24] ss:$8 sps:$4 sm:$0xff]   ;;  %v221_v12 = vld [vmem:[%s316_s1 + $0x20] ss:$8 sps:$4 sm:$0xff]  }
   0x5   :  { %v222_v13 = vld [vmem:[%s316_s1 + $0x14] ss:$8 sps:$4 sm:$0xff]   ;;  %v224_v14 = vld [vmem:[%s316_s1 + $0x10] ss:$8 sps:$4 sm:$0xff]   ;;  %v225_v15 = vld [vmem:[%s316_s1 + $0x4] ss:$8 sps:$4 sm:$0xff]  }
   0x6   :  { %v227_v16 = vld [vmem:[%s316_s1] ss:$8 sps:$4 sm:$0xff]   ;;  %v36_v19 = vshrl.u32 %v35_v18, 7 }
   0x7   :  { %134 = vmatpush1.bf16.msra.mxu0 %v209_v4  ;;  %v228_v17 = vld [vmem:[%s317_s0] sm:$0xff]  }
   0x8   :  { %135 = vmatprep.subr.bf16.mxu0 %v210_v5  ;;  %v37_v20 = vsub.s32 0, %v36_v19  ;;  %v33_v21 = vld [vmem:[%s318_s2] sm:$0x3]  ;;  %v41_v22 = vsub.s32 1, %v36_v19 }
   0xa   :  { %v38_v23 = vrot.slane %v33_v21, %v37_v20  ;;  %v42_v24 = vrot.slane %v33_v21, %v41_v22 }
   0xb   :  { %136 = vmatpush1.bf16.msra.mxu0 %v212_v6 }
   0xc   :  { %137 = vmatprep.subr.bf16.mxu0 %v213_v7 }
   0xf   :  { %138 = vmatpush1.bf16.msra.mxu0 %v215_v8 }
  0x10   :  { %139 = vmatprep.subr.bf16.mxu0 %v216_v9 }
  0x13   :  { %140 = vmatpush1.bf16.msra.mxu0 %v218_v10 }
  0x14   :  { %141 = vmatprep.subr.bf16.mxu0 %v219_v11 }
  0x17   :  { %142 = vmatpush1.bf16.msra.mxu0 %v221_v12 }
  0x18   :  { %143 = vmatprep.subr.bf16.mxu0 %v222_v13 }
  0x1b   :  { %144 = vmatpush1.bf16.msra.mxu0 %v224_v14 }
  0x1c   :  { %145 = vmatprep.subr.bf16.mxu0 %v225_v15 }
  0x1f   :  { %146 = vmatpush1.bf16.msra.mxu0 %v227_v16 }
  0x22   :  { %164 = vmatmul.mubr.bf16.vlgmr.msra.gmra.mxu0 %v228_v17 }
  0xe2   :  { %v165_v25 = vpop.f32.mrf.mxu0 }
  0xe3   :  { %v166_v26 = vadd.f32 %v165_v25, %v38_v23 }
  0xe4   :  { %v167_v27 = vpop.f32.mrf.mxu0 }
  0xe5   :  { %v174_v28 = vmax.f32 %v166_v26, 0.0  ;;  %v168_v29 = vadd.f32 %v167_v27, %v42_v24 }
  0xe6   :  { %v169_v30 = vpop.f32.mrf.mxu0 }
  0xe7   :  { %178 = vst [vmem:[%s319_s3] sm:$0xff] %v174_v28  ;;  %v175_v31 = vmax.f32 %v168_v29, 0.0  ;;  %v170_v32 = vadd.f32 %v169_v30, %v38_v23 }
  0xe8   :  { %v171_v33 = vpop.f32.mrf.mxu0 }
  0xe9   :  { %179 = vst [vmem:[%s319_s3 + $0x8] sm:$0xff] %v175_v31  ;;  %v176_v34 = vmax.f32 %v170_v32, 0.0  ;;  %v172_v35 = vadd.f32 %v171_v33, %v42_v24 }
  0xeb   :  { %180 = vst [vmem:[%s319_s3 + $0x10] sm:$0xff] %v176_v34  ;;  %v177_v36 = vmax.f32 %v172_v35, 0.0 }
  0xed   :  { %181 = vst [vmem:[%s319_s3 + $0x18] sm:$0xff] %v177_v36 }

// kernel: forward_pallas.10
= control target key start
LH: loop header
LB: loop body
LE: loop exit
PB: predicated region body
PF: predicated region fallthrough
CT: control target
= control target key end

     0   :  { %s2337_s1 = inlined_call_operand.vmem [shape: bf16[896,128], index: 1, kind: input, shape index: {}]   ;;  %s2338_s0 = inlined_call_operand.vmem [shape: bf16[128,896], index: 0, kind: input, shape index: {}]   ;;  %s2339_s2 = inlined_call_operand.vmem [shape: f32[1,128], index: 2, kind: input, shape index: {}]   ;;  %s2340_s3 = inlined_call_operand.vmem [shape: f32[128,128], index: 3, kind: output, shape index: {}]  }
   0x1   :  { %v1599_v0 = vld [vmem:[%s2337_s1 + $0x78] sm:$0xff]   ;;  %v1603_v4 = vld [vmem:[%s2337_s1 + $0x70] sm:$0xff]   ;;  %v1607_v8 = vld [vmem:[%s2337_s1 + $0x68] sm:$0xff]  }
   0x2   :  { %v1600_v1 = vld [vmem:[%s2337_s1 + $0x38] sm:$0xff]   ;;  %1359 = vmatprep.subr.bf16.mxu0 %v1599_v0  ;;  %v1604_v5 = vld [vmem:[%s2337_s1 + $0x30] sm:$0xff]   ;;  %v1608_v9 = vld [vmem:[%s2337_s1 + $0x28] sm:$0xff]  }
   0x3   :  { %v1601_v2 = vld [vmem:[%s2337_s1 + $0xf8] sm:$0xff]   ;;  %1360 = vmatpush3.bf16.msra.mxu0 %v1600_v1  ;;  %v1605_v6 = vld [vmem:[%s2337_s1 + $0xf0] sm:$0xff]   ;;  %v1609_v10 = vld [vmem:[%s2337_s1 + $0xe8] sm:$0xff]  }
   0x4   :  { %v1602_v3 = vld [vmem:[%s2337_s1 + $0xb8] sm:$0xff]   ;;  %1423 = vmatprep.subr.bf16.mxu1 %v1601_v2  ;;  %1361 = vmatprep.subr.bf16.mxu0 %v1603_v4  ;;  %v1606_v7 = vld [vmem:[%s2337_s1 + $0xb0] sm:$0xff]   ;;  %v1610_v11 = vld [vmem:[%s2337_s1 + $0xa8] sm:$0xff]  }
   0x5   :  { %1424 = vmatpush3.bf16.msra.mxu1 %v1602_v3  ;;  %v1611_v12 = vld [vmem:[%s2337_s1 + $0x60] sm:$0xff]   ;;  %v1615_v16 = vld [vmem:[%s2337_s1 + $0x58] sm:$0xff]   ;;  %v1619_v20 = vld [vmem:[%s2337_s1 + $0x50] sm:$0xff]  }
   0x6   :  { %1425 = vmatprep.subr.bf16.mxu1 %v1605_v6  ;;  %v1612_v13 = vld [vmem:[%s2337_s1 + $0x20] sm:$0xff]   ;;  %v1616_v17 = vld [vmem:[%s2337_s1 + $0x18] sm:$0xff]   ;;  %v1620_v21 = vld [vmem:[%s2337_s1 + $0x10] sm:$0xff]  }
   0x7   :  { %1362 = vmatpush3.bf16.msra.mxu0 %v1604_v5  ;;  %v1613_v14 = vld [vmem:[%s2337_s1 + $0xe0] sm:$0xff]   ;;  %v1617_v18 = vld [vmem:[%s2337_s1 + $0xd8] sm:$0xff]   ;;  %v1621_v22 = vld [vmem:[%s2337_s1 + $0xd0] sm:$0xff]  }
   0x8   :  { %1363 = vmatprep.subr.bf16.mxu0 %v1607_v8  ;;  %v1614_v15 = vld [vmem:[%s2337_s1 + $0xa0] sm:$0xff]   ;;  %v1618_v19 = vld [vmem:[%s2337_s1 + $0x98] sm:$0xff]   ;;  %v1622_v23 = vld [vmem:[%s2337_s1 + $0x90] sm:$0xff]  }
   0x9   :  { %1426 = vmatpush3.bf16.msra.mxu1 %v1606_v7  ;;  %v1623_v24 = vld [vmem:[%s2337_s1 + $0x48] sm:$0xff]   ;;  %v1627_v28 = vld [vmem:[%s2337_s1 + $0x40] sm:$0xff]   ;;  %v1634_v34 = vld [vmem:[%s2337_s1 + $0x178] sm:$0xff]  }
   0xa   :  { %1427 = vmatprep.subr.bf16.mxu1 %v1609_v10  ;;  %v1624_v25 = vld [vmem:[%s2337_s1 + $0x8] sm:$0xff]   ;;  %v1628_v29 = vld [vmem:[%s2337_s1] sm:$0xff]   ;;  %v1638_v37 = vld [vmem:[%s2337_s1 + $0x138] sm:$0xff]  }
   0xb   :  { %1364 = vmatpush3.bf16.msra.mxu0 %v1608_v9  ;;  %v1625_v26 = vld [vmem:[%s2337_s1 + $0xc8] sm:$0xff]   ;;  %v1629_v30 = vld [vmem:[%s2337_s1 + $0xc0] sm:$0xff]   ;;  %v1639_v38 = vld [vmem:[%s2338_s0 + $0x3c] ss:$28 sps:$4 sm:$0xff]  }
   0xc   :  { %1365 = vmatprep.subr.bf16.mxu0 %v1611_v12  ;;  %v1626_v27 = vld [vmem:[%s2337_s1 + $0x88] sm:$0xff]   ;;  %v1630_v31 = vld [vmem:[%s2338_s0] ss:$28 sps:$4 sm:$0xff]   ;;  %v1641_v39 = vld [vmem:[%s2338_s0 + $0x38] ss:$28 sps:$4 sm:$0xff]  }
   0xd   :  { %1428 = vmatpush3.bf16.msra.mxu1 %v1610_v11  ;;  %v1632_v32 = vld [vmem:[%s2338_s0 + $0x4] ss:$28 sps:$4 sm:$0xff]   ;;  %v1637_v36 = vld [vmem:[%s2338_s0 + $0xc] ss:$28 sps:$4 sm:$0xff]   ;;  %v1642_v40 = vld [vmem:[%s2337_s1 + $0x170] sm:$0xff]  }
   0xe   :  { %1429 = vmatprep.subr.bf16.mxu1 %v1613_v14  ;;  %v1633_v33 = vld [vmem:[%s2337_s1 + $0x80] sm:$0xff]   ;;  %854 = vmatprep.mubr.bf16.mxu0 %v1632_v32  ;;  %v1645_v42 = vld [vmem:[%s2337_s1 + $0x130] sm:$0xff]   ;;  %v1650_v45 = vld [vmem:[%s2337_s1 + $0x168] sm:$0xff]  }
   0xf   :  { %1366 = vmatpush3.bf16.msra.mxu0 %v1612_v13  ;;  %v1635_v35 = vld [vmem:[%s2338_s0 + $0x8] ss:$28 sps:$4 sm:$0xff]   ;;  %951 = vmatprep.mubr.bf16.mxu1 %v1637_v36  ;;  %v1646_v43 = vld [vmem:[%s2338_s0 + $0x40] ss:$28 sps:$4 sm:$0xff]   ;;  %v1647_v44 = vld [vmem:[%s2338_s0 + $0x74] ss:$28 sps:$4 sm:$0xff]  }
  0x10   :  { %1367 = vmatprep.subr.bf16.mxu0 %v1615_v16  ;;  %v1643_v41 = vld [vmem:[%s2338_s0 + $0x44] ss:$28 sps:$4 sm:$0xff]   ;;  %v1651_v46 = vld [vmem:[%s2338_s0 + $0x7c] ss:$28 sps:$4 sm:$0xff]   ;;  %v1653_v47 = vld [vmem:[%s2337_s1 + $0x128] sm:$0xff]  }
  0x11   :  { %1430 = vmatpush3.bf16.msra.mxu1 %v1614_v15  ;;  %v1649_v48 = vld [vmem:[%s2338_s0 + $0x70] ss:$28 sps:$4 sm:$0xff]   ;;  %v1658_v50 = vld [vmem:[%s2337_s1 + $0x160] sm:$0xff]   ;;  %v1654_v51 = vld [vmem:[%s2338_s0 + $0x78] ss:$28 sps:$4 sm:$0xff]  }
  0x12   :  { %1431 = vmatprep.subr.bf16.mxu1 %v1617_v18  ;;  %v1655_v49 = vld [vmem:[%s2338_s0 + $0xac] ss:$28 sps:$4 sm:$0xff]   ;;  %v1661_v52 = vld [vmem:[%s2337_s1 + $0x120] sm:$0xff]   ;;  %v1659_v53 = vld [vmem:[%s2338_s0 + $0xb4] ss:$28 sps:$4 sm:$0xff]  }
  0x13   :  { %1368 = vmatpush3.bf16.msra.mxu0 %v1616_v17  ;;  %v1666_v54 = vld [vmem:[%s2337_s1 + $0x158] sm:$0xff]   ;;  %v1657_v55 = vld [vmem:[%s2338_s0 + $0xa8] ss:$28 sps:$4 sm:$0xff]   ;;  %v1662_v59 = vld [vmem:[%s2338_s0 + $0xb0] ss:$28 sps:$4 sm:$0xff]  }
  0x14   :  { %1369 = vmatprep.subr.bf16.mxu0 %v1619_v20  ;;  %v1669_v56 = vld [vmem:[%s2337_s1 + $0x118] sm:$0xff]   ;;  %v1663_v57 = vld [vmem:[%s2338_s0 + $0xe4] ss:$28 sps:$4 sm:$0xff]   ;;  %v1667_v60 = vld [vmem:[%s2338_s0 + $0xec] ss:$28 sps:$4 sm:$0xff]  }
  0x15   :  { %1432 = vmatpush3.bf16.msra.mxu1 %v1618_v19  ;;  %v1671_v58 = vld [vmem:[%s2337_s1 + $0x1b8] sm:$0xff]   ;;  %v1675_v61 = vld [vmem:[%s2337_s1 + $0x150] sm:$0xff]   ;;  %v1681_v0 = vld [vmem:[%s2337_s1 + $0x1a8] sm:$0xff]  }
  0x16   :  { %1433 = vmatprep.subr.bf16.mxu1 %v1621_v22  ;;  %v1676_v62 = vld [vmem:[%s2337_s1 + $0x1b0] sm:$0xff]   ;;  %v1665_v1 = vld [vmem:[%s2338_s0 + $0xe0] ss:$28 sps:$4 sm:$0xff]   ;;  %v1670_v2 = vld [vmem:[%s2338_s0 + $0xe8] ss:$28 sps:$4 sm:$0xff]  }
  0x17   :  { %1370 = vmatpush3.bf16.msra.mxu0 %v1620_v21  ;;  %v1679_v63 = vld [vmem:[%s2337_s1 + $0x110] sm:$0xff]   ;;  %v1672_v3 = vld [vmem:[%s2338_s0 + $0x11c] ss:$28 sps:$4 sm:$0xff]   ;;  %v1685_v4 = vld [vmem:[%s2337_s1 + $0x148] sm:$0xff]  }
  0x18   :  { %1371 = vmatprep.subr.bf16.mxu0 %v1623_v24  ;;  %v1686_v5 = vld [vmem:[%s2337_s1 + $0x1a0] sm:$0xff]   ;;  %v1689_v7 = vld [vmem:[%s2337_s1 + $0x108] sm:$0xff]   ;;  %v1691_v8 = vld [vmem:[%s2337_s1 + $0x198] sm:$0xff]  }
  0x19   :  { %1434 = vmatpush3.bf16.msra.mxu1 %v1622_v23  ;;  %v1677_v6 = vld [vmem:[%s2338_s0 + $0x124] ss:$28 sps:$4 sm:$0xff]   ;;  %v1674_v9 = vld [vmem:[%s2338_s0 + $0x118] ss:$28 sps:$4 sm:$0xff]   ;;  %v1701_v16 = vld [vmem:[%s2337_s1 + $0x188] sm:$0xff]  }
  0x1a   :  { %1435 = vmatprep.subr.bf16.mxu1 %v1625_v26  ;;  %v1695_v10 = vld [vmem:[%s2337_s1 + $0x140] sm:$0xff]   ;;  %v1682_v12 = vld [vmem:[%s2338_s0 + $0x154] ss:$28 sps:$4 sm:$0xff]   ;;  %v1687_v15 = vld [vmem:[%s2338_s0 + $0x15c] ss:$28 sps:$4 sm:$0xff]  }
  0x1b   :  { %1372 = vmatpush3.bf16.msra.mxu0 %v1624_v25  ;;  %v1680_v11 = vld [vmem:[%s2338_s0 + $0x120] ss:$28 sps:$4 sm:$0xff]   ;;  %v1696_v13 = vld [vmem:[%s2337_s1 + $0x190] sm:$0xff]   ;;  %v1692_v18 = vld [vmem:[%s2338_s0 + $0x18c] ss:$28 sps:$4 sm:$0xff]  }
  0x1c   :  { %1373 = vmatprep.subr.bf16.mxu0 %v1627_v28  ;;  %v1699_v14 = vld [vmem:[%s2337_s1 + $0x100] sm:$0xff]   ;;  %v1684_v17 = vld [vmem:[%s2338_s0 + $0x150] ss:$28 sps:$4 sm:$0xff]   ;;  %v1690_v20 = vld [vmem:[%s2338_s0 + $0x158] ss:$28 sps:$4 sm:$0xff]  }
  0x1d   :  { %1436 = vmatpush3.bf16.msra.mxu1 %v1626_v27  ;;  %v1705_v19 = vld [vmem:[%s2337_s1 + $0x180] sm:$0xff]   ;;  %v1697_v21 = vld [vmem:[%s2338_s0 + $0x194] ss:$28 sps:$4 sm:$0xff]   ;;  %v1708_v27 = vld [vmem:[%s2338_s0 + $0x4c] ss:$28 sps:$4 sm:$0xff]  }
  0x1e   :  { %1437 = vmatprep.subr.bf16.mxu1 %v1629_v30  ;;  %v1694_v22 = vld [vmem:[%s2338_s0 + $0x188] ss:$28 sps:$4 sm:$0xff]   ;;  %v1704_v23 = vld [vmem:[%s2338_s0 + $0x14] ss:$28 sps:$4 sm:$0xff]   ;;  %v1715_v32 = vld [vmem:[%s2338_s0 + $0xc0] ss:$28 sps:$4 sm:$0xff]  }
  0x1f   :  { %1374 = vmatpush3.bf16.msra.mxu0 %v1628_v29  ;;  %v1700_v24 = vld [vmem:[%s2338_s0 + $0x190] ss:$28 sps:$4 sm:$0xff]   ;;  %v1706_v25 = vld [vmem:[%s2338_s0 + $0x18] ss:$28 sps:$4 sm:$0xff]   ;;  %v1714_v29 = vld [vmem:[%s2338_s0 + $0x88] ss:$28 sps:$4 sm:$0xff]  }
  0x20   :  { %1487 = vmatprep.subr.bf16.mxu0 %v1634_v34  ;;  %v1702_v26 = vld [vmem:[%s2338_s0 + $0x10] ss:$28 sps:$4 sm:$0xff]   ;;  %v1710_v30 = vld [vmem:[%s2338_s0 + $0x48] ss:$28 sps:$4 sm:$0xff]   ;;  %v1713_v34 = vld [vmem:[%s2338_s0 + $0x80] ss:$28 sps:$4 sm:$0xff]  }
  0x21   :  { %1438 = vmatpush3.bf16.msra.mxu1 %v1633_v33  ;;  %v1707_v28 = vld [vmem:[%s2338_s0 + $0x50] ss:$28 sps:$4 sm:$0xff]   ;;  %v1722_v33 = vld [vmem:[%s2338_s0 + $0xf8] ss:$28 sps:$4 sm:$0xff]  }
  0x22   :  { %855 = vmatmul.mubr.bf16.vlgmr.msra.gmra.mxu0 %v1630_v31  ;;  %1567 = vmatprep.subr.bf16.mxu1 %v1671_v58  ;;  %v1711_v31 = vld [vmem:[%s2338_s0 + $0x84] ss:$28 sps:$4 sm:$0xff]   ;;  %v1723_v36 = vld [vmem:[%s2338_s0 + $0x130] ss:$28 sps:$4 sm:$0xff]  }
  0x23   :  { %1488 = vmatpush3.bf16.msra.mxu0 %v1638_v37  ;;  %862 = vmatprep.mubr.bf16.mxu0 %v1639_v38  ;;  %v1730_v37 = vld [vmem:[%s2338_s0 + $0x168] ss:$28 sps:$4 sm:$0xff]   ;;  %v1718_v38 = vld [vmem:[%s2338_s0 + $0xb8] ss:$28 sps:$4 sm:$0xff]  }
  0x24   :  { %952 = vmatmul.mubr.bf16.vlgmr.msra.gmra.mxu1 %v1635_v35  ;;  %1489 = vmatprep.subr.bf16.mxu0 %v1642_v40  ;;  %v1716_v35 = vld [vmem:[%s2338_s0 + $0xbc] ss:$28 sps:$4 sm:$0xff]  }
  0x25   :  { %959 = vmatprep.mubr.bf16.mxu1 %v1643_v41  ;;  %1568 = vmatpush3.bf16.msra.mxu1 %v1671_v58  ;;  %v1731_v40 = vld [vmem:[%s2338_s0 + $0x1a0] ss:$28 sps:$4 sm:$0xff]   ;;  %v1721_v41 = vld [vmem:[%s2338_s0 + $0xf0] ss:$28 sps:$4 sm:$0xff]  }
  0x26   :  { %1569 = vmatprep.subr.bf16.mxu1 %v1676_v62 }
  0x27   :  { %1490 = vmatpush3.bf16.msra.mxu0 %v1645_v42  ;;  %v1724_v42 = vld [vmem:[%s2338_s0 + $0x12c] ss:$28 sps:$4 sm:$0xff]  }
  0x28   :  { %1491 = vmatprep.subr.bf16.mxu0 %v1650_v45  ;;  %v1729_v45 = vld [vmem:[%s2338_s0 + $0x160] ss:$28 sps:$4 sm:$0xff]  }
  0x29   :  { %1570 = vmatpush3.bf16.msra.mxu1 %v1676_v62 }
  0x2a   :  { %863 = vmatmul.mubr.bf16.gmra.mxu0 %v1641_v39  ;;  %1571 = vmatprep.subr.bf16.mxu1 %v1681_v0  ;;  %v1719_v39 = vld [vmem:[%s2338_s0 + $0xf4] ss:$28 sps:$4 sm:$0xff]  }
  0x2b   :  { %870 = vmatprep.mubr.bf16.mxu0 %v1647_v44  ;;  %1492 = vmatpush3.bf16.msra.mxu0 %v1653_v47  ;;  %v1727_v44 = vld [vmem:[%s2338_s0 + $0x164] ss:$28 sps:$4 sm:$0xff]   ;;  %v1734_v47 = vld [vmem:[%s2338_s0 + $0x198] ss:$28 sps:$4 sm:$0xff]  }
  0x2c   :  { %960 = vmatmul.mubr.bf16.gmra.mxu1 %v1646_v43  ;;  %1493 = vmatprep.subr.bf16.mxu0 %v1658_v50  ;;  %v1726_v43 = vld [vmem:[%s2338_s0 + $0x128] ss:$28 sps:$4 sm:$0xff]  }
  0x2d   :  { %967 = vmatprep.mubr.bf16.mxu1 %v1651_v46  ;;  %1572 = vmatpush3.bf16.msra.mxu1 %v1681_v0  ;;  %v1732_v46 = vld [vmem:[%s2338_s0 + $0x19c] ss:$28 sps:$4 sm:$0xff]  }
  0x2e   :  { %1573 = vmatprep.subr.bf16.mxu1 %v1686_v5 }
  0x2f   :  { %1494 = vmatpush3.bf16.msra.mxu0 %v1661_v52 }
  0x30   :  { %1495 = vmatprep.subr.bf16.mxu0 %v1666_v54 }
  0x31   :  { %1574 = vmatpush3.bf16.msra.mxu1 %v1686_v5 }
  0x32   :  { %871 = vmatmul.mubr.bf16.gmra.mxu0 %v1649_v48  ;;  %1575 = vmatprep.subr.bf16.mxu1 %v1691_v8 }
  0x33   :  { %878 = vmatprep.mubr.bf16.mxu0 %v1655_v49  ;;  %1496 = vmatpush3.bf16.msra.mxu0 %v1669_v56 }
  0x34   :  { %968 = vmatmul.mubr.bf16.gmra.mxu1 %v1654_v51  ;;  %1497 = vmatprep.subr.bf16.mxu0 %v1675_v61 }
  0x35   :  { %975 = vmatprep.mubr.bf16.mxu1 %v1659_v53  ;;  %1576 = vmatpush3.bf16.msra.mxu1 %v1691_v8 }
  0x36   :  { %1577 = vmatprep.subr.bf16.mxu1 %v1696_v13 }
  0x37   :  { %1498 = vmatpush3.bf16.msra.mxu0 %v1679_v63 }
  0x38   :  { %1499 = vmatprep.subr.bf16.mxu0 %v1685_v4 }
  0x39   :  { %1578 = vmatpush3.bf16.msra.mxu1 %v1696_v13 }
  0x3a   :  { %879 = vmatmul.mubr.bf16.gmra.mxu0 %v1657_v55  ;;  %1579 = vmatprep.subr.bf16.mxu1 %v1701_v16 }
  0x3b   :  { %886 = vmatprep.mubr.bf16.mxu0 %v1663_v57  ;;  %1500 = vmatpush3.bf16.msra.mxu0 %v1689_v7 }
  0x3c   :  { %976 = vmatmul.mubr.bf16.gmra.mxu1 %v1662_v59  ;;  %1501 = vmatprep.subr.bf16.mxu0 %v1695_v10 }
  0x3d   :  { %983 = vmatprep.mubr.bf16.mxu1 %v1667_v60  ;;  %1580 = vmatpush3.bf16.msra.mxu1 %v1701_v16 }
  0x3e   :  { %1581 = vmatprep.subr.bf16.mxu1 %v1705_v19 }
  0x3f   :  { %1502 = vmatpush3.bf16.msra.mxu0 %v1699_v14 }
  0x41   :  { %1582 = vmatpush3.bf16.msra.mxu1 %v1705_v19 }
  0x42   :  { %887 = vmatmul.mubr.bf16.gmra.mxu0 %v1665_v1 }
  0x43   :  { %894 = vmatprep.mubr.bf16.mxu0 %v1672_v3 }
  0x44   :  { %984 = vmatmul.mubr.bf16.gmra.mxu1 %v1670_v2 }
  0x45   :  { %991 = vmatprep.mubr.bf16.mxu1 %v1677_v6 }
  0x4a   :  { %895 = vmatmul.mubr.bf16.gmra.mxu0 %v1674_v9 }
  0x4b   :  { %902 = vmatprep.mubr.bf16.mxu0 %v1682_v12 }
  0x4c   :  { %992 = vmatmul.mubr.bf16.gmra.mxu1 %v1680_v11 }
  0x4d   :  { %999 = vmatprep.mubr.bf16.mxu1 %v1687_v15 }
  0x52   :  { %903 = vmatmul.mubr.bf16.gmra.mxu0 %v1684_v17 }
  0x53   :  { %910 = vmatprep.mubr.bf16.mxu0 %v1692_v18 }
  0x54   :  { %1000 = vmatmul.mubr.bf16.gmra.mxu1 %v1690_v20 }
  0x55   :  { %1007 = vmatprep.mubr.bf16.mxu1 %v1697_v21 }
  0x5a   :  { %911 = vmatmul.mubr.bf16.gmra.mxu0 %v1694_v22 }
  0x5b   :  { %1048 = vmatprep.mubr.bf16.mxu0 %v1704_v23 }
  0x5c   :  { %1008 = vmatmul.mubr.bf16.gmra.mxu1 %v1700_v24 }
  0x5d   :  { %1583 = vmatprep.mubr.bf16.mxu1 %v1706_v25 }
  0x62   :  { %1049 = vmatmul.mubr.bf16.vlgmr.msra.gmra.mxu0 %v1702_v26 }
  0x63   :  { %1056 = vmatprep.mubr.bf16.mxu0 %v1708_v27 }
  0x64   :  { %1584 = vmatmul.mubr.bf16.vlgmr.msra.gmra.mxu1 %v1707_v28 }
  0x65   :  { %1587 = vmatprep.mubr.bf16.mxu1 %v1714_v29 }
  0x6a   :  { %1057 = vmatmul.mubr.bf16.gmra.mxu0 %v1710_v30 }
  0x6b   :  { %1064 = vmatprep.mubr.bf16.mxu0 %v1711_v31 }
  0x6c   :  { %1588 = vmatmul.mubr.bf16.gmra.mxu1 %v1715_v32 }
  0x6d   :  { %1591 = vmatprep.mubr.bf16.mxu1 %v1722_v33 }
  0x72   :  { %1065 = vmatmul.mubr.bf16.gmra.mxu0 %v1713_v34 }
  0x73   :  { %1072 = vmatprep.mubr.bf16.mxu0 %v1716_v35 }
  0x74   :  { %1592 = vmatmul.mubr.bf16.gmra.mxu1 %v1723_v36 }
  0x75   :  { %1595 = vmatprep.mubr.bf16.mxu1 %v1730_v37 }
  0x7a   :  { %1073 = vmatmul.mubr.bf16.gmra.mxu0 %v1718_v38 }
  0x7b   :  { %1080 = vmatprep.mubr.bf16.mxu0 %v1719_v39 }
  0x7c   :  { %1596 = vmatmul.mubr.bf16.gmra.mxu1 %v1731_v40 }
  0x82   :  { %1081 = vmatmul.mubr.bf16.gmra.mxu0 %v1721_v41 }
  0x83   :  { %1088 = vmatprep.mubr.bf16.mxu0 %v1724_v42 }
  0x8a   :  { %1089 = vmatmul.mubr.bf16.gmra.mxu0 %v1726_v43 }
  0x8b   :  { %1096 = vmatprep.mubr.bf16.mxu0 %v1727_v44  ;;  %v2202_v44 = vld [vmem:[%s2339_s2] ss:$0 sm:$0xff] }
  0x92   :  { %1097 = vmatmul.mubr.bf16.gmra.mxu0 %v1729_v45 }
  0x93   :  { %1104 = vmatprep.mubr.bf16.mxu0 %v1732_v46 }
  0x9a   :  { %1105 = vmatmul.mubr.bf16.gmra.mxu0 %v1734_v47 }
  0xe2   :  { %v1375_v48 = vpop.f32.mrf.mxu0 }
  0xe4   :  { %v1376_v49 = vpop.f32.mrf.mxu0  ;;  %v2091_v50 = vpop.f32.mrf.mxu1 }
  0xe5   :  { %v1377_v42 = vadd.f32 %v1376_v49, %v1375_v48 }
  0xe6   :  { %v2093_v51 = vpop.f32.mrf.mxu0  ;;  %v1440_v52 = vpop.f32.mrf.mxu1 }
  0xe8   :  { %v1379_v53 = vpop.f32.mrf.mxu0  ;;  %v2095_v54 = vpop.f32.mrf.mxu1 }
  0xea   :  { %v2097_v55 = vpop.f32.mrf.mxu0  ;;  %v2099_v56 = vpop.f32.mrf.mxu1 }
  0xec   :  { %v1382_v57 = vpop.f32.mrf.mxu0  ;;  %v2101_v58 = vpop.f32.mrf.mxu1 }
  0xee   :  { %v2103_v59 = vpop.f32.mrf.mxu0  ;;  %v2105_v60 = vpop.f32.mrf.mxu1 }
  0xf0   :  { %v2107_v61 = vpop.f32.mrf.mxu0  ;;  %v2109_v62 = vpop.f32.mrf.mxu1 }
  0xf2   :  { %v2111_v63 = vpop.f32.mrf.mxu0  ;;  %v2113_v0 = vpop.f32.mrf.mxu1 }
  0xf4   :  { %v2115_v1 = vpop.f32.mrf.mxu0  ;;  %v2117_v2 = vpop.f32.mrf.mxu1 }
  0xf6   :  { %v2119_v3 = vpop.f32.mrf.mxu0  ;;  %v2121_v4 = vpop.f32.mrf.mxu1 }
  0xf8   :  { %v2123_v5 = vpop.f32.mrf.mxu0  ;;  %v2125_v6 = vpop.f32.mrf.mxu1 }
  0xfa   :  { %v2127_v7 = vpop.f32.mrf.mxu0  ;;  %v2129_v8 = vpop.f32.mrf.mxu1 }
  0xfc   :  { %v2131_v9 = vpop.f32.mrf.mxu0  ;;  %v2133_v10 = vpop.f32.mrf.mxu1 }
  0xfe   :  { %v2135_v11 = vpop.f32.mrf.mxu0  ;;  %v2137_v12 = vpop.f32.mrf.mxu1 }
 0x100   :  { %v2139_v13 = vpop.f32.mrf.mxu0  ;;  %v2141_v14 = vpop.f32.mrf.mxu1 }
 0x102   :  { %v2143_v15 = vpop.f32.mrf.mxu0  ;;  %v2145_v16 = vpop.f32.mrf.mxu1 }
 0x104   :  { %v2147_v17 = vpop.f32.mrf.mxu0  ;;  %v2149_v18 = vpop.f32.mrf.mxu1 }
 0x106   :  { %v2151_v19 = vpop.f32.mrf.mxu0  ;;  %v2153_v20 = vpop.f32.mrf.mxu1 }
 0x108   :  { %v2155_v21 = vpop.f32.mrf.mxu0  ;;  %v2157_v22 = vpop.f32.mrf.mxu1 }
 0x10a   :  { %v2159_v23 = vpop.f32.mrf.mxu0  ;;  %v2161_v24 = vpop.f32.mrf.mxu1 }
 0x10c   :  { %v2163_v25 = vpop.f32.mrf.mxu0  ;;  %v2165_v26 = vpop.f32.mrf.mxu1 }
 0x10e   :  { %v2167_v27 = vpop.f32.mrf.mxu0  ;;  %v2169_v28 = vpop.f32.mrf.mxu1 }
 0x110   :  { %v2171_v29 = vpop.f32.mrf.mxu0  ;;  %v2173_v30 = vpop.f32.mrf.mxu1 }
 0x112   :  { %v2175_v31 = vpop.f32.mrf.mxu0  ;;  %v2177_v32 = vpop.f32.mrf.mxu1 }
 0x114   :  { %v2179_v33 = vpop.f32.mrf.mxu0  ;;  %v2181_v34 = vpop.f32.mrf.mxu1 }
 0x116   :  { %v2183_v35 = vpop.f32.mrf.mxu0  ;;  %v2185_v36 = vpop.f32.mrf.mxu1 }
 0x117   :  { %2341 = vst [vmem:[#allocation2_spill] sm:$0xff] %v2183_v35  ;;  %2342 = vst [vmem:[#allocation3_spill] sm:$0xff] %v2185_v36 }
 0x118   :  { %v2187_v37 = vpop.f32.mrf.mxu0  ;;  %v2189_v38 = vpop.f32.mrf.mxu1 }
 0x119   :  { %2343 = vst [vmem:[#allocation4_spill] sm:$0xff] %v2187_v37  ;;  %2344 = vst [vmem:[#allocation5_spill] sm:$0xff] %v2189_v38  ;;  %v857_v38 = vadd.f32 %v1377_v42, %v2202_v44 }
 0x11a   :  { %v2191_v39 = vpop.f32.mrf.mxu0  ;;  %v2193_v40 = vpop.f32.mrf.mxu1 }
 0x11b   :  { %2345 = vst [vmem:[#allocation6_spill] sm:$0xff] %v2191_v39  ;;  %2346 = vst [vmem:[#allocation7_spill] sm:$0xff] %v2193_v40  ;;  %v1441_v40 = vadd.f32 %v1440_v52, %v2091_v50  ;;  %v1383_v39 = vadd.f32 %v1382_v57, %v2097_v55  ;;  %v1386_v55 = vadd.f32 %v2107_v61, %v2103_v59 }
 0x11c   :  { %v2195_v41 = vpop.f32.mrf.mxu0  ;;  %v2197_v43 = vpop.f32.mrf.mxu1 }
 0x11d   :  { %2347 = vst [vmem:[#allocation8_spill] sm:$0xff] %v2195_v41  ;;  %2348 = vst [vmem:[#allocation9_spill] sm:$0xff] %v2197_v43  ;;  %v1380_v41 = vadd.f32 %v1379_v53, %v2093_v51  ;;  %v954_v35 = vadd.f32 %v1441_v40, %v857_v38  ;;  %v865_v51 = vadd.f32 %v1383_v39, %v2202_v44 }
 0x11e   :  { %v2204_v45 = vpop.f32.mrf.mxu0  ;;  %v2206_v46 = vpop.f32.mrf.mxu1  ;;  %v1447_v53 = vadd.f32 %v2105_v60, %v2101_v58  ;;  %v1450_v58 = vadd.f32 %v2113_v0, %v2109_v62  ;;  %v1392_v62 = vadd.f32 %v2123_v5, %v2119_v3  ;;  %v1456_v3 = vadd.f32 %v2129_v8, %v2125_v6 }
 0x11f   :  { %2349 = vst [vmem:[#allocation10_spill] sm:$0xff] %v2204_v45  ;;  %2350 = vst [vmem:[#allocation11_spill] sm:$0xff] %v2206_v46  ;;  %v860_v45 = vadd.f32 %v1380_v41, %v2202_v44  ;;  %v1398_v6 = vadd.f32 %v2139_v13, %v2135_v11  ;;  %v1462_v11 = vadd.f32 %v2145_v16, %v2141_v14 }
 0x120   :  { %v2208_v47 = vpop.f32.mrf.mxu0  ;;  %v2213_v48 = vpop.f32.mrf.mxu1  ;;  %v1404_v14 = vadd.f32 %v2155_v21, %v2151_v19  ;;  %v1468_v19 = vadd.f32 %v2161_v24, %v2157_v22  ;;  %v1410_v22 = vadd.f32 %v2171_v29, %v2167_v27  ;;  %v1474_v27 = vadd.f32 %v2177_v32, %v2173_v30 }
 0x121   :  { %2351 = vst [vmem:[#allocation12_spill] sm:$0xff] %v2208_v47  ;;  %2352 = vst [vmem:[#allocation13_spill] sm:$0xff] %v2213_v48  ;;  %v1444_v47 = vadd.f32 %v2099_v56, %v2095_v54 }
 0x122   :  { %v1503_v49 = vpop.f32.mrf.mxu0  ;;  %v2215_v43 = vpop.f32.mrf.mxu1 }
 0x123   :  { %2353 = vst [vmem:[#allocation14_spill] sm:$0xff] %v2215_v43  ;;  %v957_v48 = vadd.f32 %v1444_v47, %v860_v45 }
 0x124   :  { %v1504_v37 = vpop.f32.mrf.mxu0  ;;  %v1585_v42 = vpop.f32.mrf.mxu1 }
 0x125   :  { %v1505_v46 = vadd.f32 %v1504_v37, %v1503_v49  ;;  %v962_v49 = vadd.f32 %v1447_v53, %v865_v51 }
 0x126   :  { %v1506_v36 = vpop.f32.mrf.mxu0  ;;  %v1147_v52 = vpop.f32.mrf.mxu1 }
 0x127   :  { %v1051_v50 = vadd.f32 %v1505_v46, %v954_v35  ;;  %v1389_v35 = vadd.f32 %v2115_v1, %v2111_v63  ;;  %v868_v46 = vadd.f32 %v1386_v55, %v2202_v44  ;;  %v1453_v63 = vadd.f32 %v2121_v4, %v2117_v2 }
 0x128   :  { %v1507_v43 = vpop.f32.mrf.mxu0  ;;  %v1586_v40 = vpop.f32.mrf.mxu1  ;;  %v876_v4 = vadd.f32 %v1392_v62, %v2202_v44 }
 0x129   :  { %v1508_v57 = vadd.f32 %v1507_v43, %v1506_v36  ;;  %v1148_v38 = vadd.f32 %v1147_v52, %v1051_v50  ;;  %v873_v47 = vadd.f32 %v1389_v35, %v2202_v44 }
 0x12a   :  { %v1509_v41 = vpop.f32.mrf.mxu0  ;;  %v1150_v37 = vpop.f32.mrf.mxu1  ;;  %v973_v35 = vadd.f32 %v1456_v3, %v876_v4 }
 0x12b   :  { %v1210_v54 = vmax.f32 %v1148_v38, 0.0  ;;  %v1054_v56 = vadd.f32 %v1508_v57, %v957_v48  ;;  %v965_v48 = vadd.f32 %v1450_v58, %v868_v46  ;;  %v970_v57 = vadd.f32 %v1453_v63, %v873_v47 }
 0x12c   :  { %v1510_v39 = vpop.f32.mrf.mxu0  ;;  %v1589_v36 = vpop.f32.mrf.mxu1  ;;  %v1395_v38 = vadd.f32 %v2131_v9, %v2127_v7  ;;  %v1459_v7 = vadd.f32 %v2137_v12, %v2133_v10  ;;  %v884_v12 = vadd.f32 %v1398_v6, %v2202_v44 }
 0x12d   :  { %1226 = vst [vmem:[%s2340_s3] sm:$0xff] %v1210_v54  ;;  %v1511_v59 = vadd.f32 %v1510_v39, %v1509_v41  ;;  %v1151_v60 = vadd.f32 %v1150_v37, %v1054_v56 }
 0x12e   :  { %v1512_v61 = vpop.f32.mrf.mxu0  ;;  %v1163_v51 = vpop.f32.mrf.mxu1  ;;  %v981_v62 = vadd.f32 %v1462_v11, %v884_v12 }
 0x12f   :  { %v1059_v43 = vadd.f32 %v1511_v59, %v962_v49  ;;  %v1211_v45 = vmax.f32 %v1151_v60, 0.0  ;;  %v881_v49 = vadd.f32 %v1395_v38, %v2202_v44 }
 0x130   :  { %v1513_v1 = vpop.f32.mrf.mxu0  ;;  %v1590_v54 = vpop.f32.mrf.mxu1 }
 0x131   :  { %v1156_v0 = vadd.f32 %v1585_v42, %v1059_v43  ;;  %1227 = vst [vmem:[%s2340_s3 + $0x8] sm:$0xff] %v1211_v45  ;;  %v1514_v50 = vadd.f32 %v1513_v1, %v1512_v61  ;;  %v978_v60 = vadd.f32 %v1459_v7, %v881_v49  ;;  %v1401_v61 = vadd.f32 %v2147_v17, %v2143_v15 }
 0x132   :  { %v1515_v52 = vpop.f32.mrf.mxu0  ;;  %v1166_v46 = vpop.f32.mrf.mxu1  ;;  %v1465_v15 = vadd.f32 %v2153_v20, %v2149_v18  ;;  %v892_v20 = vadd.f32 %v1404_v14, %v2202_v44 }
 0x133   :  { %v1212_v53 = vmax.f32 %v1156_v0, 0.0  ;;  %v1062_v55 = vadd.f32 %v1514_v50, %v965_v48  ;;  %v889_v48 = vadd.f32 %v1401_v61, %v2202_v44  ;;  %v2356_v61 = vld [vmem:[#allocation4_spill] sm:$0xff] }
 0x134   :  { %v1516_v2 = vpop.f32.mrf.mxu0  ;;  %v1593_v47 = vpop.f32.mrf.mxu1 }
 0x135   :  { %1228 = vst [vmem:[%s2340_s3 + $0x10] sm:$0xff] %v1212_v53  ;;  %v1159_v5 = vadd.f32 %v1586_v40, %v1062_v55  ;;  %v1517_v42 = vadd.f32 %v1516_v2, %v1515_v52  ;;  %v986_v55 = vadd.f32 %v1465_v15, %v889_v48 }
 0x136   :  { %v1518_v41 = vpop.f32.mrf.mxu0  ;;  %v1179_v52 = vpop.f32.mrf.mxu1 }
 0x137   :  { %v1213_v56 = vmax.f32 %v1159_v5, 0.0  ;;  %v1067_v37 = vadd.f32 %v1517_v42, %v970_v57  ;;  %v1407_v57 = vadd.f32 %v2163_v25, %v2159_v23  ;;  %v1471_v23 = vadd.f32 %v2169_v28, %v2165_v26 }
 0x138   :  { %v1519_v9 = vpop.f32.mrf.mxu0  ;;  %v1594_v2 = vpop.f32.mrf.mxu1  ;;  %v989_v42 = vadd.f32 %v1468_v19, %v892_v20  ;;  %v900_v28 = vadd.f32 %v1410_v22, %v2202_v44 }
 0x139   :  { %1229 = vst [vmem:[%s2340_s3 + $0x18] sm:$0xff] %v1213_v56  ;;  %v1520_v8 = vadd.f32 %v1519_v9, %v1518_v41  ;;  %v1164_v40 = vadd.f32 %v1163_v51, %v1067_v37  ;;  %v897_v5 = vadd.f32 %v1407_v57, %v2202_v44  ;;  %v1413_v9 = vadd.f32 %v2179_v33, %v2175_v31  ;;  %v2354_v31 = vld [vmem:[#allocation3_spill] sm:$0xff] }
 0x13a   :  { %v1521_v39 = vpop.f32.mrf.mxu0  ;;  %v1182_v56 = vpop.f32.mrf.mxu1  ;;  %v1477_v33 = vadd.f32 %v2354_v31, %v2181_v34  ;;  %v2362_v57 = vld [vmem:[#allocation11_spill] sm:$0xff] }
 0x13b   :  { %v1214_v58 = vmax.f32 %v1164_v40, 0.0  ;;  %v1070_v59 = vadd.f32 %v1520_v8, %v973_v35  ;;  %v994_v7 = vadd.f32 %v1471_v23, %v897_v5 }
 0x13c   :  { %v1522_v10 = vpop.f32.mrf.mxu0  ;;  %v1597_v8 = vpop.f32.mrf.mxu1 }
 0x13d   :  { %1230 = vst [vmem:[%s2340_s3 + $0x20] sm:$0xff] %v1214_v58  ;;  %v1523_v13 = vadd.f32 %v1522_v10, %v1521_v39  ;;  %v1167_v43 = vadd.f32 %v1166_v46, %v1070_v59  ;;  %v905_v46 = vadd.f32 %v1413_v9, %v2202_v44  ;;  %v997_v59 = vadd.f32 %v1474_v27, %v900_v28 }
 0x13e   :  { %v1524_v45 = vpop.f32.mrf.mxu0  ;;  %v1195_v11 = vpop.f32.mrf.mxu1 }
 0x13f   :  { %v1075_v63 = vadd.f32 %v1523_v13, %v978_v60  ;;  %v1215_v1 = vmax.f32 %v1167_v43, 0.0  ;;  %v2355_v60 = vld [vmem:[#allocation2_spill] sm:$0xff] }
 0x140   :  { %v1525_v17 = vpop.f32.mrf.mxu0  ;;  %v1416_v30 = vadd.f32 %v2356_v61, %v2355_v60 }
 0x141   :  { %v1172_v16 = vadd.f32 %v1589_v36, %v1075_v63  ;;  %1231 = vst [vmem:[%s2340_s3 + $0x28] sm:$0xff] %v1215_v1  ;;  %v1526_v0 = vadd.f32 %v1525_v17, %v1524_v45  ;;  %v1002_v45 = vadd.f32 %v1477_v33, %v905_v46  ;;  %v2357_v63 = vld [vmem:[#allocation6_spill] sm:$0xff]  ;;  %v2358_v1 = vld [vmem:[#allocation8_spill] sm:$0xff]  ;;  %v2359_v17 = vld [vmem:[#allocation5_spill] sm:$0xff] }
 0x142   :  { %v1527_v50 = vpop.f32.mrf.mxu0  ;;  %v1419_v48 = vadd.f32 %v2358_v1, %v2357_v63  ;;  %v908_v15 = vadd.f32 %v1416_v30, %v2202_v44 }
 0x143   :  { %v1216_v51 = vmax.f32 %v1172_v16, 0.0  ;;  %v1078_v53 = vadd.f32 %v1526_v0, %v981_v62  ;;  %v2360_v62 = vld [vmem:[#allocation7_spill] sm:$0xff] }
 0x144   :  { %v1528_v18 = vpop.f32.mrf.mxu0  ;;  %v1480_v14 = vadd.f32 %v2360_v62, %v2359_v17 }
 0x145   :  { %1232 = vst [vmem:[%s2340_s3 + $0x30] sm:$0xff] %v1216_v51  ;;  %v1175_v21 = vadd.f32 %v1590_v54, %v1078_v53  ;;  %v1529_v36 = vadd.f32 %v1528_v18, %v1527_v50  ;;  %v1598_v50 = vpop.f32.mrf.mxu1  ;;  %v913_v53 = vadd.f32 %v1419_v48, %v2202_v44 }
 0x146   :  { %v1530_v38 = vpop.f32.mrf.mxu0  ;;  %v1005_v19 = vadd.f32 %v1480_v14, %v908_v15 }
 0x147   :  { %v1217_v4 = vmax.f32 %v1175_v21, 0.0  ;;  %v1083_v3 = vadd.f32 %v1529_v36, %v986_v55  ;;  %v2361_v55 = vld [vmem:[#allocation9_spill] sm:$0xff]  ;;  %v2363_v21 = vld [vmem:[#allocation10_spill] sm:$0xff]  ;;  %v2364_v36 = vld [vmem:[#allocation12_spill] sm:$0xff]  ;;  %v1198_v5 = vpop.f32.mrf.mxu1 }
 0x148   :  { %v1531_v25 = vpop.f32.mrf.mxu0  ;;  %v1483_v18 = vadd.f32 %v2362_v57, %v2361_v55 }
 0x149   :  { %1233 = vst [vmem:[%s2340_s3 + $0x38] sm:$0xff] %v1217_v4  ;;  %v1532_v24 = vadd.f32 %v1531_v25, %v1530_v38  ;;  %v1180_v41 = vadd.f32 %v1179_v52, %v1083_v3  ;;  %v1422_v38 = vadd.f32 %v2364_v36, %v2363_v21 }
 0x14a   :  { %v1533_v54 = vpop.f32.mrf.mxu0 }
 0x14b   :  { %v1218_v37 = vmax.f32 %v1180_v41, 0.0  ;;  %v1086_v49 = vadd.f32 %v1532_v24, %v989_v42  ;;  %v1010_v42 = vadd.f32 %v1483_v18, %v913_v53  ;;  %v916_v24 = vadd.f32 %v1422_v38, %v2202_v44  ;;  %v2365_v41 = vld [vmem:[#allocation13_spill] sm:$0xff] }
 0x14c   :  { %v1534_v26 = vpop.f32.mrf.mxu0 }
 0x14d   :  { %1234 = vst [vmem:[%s2340_s3 + $0x40] sm:$0xff] %v1218_v37  ;;  %v1535_v29 = vadd.f32 %v1534_v26, %v1533_v54  ;;  %v1183_v35 = vadd.f32 %v1182_v56, %v1086_v49  ;;  %v2366_v54 = vld [vmem:[#allocation14_spill] sm:$0xff] }
 0x14e   :  { %v1536_v6 = vpop.f32.mrf.mxu0  ;;  %v1486_v56 = vadd.f32 %v2366_v54, %v2365_v41 }
 0x14f   :  { %v1091_v40 = vadd.f32 %v1535_v29, %v994_v7  ;;  %v1219_v39 = vmax.f32 %v1183_v35, 0.0 }
 0x150   :  { %v1537_v58 = vpop.f32.mrf.mxu0  ;;  %v1013_v27 = vadd.f32 %v1486_v56, %v916_v24 }
 0x151   :  { %v1188_v32 = vadd.f32 %v1593_v47, %v1091_v40  ;;  %1235 = vst [vmem:[%s2340_s3 + $0x48] sm:$0xff] %v1219_v39  ;;  %v1538_v10 = vadd.f32 %v1537_v58, %v1536_v6 }
 0x152   :  { %v1539_v12 = vpop.f32.mrf.mxu0 }
 0x153   :  { %v1220_v13 = vmax.f32 %v1188_v32, 0.0  ;;  %v1094_v43 = vadd.f32 %v1538_v10, %v997_v59 }
 0x154   :  { %v1540_v34 = vpop.f32.mrf.mxu0 }
 0x155   :  { %1236 = vst [vmem:[%s2340_s3 + $0x50] sm:$0xff] %v1220_v13  ;;  %v1191_v47 = vadd.f32 %v1594_v2, %v1094_v43  ;;  %v1541_v16 = vadd.f32 %v1540_v34, %v1539_v12 }
 0x156   :  { %v1542_v0 = vpop.f32.mrf.mxu0 }
 0x157   :  { %v1221_v52 = vmax.f32 %v1191_v47, 0.0  ;;  %v1099_v51 = vadd.f32 %v1541_v16, %v1002_v45 }
 0x158   :  { %v1543_v20 = vpop.f32.mrf.mxu0 }
 0x159   :  { %1237 = vst [vmem:[%s2340_s3 + $0x58] sm:$0xff] %v1221_v52  ;;  %v1544_v2 = vadd.f32 %v1543_v20, %v1542_v0  ;;  %v1196_v4 = vadd.f32 %v1195_v11, %v1099_v51 }
 0x15a   :  { %v1545_v3 = vpop.f32.mrf.mxu0 }
 0x15b   :  { %v1222_v23 = vmax.f32 %v1196_v4, 0.0  ;;  %v1102_v25 = vadd.f32 %v1544_v2, %v1005_v19 }
 0x15c   :  { %v1546_v22 = vpop.f32.mrf.mxu0 }
 0x15d   :  { %1238 = vst [vmem:[%s2340_s3 + $0x60] sm:$0xff] %v1222_v23  ;;  %v1547_v37 = vadd.f32 %v1546_v22, %v1545_v3  ;;  %v1199_v49 = vadd.f32 %v1198_v5, %v1102_v25 }
 0x15e   :  { %v1548_v7 = vpop.f32.mrf.mxu0 }
 0x15f   :  { %v1107_v9 = vadd.f32 %v1547_v37, %v1010_v42  ;;  %v1223_v26 = vmax.f32 %v1199_v49, 0.0 }
 0x160   :  { %v1549_v28 = vpop.f32.mrf.mxu0 }
 0x161   :  { %v1204_v29 = vadd.f32 %v1597_v8, %v1107_v9  ;;  %1239 = vst [vmem:[%s2340_s3 + $0x68] sm:$0xff] %v1223_v26  ;;  %v1550_v44 = vadd.f32 %v1549_v28, %v1548_v7 }
 0x163   :  { %v1224_v35 = vmax.f32 %v1204_v29, 0.0  ;;  %v1110_v6 = vadd.f32 %v1550_v44, %v1013_v27 }
 0x165   :  { %1240 = vst [vmem:[%s2340_s3 + $0x70] sm:$0xff] %v1224_v35  ;;  %v1207_v40 = vadd.f32 %v1598_v50, %v1110_v6 }
 0x167   :  { %v1225_v39 = vmax.f32 %v1207_v40, 0.0 }
 0x169   :  { %1241 = vst [vmem:[%s2340_s3 + $0x78] sm:$0xff] %v1225_v39 }

// kernel: forward_pallas.11
= control target key start
LH: loop header
LB: loop body
LE: loop exit
PB: predicated region body
PF: predicated region fallthrough
CT: control target
= control target key end

     0   :  { %s2072_s12 = smov 0   ;;  %s2074_s13 = smov 0   ;;  %s2564_s0 = inlined_call_operand.vmem [shape: bf16[8,512], index: 0, kind: input, shape index: {}]   ;;  %s2565_s1 = inlined_call_operand.vmem [shape: bf16[512,1024], index: 1, kind: input, shape index: {}]   ;;  %s2566_s2 = inlined_call_operand.vmem [shape: f32[8,1], index: 2, kind: input, shape index: {}]   ;;  %s2567_s3 = inlined_call_operand.vmem [shape: f32[8,1024], index: 3, kind: output, shape index: {}]  }
   0x1   :  { %s2076_s14 = smov 0   ;;  %s2078_s15 = smov 0  }
   0x2   :  { %s2080_s16 = smov 0  }
   0x3 LB: > { %s22_s17 = sadd.s32 1, %s2045_s15  ;;  %p65_p1 = scmp.ne.s32.totalorder %s2037_s13, %s2033_s12  ;;  %s2049_s16 = sphi %s2080_s16, %s13_s16   ;;  %s2045_s15 = sphi %s2078_s15, %s2571_s15   ;;  %s2041_s14 = sphi %s2076_s14, %s2570_s14   ;;  %s2037_s13 = sphi %s2074_s13, %s2569_s13   ;;  %s2033_s12 = sphi %s2072_s12, %s2568_s12  }
   0x4   : > { %p23_p0 = scmp.ge.s32.totalorder %s22_s17, 2  ;;  %p66_p2 = scmp.eq.s32.totalorder %s2049_s16, 0 }
   0x5   : > { %s58_s19 = sadd.s32 1, %s2037_s13  ;;  %p1610_p5 = scmp.ge.s32.totalorder %s2049_s16, 2 }
   0x6   : > { %s2573_s17 = smov (%p23_p0, %s22_s17), 0  ;;  %p67_p3 = por %p66_p2, %p65_p1 }
   0x7   : > { %s55_s18 = ssub.s32 %s2045_s15, %s2573_s17  ;;  %160 = sbr.rel (%p1610_p5) target bundleno = 80 (0x50), region = 24 }
   0x8   : > { %p56_p4 = scmp.eq.s32.totalorder %s55_s18, 0 }
   0xa   : > { %s2107_s20 = scalar_select %p56_p4, %s2037_s13, %s58_s19  }
   0xc   : > { %163 = sbr.rel (!%p67_p3) target bundleno = 80 (0x50), region = 28  ;;  %s165_s21 = sand.u32 (%p67_p3), 1, %s2037_s13  }
   0xd   : > { %s1756_s22 = sshll.u32 (%p67_p3), %s2045_s15, 4  ;;  %s1611_s23 = sshll.u32 (%p67_p3), %s165_s21, 10 }
   0xe   : > { %s2115_s26 = scalar_lea.vmem (%p67_p3), %s2565_s1, %s1756_s22  ;;  %s2120_s27 = scalar_lea.vmem (%p67_p3), [#allocation2], %s1611_s23 }
   0xf   : > { %v183_v0 = vld [vmem:[%s2115_s26] sm:$0xff] (%p67_p3)  ;;  %v185_v1 = vld [vmem:[%s2115_s26 + $0x8] sm:$0xff] (%p67_p3) }
  0x10   : > { %v187_v2 = vld [vmem:[%s2115_s26 + $0x20] sm:$0xff] (%p67_p3)  ;;  %184 = vst [vmem:[%s2120_s27] sm:$0xff] (%p67_p3), %v183_v0  ;;  %186 = vst [vmem:[%s2120_s27 + $0x8] sm:$0xff] (%p67_p3), %v185_v1  ;;  %v189_v3 = vld [vmem:[%s2115_s26 + $0x28] sm:$0xff] (%p67_p3) }
  0x11   : > { %188 = vst [vmem:[%s2120_s27 + $0x10] sm:$0xff] %v187_v2  ;;  %v191_v4 = vld [vmem:[%s2115_s26 + $0x40] sm:$0xff]  ;;  %v193_v5 = vld [vmem:[%s2115_s26 + $0x48] sm:$0xff]  ;;  %190 = vst [vmem:[%s2120_s27 + $0x18] sm:$0xff] %v189_v3 }
  0x12   : > { %192 = vst [vmem:[%s2120_s27 + $0x20] sm:$0xff] %v191_v4  ;;  %194 = vst [vmem:[%s2120_s27 + $0x28] sm:$0xff] %v193_v5  ;;  %v195_v6 = vld [vmem:[%s2115_s26 + $0x60] sm:$0xff]  ;;  %v197_v7 = vld [vmem:[%s2115_s26 + $0x68] sm:$0xff] }
  0x13   : > { %v199_v8 = vld [vmem:[%s2115_s26 + $0x80] sm:$0xff]  ;;  %196 = vst [vmem:[%s2120_s27 + $0x30] sm:$0xff] %v195_v6  ;;  %198 = vst [vmem:[%s2120_s27 + $0x38] sm:$0xff] %v197_v7  ;;  %v201_v9 = vld [vmem:[%s2115_s26 + $0x88] sm:$0xff] }
  0x14   : > { %200 = vst [vmem:[%s2120_s27 + $0x40] sm:$0xff] %v199_v8  ;;  %v203_v10 = vld [vmem:[%s2115_s26 + $0xa0] sm:$0xff]  ;;  %v205_v11 = vld [vmem:[%s2115_s26 + $0xa8] sm:$0xff]  ;;  %202 = vst [vmem:[%s2120_s27 + $0x48] sm:$0xff] %v201_v9 }
  0x15   : > { %204 = vst [vmem:[%s2120_s27 + $0x50] sm:$0xff] %v203_v10  ;;  %206 = vst [vmem:[%s2120_s27 + $0x58] sm:$0xff] %v205_v11  ;;  %v207_v12 = vld [vmem:[%s2115_s26 + $0xc0] sm:$0xff]  ;;  %v209_v13 = vld [vmem:[%s2115_s26 + $0xc8] sm:$0xff] }
  0x16   : > { %v211_v14 = vld [vmem:[%s2115_s26 + $0xe0] sm:$0xff]  ;;  %208 = vst [vmem:[%s2120_s27 + $0x60] sm:$0xff] %v207_v12  ;;  %210 = vst [vmem:[%s2120_s27 + $0x68] sm:$0xff] %v209_v13  ;;  %v213_v15 = vld [vmem:[%s2115_s26 + $0xe8] sm:$0xff] }
  0x17   : > { %212 = vst [vmem:[%s2120_s27 + $0x70] sm:$0xff] %v211_v14  ;;  %v215_v16 = vld [vmem:[%s2115_s26 + $0x100] sm:$0xff]  ;;  %v217_v17 = vld [vmem:[%s2115_s26 + $0x108] sm:$0xff]  ;;  %214 = vst [vmem:[%s2120_s27 + $0x78] sm:$0xff] %v213_v15 }
  0x18   : > { %216 = vst [vmem:[%s2120_s27 + $0x80] sm:$0xff] %v215_v16  ;;  %218 = vst [vmem:[%s2120_s27 + $0x88] sm:$0xff] %v217_v17  ;;  %v219_v18 = vld [vmem:[%s2115_s26 + $0x120] sm:$0xff]  ;;  %v221_v19 = vld [vmem:[%s2115_s26 + $0x128] sm:$0xff] }
  0x19   : > { %v223_v20 = vld [vmem:[%s2115_s26 + $0x140] sm:$0xff]  ;;  %220 = vst [vmem:[%s2120_s27 + $0x90] sm:$0xff] %v219_v18  ;;  %222 = vst [vmem:[%s2120_s27 + $0x98] sm:$0xff] %v221_v19  ;;  %v225_v21 = vld [vmem:[%s2115_s26 + $0x148] sm:$0xff] }
  0x1a   : > { %224 = vst [vmem:[%s2120_s27 + $0xa0] sm:$0xff] %v223_v20  ;;  %v227_v22 = vld [vmem:[%s2115_s26 + $0x160] sm:$0xff]  ;;  %v229_v23 = vld [vmem:[%s2115_s26 + $0x168] sm:$0xff]  ;;  %226 = vst [vmem:[%s2120_s27 + $0xa8] sm:$0xff] %v225_v21 }
  0x1b   : > { %228 = vst [vmem:[%s2120_s27 + $0xb0] sm:$0xff] %v227_v22  ;;  %230 = vst [vmem:[%s2120_s27 + $0xb8] sm:$0xff] %v229_v23  ;;  %v231_v24 = vld [vmem:[%s2115_s26 + $0x180] sm:$0xff]  ;;  %v233_v25 = vld [vmem:[%s2115_s26 + $0x188] sm:$0xff] }
  0x1c   : > { %v235_v26 = vld [vmem:[%s2115_s26 + $0x1a0] sm:$0xff]  ;;  %232 = vst [vmem:[%s2120_s27 + $0xc0] sm:$0xff] %v231_v24  ;;  %234 = vst [vmem:[%s2120_s27 + $0xc8] sm:$0xff] %v233_v25  ;;  %v237_v27 = vld [vmem:[%s2115_s26 + $0x1a8] sm:$0xff] }
  0x1d   : > { %236 = vst [vmem:[%s2120_s27 + $0xd0] sm:$0xff] %v235_v26  ;;  %v239_v28 = vld [vmem:[%s2115_s26 + $0x1c0] sm:$0xff]  ;;  %v241_v29 = vld [vmem:[%s2115_s26 + $0x1c8] sm:$0xff]  ;;  %238 = vst [vmem:[%s2120_s27 + $0xd8] sm:$0xff] %v237_v27 }
  0x1e   : > { %240 = vst [vmem:[%s2120_s27 + $0xe0] sm:$0xff] %v239_v28  ;;  %242 = vst [vmem:[%s2120_s27 + $0xe8] sm:$0xff] %v241_v29  ;;  %v243_v30 = vld [vmem:[%s2115_s26 + $0x1e0] sm:$0xff]  ;;  %v245_v31 = vld [vmem:[%s2115_s26 + $0x1e8] sm:$0xff] }
  0x1f   : > { %v247_v32 = vld [vmem:[%s2115_s26 + $0x200] sm:$0xff]  ;;  %244 = vst [vmem:[%s2120_s27 + $0xf0] sm:$0xff] %v243_v30  ;;  %246 = vst [vmem:[%s2120_s27 + $0xf8] sm:$0xff] %v245_v31  ;;  %v249_v33 = vld [vmem:[%s2115_s26 + $0x208] sm:$0xff] }
  0x20   : > { %248 = vst [vmem:[%s2120_s27 + $0x100] sm:$0xff] %v247_v32  ;;  %v251_v34 = vld [vmem:[%s2115_s26 + $0x220] sm:$0xff]  ;;  %v253_v35 = vld [vmem:[%s2115_s26 + $0x228] sm:$0xff]  ;;  %250 = vst [vmem:[%s2120_s27 + $0x108] sm:$0xff] %v249_v33 }
  0x21   : > { %252 = vst [vmem:[%s2120_s27 + $0x110] sm:$0xff] %v251_v34  ;;  %254 = vst [vmem:[%s2120_s27 + $0x118] sm:$0xff] %v253_v35  ;;  %v255_v36 = vld [vmem:[%s2115_s26 + $0x240] sm:$0xff]  ;;  %v257_v37 = vld [vmem:[%s2115_s26 + $0x248] sm:$0xff] }
  0x22   : > { %v259_v38 = vld [vmem:[%s2115_s26 + $0x260] sm:$0xff]  ;;  %256 = vst [vmem:[%s2120_s27 + $0x120] sm:$0xff] %v255_v36  ;;  %258 = vst [vmem:[%s2120_s27 + $0x128] sm:$0xff] %v257_v37  ;;  %v261_v39 = vld [vmem:[%s2115_s26 + $0x268] sm:$0xff] }
  0x23   : > { %260 = vst [vmem:[%s2120_s27 + $0x130] sm:$0xff] %v259_v38  ;;  %v263_v40 = vld [vmem:[%s2115_s26 + $0x280] sm:$0xff]  ;;  %v265_v41 = vld [vmem:[%s2115_s26 + $0x288] sm:$0xff]  ;;  %262 = vst [vmem:[%s2120_s27 + $0x138] sm:$0xff] %v261_v39 }
  0x24   : > { %264 = vst [vmem:[%s2120_s27 + $0x140] sm:$0xff] %v263_v40  ;;  %266 = vst [vmem:[%s2120_s27 + $0x148] sm:$0xff] %v265_v41  ;;  %v267_v42 = vld [vmem:[%s2115_s26 + $0x2a0] sm:$0xff]  ;;  %v269_v43 = vld [vmem:[%s2115_s26 + $0x2a8] sm:$0xff] }
  0x25   : > { %v271_v44 = vld [vmem:[%s2115_s26 + $0x2c0] sm:$0xff]  ;;  %268 = vst [vmem:[%s2120_s27 + $0x150] sm:$0xff] %v267_v42  ;;  %270 = vst [vmem:[%s2120_s27 + $0x158] sm:$0xff] %v269_v43  ;;  %v273_v45 = vld [vmem:[%s2115_s26 + $0x2c8] sm:$0xff] }
  0x26   : > { %272 = vst [vmem:[%s2120_s27 + $0x160] sm:$0xff] %v271_v44  ;;  %v275_v46 = vld [vmem:[%s2115_s26 + $0x2e0] sm:$0xff]  ;;  %v277_v47 = vld [vmem:[%s2115_s26 + $0x2e8] sm:$0xff]  ;;  %274 = vst [vmem:[%s2120_s27 + $0x168] sm:$0xff] %v273_v45 }
  0x27   : > { %276 = vst [vmem:[%s2120_s27 + $0x170] sm:$0xff] %v275_v46  ;;  %278 = vst [vmem:[%s2120_s27 + $0x178] sm:$0xff] %v277_v47  ;;  %v279_v48 = vld [vmem:[%s2115_s26 + $0x300] sm:$0xff]  ;;  %v281_v49 = vld [vmem:[%s2115_s26 + $0x308] sm:$0xff] }
  0x28   : > { %v283_v50 = vld [vmem:[%s2115_s26 + $0x320] sm:$0xff]  ;;  %280 = vst [vmem:[%s2120_s27 + $0x180] sm:$0xff] %v279_v48  ;;  %282 = vst [vmem:[%s2120_s27 + $0x188] sm:$0xff] %v281_v49  ;;  %v285_v51 = vld [vmem:[%s2115_s26 + $0x328] sm:$0xff] }
  0x29   : > { %284 = vst [vmem:[%s2120_s27 + $0x190] sm:$0xff] %v283_v50  ;;  %v287_v52 = vld [vmem:[%s2115_s26 + $0x340] sm:$0xff]  ;;  %v289_v53 = vld [vmem:[%s2115_s26 + $0x348] sm:$0xff]  ;;  %286 = vst [vmem:[%s2120_s27 + $0x198] sm:$0xff] %v285_v51 }
  0x2a   : > { %288 = vst [vmem:[%s2120_s27 + $0x1a0] sm:$0xff] %v287_v52  ;;  %290 = vst [vmem:[%s2120_s27 + $0x1a8] sm:$0xff] %v289_v53  ;;  %v291_v54 = vld [vmem:[%s2115_s26 + $0x360] sm:$0xff]  ;;  %v293_v55 = vld [vmem:[%s2115_s26 + $0x368] sm:$0xff] }
  0x2b   : > { %v295_v56 = vld [vmem:[%s2115_s26 + $0x380] sm:$0xff]  ;;  %292 = vst [vmem:[%s2120_s27 + $0x1b0] sm:$0xff] %v291_v54  ;;  %294 = vst [vmem:[%s2120_s27 + $0x1b8] sm:$0xff] %v293_v55  ;;  %v297_v57 = vld [vmem:[%s2115_s26 + $0x388] sm:$0xff] }
  0x2c   : > { %296 = vst [vmem:[%s2120_s27 + $0x1c0] sm:$0xff] %v295_v56  ;;  %v299_v58 = vld [vmem:[%s2115_s26 + $0x3a0] sm:$0xff]  ;;  %v301_v59 = vld [vmem:[%s2115_s26 + $0x3a8] sm:$0xff]  ;;  %298 = vst [vmem:[%s2120_s27 + $0x1c8] sm:$0xff] %v297_v57 }
  0x2d   : > { %300 = vst [vmem:[%s2120_s27 + $0x1d0] sm:$0xff] %v299_v58  ;;  %302 = vst [vmem:[%s2120_s27 + $0x1d8] sm:$0xff] %v301_v59  ;;  %v303_v60 = vld [vmem:[%s2115_s26 + $0x3c0] sm:$0xff]  ;;  %v305_v61 = vld [vmem:[%s2115_s26 + $0x3c8] sm:$0xff] }
  0x2e   : > { %v307_v62 = vld [vmem:[%s2115_s26 + $0x3e0] sm:$0xff]  ;;  %304 = vst [vmem:[%s2120_s27 + $0x1e0] sm:$0xff] %v303_v60  ;;  %306 = vst [vmem:[%s2120_s27 + $0x1e8] sm:$0xff] %v305_v61  ;;  %v309_v63 = vld [vmem:[%s2115_s26 + $0x3e8] sm:$0xff] }
  0x2f   : > { %308 = vst [vmem:[%s2120_s27 + $0x1f0] sm:$0xff] %v307_v62  ;;  %v311_v0 = vld [vmem:[%s2115_s26 + $0x400] sm:$0xff]  ;;  %v313_v1 = vld [vmem:[%s2115_s26 + $0x408] sm:$0xff]  ;;  %310 = vst [vmem:[%s2120_s27 + $0x1f8] sm:$0xff] %v309_v63 }
  0x30   : > { %312 = vst [vmem:[%s2120_s27 + $0x200] sm:$0xff] %v311_v0  ;;  %314 = vst [vmem:[%s2120_s27 + $0x208] sm:$0xff] %v313_v1  ;;  %v315_v2 = vld [vmem:[%s2115_s26 + $0x420] sm:$0xff]  ;;  %v317_v3 = vld [vmem:[%s2115_s26 + $0x428] sm:$0xff] }
  0x31   : > { %v319_v4 = vld [vmem:[%s2115_s26 + $0x440] sm:$0xff]  ;;  %316 = vst [vmem:[%s2120_s27 + $0x210] sm:$0xff] %v315_v2  ;;  %318 = vst [vmem:[%s2120_s27 + $0x218] sm:$0xff] %v317_v3  ;;  %v321_v5 = vld [vmem:[%s2115_s26 + $0x448] sm:$0xff] }
  0x32   : > { %320 = vst [vmem:[%s2120_s27 + $0x220] sm:$0xff] %v319_v4  ;;  %v323_v6 = vld [vmem:[%s2115_s26 + $0x460] sm:$0xff]  ;;  %v325_v7 = vld [vmem:[%s2115_s26 + $0x468] sm:$0xff]  ;;  %322 = vst [vmem:[%s2120_s27 + $0x228] sm:$0xff] %v321_v5 }
  0x33   : > { %324 = vst [vmem:[%s2120_s27 + $0x230] sm:$0xff] %v323_v6  ;;  %326 = vst [vmem:[%s2120_s27 + $0x238] sm:$0xff] %v325_v7  ;;  %v327_v8 = vld [vmem:[%s2115_s26 + $0x480] sm:$0xff]  ;;  %v329_v9 = vld [vmem:[%s2115_s26 + $0x488] sm:$0xff] }
  0x34   : > { %v331_v10 = vld [vmem:[%s2115_s26 + $0x4a0] sm:$0xff]  ;;  %328 = vst [vmem:[%s2120_s27 + $0x240] sm:$0xff] %v327_v8  ;;  %330 = vst [vmem:[%s2120_s27 + $0x248] sm:$0xff] %v329_v9  ;;  %v333_v11 = vld [vmem:[%s2115_s26 + $0x4a8] sm:$0xff] }
  0x35   : > { %332 = vst [vmem:[%s2120_s27 + $0x250] sm:$0xff] %v331_v10  ;;  %v335_v12 = vld [vmem:[%s2115_s26 + $0x4c0] sm:$0xff]  ;;  %v337_v13 = vld [vmem:[%s2115_s26 + $0x4c8] sm:$0xff]  ;;  %334 = vst [vmem:[%s2120_s27 + $0x258] sm:$0xff] %v333_v11 }
  0x36   : > { %336 = vst [vmem:[%s2120_s27 + $0x260] sm:$0xff] %v335_v12  ;;  %338 = vst [vmem:[%s2120_s27 + $0x268] sm:$0xff] %v337_v13  ;;  %v339_v14 = vld [vmem:[%s2115_s26 + $0x4e0] sm:$0xff]  ;;  %v341_v15 = vld [vmem:[%s2115_s26 + $0x4e8] sm:$0xff] }
  0x37   : > { %v343_v16 = vld [vmem:[%s2115_s26 + $0x500] sm:$0xff]  ;;  %340 = vst [vmem:[%s2120_s27 + $0x270] sm:$0xff] %v339_v14  ;;  %342 = vst [vmem:[%s2120_s27 + $0x278] sm:$0xff] %v341_v15  ;;  %v345_v17 = vld [vmem:[%s2115_s26 + $0x508] sm:$0xff] }
  0x38   : > { %344 = vst [vmem:[%s2120_s27 + $0x280] sm:$0xff] %v343_v16  ;;  %v347_v18 = vld [vmem:[%s2115_s26 + $0x520] sm:$0xff]  ;;  %v349_v19 = vld [vmem:[%s2115_s26 + $0x528] sm:$0xff]  ;;  %346 = vst [vmem:[%s2120_s27 + $0x288] sm:$0xff] %v345_v17 }
  0x39   : > { %348 = vst [vmem:[%s2120_s27 + $0x290] sm:$0xff] %v347_v18  ;;  %350 = vst [vmem:[%s2120_s27 + $0x298] sm:$0xff] %v349_v19  ;;  %v351_v20 = vld [vmem:[%s2115_s26 + $0x540] sm:$0xff]  ;;  %v353_v21 = vld [vmem:[%s2115_s26 + $0x548] sm:$0xff] }
  0x3a   : > { %v355_v22 = vld [vmem:[%s2115_s26 + $0x560] sm:$0xff]  ;;  %352 = vst [vmem:[%s2120_s27 + $0x2a0] sm:$0xff] %v351_v20  ;;  %354 = vst [vmem:[%s2120_s27 + $0x2a8] sm:$0xff] %v353_v21  ;;  %v357_v23 = vld [vmem:[%s2115_s26 + $0x568] sm:$0xff] }
  0x3b   : > { %356 = vst [vmem:[%s2120_s27 + $0x2b0] sm:$0xff] %v355_v22  ;;  %v359_v24 = vld [vmem:[%s2115_s26 + $0x580] sm:$0xff]  ;;  %v361_v25 = vld [vmem:[%s2115_s26 + $0x588] sm:$0xff]  ;;  %358 = vst [vmem:[%s2120_s27 + $0x2b8] sm:$0xff] %v357_v23 }
  0x3c   : > { %360 = vst [vmem:[%s2120_s27 + $0x2c0] sm:$0xff] %v359_v24  ;;  %362 = vst [vmem:[%s2120_s27 + $0x2c8] sm:$0xff] %v361_v25  ;;  %v363_v26 = vld [vmem:[%s2115_s26 + $0x5a0] sm:$0xff]  ;;  %v365_v27 = vld [vmem:[%s2115_s26 + $0x5a8] sm:$0xff] }
  0x3d   : > { %v367_v28 = vld [vmem:[%s2115_s26 + $0x5c0] sm:$0xff]  ;;  %364 = vst [vmem:[%s2120_s27 + $0x2d0] sm:$0xff] %v363_v26  ;;  %366 = vst [vmem:[%s2120_s27 + $0x2d8] sm:$0xff] %v365_v27  ;;  %v369_v29 = vld [vmem:[%s2115_s26 + $0x5c8] sm:$0xff] }
  0x3e   : > { %368 = vst [vmem:[%s2120_s27 + $0x2e0] sm:$0xff] %v367_v28  ;;  %v371_v30 = vld [vmem:[%s2115_s26 + $0x5e0] sm:$0xff]  ;;  %v373_v31 = vld [vmem:[%s2115_s26 + $0x5e8] sm:$0xff]  ;;  %370 = vst [vmem:[%s2120_s27 + $0x2e8] sm:$0xff] %v369_v29 }
  0x3f   : > { %372 = vst [vmem:[%s2120_s27 + $0x2f0] sm:$0xff] %v371_v30  ;;  %374 = vst [vmem:[%s2120_s27 + $0x2f8] sm:$0xff] %v373_v31  ;;  %v375_v32 = vld [vmem:[%s2115_s26 + $0x600] sm:$0xff]  ;;  %v377_v33 = vld [vmem:[%s2115_s26 + $0x608] sm:$0xff] }
  0x40   : > { %v379_v34 = vld [vmem:[%s2115_s26 + $0x620] sm:$0xff]  ;;  %376 = vst [vmem:[%s2120_s27 + $0x300] sm:$0xff] %v375_v32  ;;  %378 = vst [vmem:[%s2120_s27 + $0x308] sm:$0xff] %v377_v33  ;;  %v381_v35 = vld [vmem:[%s2115_s26 + $0x628] sm:$0xff] }
  0x41   : > { %380 = vst [vmem:[%s2120_s27 + $0x310] sm:$0xff] %v379_v34  ;;  %v383_v36 = vld [vmem:[%s2115_s26 + $0x640] sm:$0xff]  ;;  %v385_v37 = vld [vmem:[%s2115_s26 + $0x648] sm:$0xff]  ;;  %382 = vst [vmem:[%s2120_s27 + $0x318] sm:$0xff] %v381_v35 }
  0x42   : > { %384 = vst [vmem:[%s2120_s27 + $0x320] sm:$0xff] %v383_v36  ;;  %386 = vst [vmem:[%s2120_s27 + $0x328] sm:$0xff] %v385_v37  ;;  %v387_v38 = vld [vmem:[%s2115_s26 + $0x660] sm:$0xff]  ;;  %v389_v39 = vld [vmem:[%s2115_s26 + $0x668] sm:$0xff] }
  0x43   : > { %v391_v40 = vld [vmem:[%s2115_s26 + $0x680] sm:$0xff]  ;;  %388 = vst [vmem:[%s2120_s27 + $0x330] sm:$0xff] %v387_v38  ;;  %390 = vst [vmem:[%s2120_s27 + $0x338] sm:$0xff] %v389_v39  ;;  %v393_v41 = vld [vmem:[%s2115_s26 + $0x688] sm:$0xff] }
  0x44   : > { %392 = vst [vmem:[%s2120_s27 + $0x340] sm:$0xff] %v391_v40  ;;  %v395_v42 = vld [vmem:[%s2115_s26 + $0x6a0] sm:$0xff]  ;;  %v397_v43 = vld [vmem:[%s2115_s26 + $0x6a8] sm:$0xff]  ;;  %394 = vst [vmem:[%s2120_s27 + $0x348] sm:$0xff] %v393_v41 }
  0x45   : > { %396 = vst [vmem:[%s2120_s27 + $0x350] sm:$0xff] %v395_v42  ;;  %398 = vst [vmem:[%s2120_s27 + $0x358] sm:$0xff] %v397_v43  ;;  %v399_v44 = vld [vmem:[%s2115_s26 + $0x6c0] sm:$0xff]  ;;  %v401_v45 = vld [vmem:[%s2115_s26 + $0x6c8] sm:$0xff] }
  0x46   : > { %v403_v46 = vld [vmem:[%s2115_s26 + $0x6e0] sm:$0xff]  ;;  %400 = vst [vmem:[%s2120_s27 + $0x360] sm:$0xff] %v399_v44  ;;  %402 = vst [vmem:[%s2120_s27 + $0x368] sm:$0xff] %v401_v45  ;;  %v405_v47 = vld [vmem:[%s2115_s26 + $0x6e8] sm:$0xff] }
  0x47   : > { %404 = vst [vmem:[%s2120_s27 + $0x370] sm:$0xff] %v403_v46  ;;  %v407_v48 = vld [vmem:[%s2115_s26 + $0x700] sm:$0xff]  ;;  %v409_v49 = vld [vmem:[%s2115_s26 + $0x708] sm:$0xff]  ;;  %406 = vst [vmem:[%s2120_s27 + $0x378] sm:$0xff] %v405_v47 }
  0x48   : > { %408 = vst [vmem:[%s2120_s27 + $0x380] sm:$0xff] %v407_v48  ;;  %410 = vst [vmem:[%s2120_s27 + $0x388] sm:$0xff] %v409_v49  ;;  %v411_v50 = vld [vmem:[%s2115_s26 + $0x720] sm:$0xff]  ;;  %v413_v51 = vld [vmem:[%s2115_s26 + $0x728] sm:$0xff] }
  0x49   : > { %v415_v52 = vld [vmem:[%s2115_s26 + $0x740] sm:$0xff]  ;;  %412 = vst [vmem:[%s2120_s27 + $0x390] sm:$0xff] %v411_v50  ;;  %414 = vst [vmem:[%s2120_s27 + $0x398] sm:$0xff] %v413_v51  ;;  %v417_v53 = vld [vmem:[%s2115_s26 + $0x748] sm:$0xff] }
  0x4a   : > { %416 = vst [vmem:[%s2120_s27 + $0x3a0] sm:$0xff] %v415_v52  ;;  %v419_v54 = vld [vmem:[%s2115_s26 + $0x760] sm:$0xff]  ;;  %v421_v55 = vld [vmem:[%s2115_s26 + $0x768] sm:$0xff]  ;;  %418 = vst [vmem:[%s2120_s27 + $0x3a8] sm:$0xff] %v417_v53 }
  0x4b   : > { %420 = vst [vmem:[%s2120_s27 + $0x3b0] sm:$0xff] %v419_v54  ;;  %422 = vst [vmem:[%s2120_s27 + $0x3b8] sm:$0xff] %v421_v55  ;;  %v423_v56 = vld [vmem:[%s2115_s26 + $0x780] sm:$0xff]  ;;  %v425_v57 = vld [vmem:[%s2115_s26 + $0x788] sm:$0xff] }
  0x4c   : > { %v427_v58 = vld [vmem:[%s2115_s26 + $0x7a0] sm:$0xff]  ;;  %424 = vst [vmem:[%s2120_s27 + $0x3c0] sm:$0xff] %v423_v56  ;;  %426 = vst [vmem:[%s2120_s27 + $0x3c8] sm:$0xff] %v425_v57  ;;  %v429_v59 = vld [vmem:[%s2115_s26 + $0x7a8] sm:$0xff] }
  0x4d   : > { %428 = vst [vmem:[%s2120_s27 + $0x3d0] sm:$0xff] %v427_v58  ;;  %v431_v60 = vld [vmem:[%s2115_s26 + $0x7c0] sm:$0xff]  ;;  %v433_v61 = vld [vmem:[%s2115_s26 + $0x7c8] sm:$0xff]  ;;  %430 = vst [vmem:[%s2120_s27 + $0x3d8] sm:$0xff] %v429_v59 }
  0x4e   : > { %432 = vst [vmem:[%s2120_s27 + $0x3e0] sm:$0xff] %v431_v60  ;;  %434 = vst [vmem:[%s2120_s27 + $0x3e8] sm:$0xff] %v433_v61  ;;  %v435_v62 = vld [vmem:[%s2115_s26 + $0x7e0] sm:$0xff]  ;;  %v437_v63 = vld [vmem:[%s2115_s26 + $0x7e8] sm:$0xff] }
  0x4f   : > { %436 = vst [vmem:[%s2120_s27 + $0x3f0] sm:$0xff] %v435_v62  ;;  %438 = vst [vmem:[%s2120_s27 + $0x3f8] sm:$0xff] %v437_v63 }
  0x50 PF: > { %p1614_p6 = scmp.ge.s32.totalorder %s2049_s16, 1  ;;  %p443_p7 = scmp.lt.s32.totalorder %s2049_s16, 3 }
  0x52   : > { %p444_p8 = pnand %p1614_p6, %p443_p7 }
  0x53   : > { %s450_s28 = sand.u32 (!%p444_p8), 1, %s2033_s12   ;;  %s1616_s10 = sshll.u32 (!%p444_p8), %s2041_s14, 2 }
  0x54   : > { %447 = sbr.rel (%p444_p8) target bundleno = 452 (0x1c4), region = 51  ;;  %s1615_s6 = sshll.u32 (!%p444_p8), %s450_s28, 10 }
  0x55   : > { %s2396_s7 = scalar_lea.vmem (!%p444_p8), [#allocation2], %s1615_s6  ;;  %p499_p9 = scmp.lt.s32.totalorder (!%p444_p8), %s1616_s10, 7 }
  0x59   : > { %v2381_v0 = vld [vmem:[%s2564_s0] sm:$0xff]  ;;  %v2386_v1 = vld [vmem:[%s2564_s0 + $0x8] sm:$0xff]  ;;  %v2051_v12 = vmov 0   ;;  %s2575_s10 = smov (!%p499_p9, %s1616_s10), 7 }
  0x5a   : > { %v2390_v2 = vcombine.high %v2381_v0, %v2381_v0  ;;  %v2394_v3 = vcombine.high %v2386_v1, %v2386_v1  ;;  %v1799_v4 = vld [vmem:[%s2396_s7 + $0xe4] ss:$16 sps:$4 sm:$0xff]   ;;  %v1803_v6 = vld [vmem:[%s2396_s7 + $0xe0] ss:$16 sps:$4 sm:$0xff]   ;;  %1798 = vset.pattern.permute.xlu0 %v2051_v12  ;;  %v2472_v12 = vcombine.low %v2386_v1, %v2386_v1  ;;  %v1913_v1 = vld [vmem:[%s2396_s7 + $0xac] ss:$16 sps:$4 sm:$0xff]  }
  0x5b   : > { %v1801_v5 = vld [vmem:[%s2396_s7 + $0x2e4] ss:$16 sps:$4 sm:$0xff]   ;;  %1296 = vmatprep.subr.bf16.mxu0 %v1799_v4  ;;  %v1804_v7 = vld [vmem:[%s2396_s7 + $0x2e0] ss:$16 sps:$4 sm:$0xff]   ;;  %s1617_s11 = sshll.u32 %s2575_s10, 3 }
  0x5c   : > { %1328 = vmatprep.mubr.bf16.mxu0 %v2390_v2  ;;  %1369 = vmatprep.mubr.bf16.mxu1 %v2394_v3  ;;  %v1805_v8 = vld [vmem:[%s2396_s7 + $0xc4] ss:$16 sps:$4 sm:$0xff]   ;;  %v1809_v10 = vld [vmem:[%s2396_s7 + $0xc0] ss:$16 sps:$4 sm:$0xff]   ;;  %s504_s19 = scalar_lea.vmem %s2567_s3, %s1617_s11 }
  0x5d   : > { %1337 = vmatprep.subr.bf16.mxu1 %v1801_v5  ;;  %1297 = vmatpush1.bf16.msra.mxu0 %v1803_v6  ;;  %v1807_v9 = vld [vmem:[%s2396_s7 + $0x2c4] ss:$16 sps:$4 sm:$0xff]   ;;  %v1810_v11 = vld [vmem:[%s2396_s7 + $0x2c0] ss:$16 sps:$4 sm:$0xff]  }
  0x5e   : > { %1338 = vmatpush1.bf16.msra.mxu1 %v1804_v7  ;;  %1298 = vmatprep.subr.bf16.mxu0 %v1805_v8  ;;  %v1811_v13 = vld [vmem:[%s2396_s7 + $0xa4] ss:$16 sps:$4 sm:$0xff]   ;;  %v1815_v15 = vld [vmem:[%s2396_s7 + $0xa0] ss:$16 sps:$4 sm:$0xff]  }
  0x5f   : > { %1339 = vmatprep.subr.bf16.mxu1 %v1807_v9  ;;  %v1813_v14 = vld [vmem:[%s2396_s7 + $0x2a4] ss:$16 sps:$4 sm:$0xff]   ;;  %v1816_v16 = vld [vmem:[%s2396_s7 + $0x2a0] ss:$16 sps:$4 sm:$0xff]   ;;  %v1901_v9 = vld [vmem:[%s2396_s7 + $0xec] ss:$16 sps:$4 sm:$0xff]  }
  0x60   : > { %v1817_v17 = vld [vmem:[%s2396_s7 + $0x84] ss:$16 sps:$4 sm:$0xff]   ;;  %v1821_v19 = vld [vmem:[%s2396_s7 + $0x80] ss:$16 sps:$4 sm:$0xff]  }
  0x61   : > { %1299 = vmatpush1.bf16.msra.mxu0 %v1809_v10  ;;  %v1819_v18 = vld [vmem:[%s2396_s7 + $0x284] ss:$16 sps:$4 sm:$0xff]   ;;  %v1822_v20 = vld [vmem:[%s2396_s7 + $0x280] ss:$16 sps:$4 sm:$0xff]   ;;  %v1904_v10 = vld [vmem:[%s2396_s7 + $0x2ec] ss:$16 sps:$4 sm:$0xff]  }
  0x62   : > { %1340 = vmatpush1.bf16.msra.mxu1 %v1810_v11  ;;  %1300 = vmatprep.subr.bf16.mxu0 %v1811_v13  ;;  %v1823_v21 = vld [vmem:[%s2396_s7 + $0x64] ss:$16 sps:$4 sm:$0xff]   ;;  %v1827_v23 = vld [vmem:[%s2396_s7 + $0x60] ss:$16 sps:$4 sm:$0xff]   ;;  %v2468_v11 = vcombine.low %v2381_v0, %v2381_v0  ;;  %v1899_v13 = vld [vmem:[%s2396_s7 + $0xe8] ss:$16 sps:$4 sm:$0xff]  }
  0x63   : > { %1341 = vmatprep.subr.bf16.mxu1 %v1813_v14  ;;  %v1825_v22 = vld [vmem:[%s2396_s7 + $0x264] ss:$16 sps:$4 sm:$0xff]   ;;  %v1828_v24 = vld [vmem:[%s2396_s7 + $0x260] ss:$16 sps:$4 sm:$0xff]   ;;  %v1902_v14 = vld [vmem:[%s2396_s7 + $0x2e8] ss:$16 sps:$4 sm:$0xff]  }
  0x64   : > { %v1829_v25 = vld [vmem:[%s2396_s7 + $0x44] ss:$16 sps:$4 sm:$0xff]   ;;  %v1833_v27 = vld [vmem:[%s2396_s7 + $0x40] ss:$16 sps:$4 sm:$0xff]   ;;  %v1905_v0 = vld [vmem:[%s2396_s7 + $0xc8] ss:$16 sps:$4 sm:$0xff]  }
  0x65   : > { %1301 = vmatpush1.bf16.msra.mxu0 %v1815_v15  ;;  %v1831_v26 = vld [vmem:[%s2396_s7 + $0x244] ss:$16 sps:$4 sm:$0xff]   ;;  %v1834_v28 = vld [vmem:[%s2396_s7 + $0x240] ss:$16 sps:$4 sm:$0xff]   ;;  %v1907_v15 = vld [vmem:[%s2396_s7 + $0xcc] ss:$16 sps:$4 sm:$0xff]  }
  0x66   : > { %1342 = vmatpush1.bf16.msra.mxu1 %v1816_v16  ;;  %1302 = vmatprep.subr.bf16.mxu0 %v1817_v17  ;;  %v1835_v29 = vld [vmem:[%s2396_s7 + $0x24] ss:$16 sps:$4 sm:$0xff]   ;;  %v1839_v31 = vld [vmem:[%s2396_s7 + $0x20] ss:$16 sps:$4 sm:$0xff]   ;;  %v1910_v16 = vld [vmem:[%s2396_s7 + $0x2cc] ss:$16 sps:$4 sm:$0xff]  }
  0x67   : > { %1343 = vmatprep.subr.bf16.mxu1 %v1819_v18  ;;  %v1837_v30 = vld [vmem:[%s2396_s7 + $0x224] ss:$16 sps:$4 sm:$0xff]   ;;  %v1840_v32 = vld [vmem:[%s2396_s7 + $0x220] ss:$16 sps:$4 sm:$0xff]   ;;  %v1908_v17 = vld [vmem:[%s2396_s7 + $0x2c8] ss:$16 sps:$4 sm:$0xff]  }
  0x68   : > { %v1841_v33 = vld [vmem:[%s2396_s7 + $0x4] ss:$16 sps:$4 sm:$0xff]   ;;  %v1845_v35 = vld [vmem:[%s2396_s7] ss:$16 sps:$4 sm:$0xff]   ;;  %v1916_v18 = vld [vmem:[%s2396_s7 + $0x2ac] ss:$16 sps:$4 sm:$0xff]  }
  0x69   : > { %1303 = vmatpush1.bf16.msra.mxu0 %v1821_v19  ;;  %v1843_v34 = vld [vmem:[%s2396_s7 + $0x204] ss:$16 sps:$4 sm:$0xff]   ;;  %v1846_v36 = vld [vmem:[%s2396_s7 + $0x200] ss:$16 sps:$4 sm:$0xff]   ;;  %v1911_v19 = vld [vmem:[%s2396_s7 + $0xa8] ss:$16 sps:$4 sm:$0xff]  }
  0x6a   : > { %1344 = vmatpush1.bf16.msra.mxu1 %v1822_v20  ;;  %1304 = vmatprep.subr.bf16.mxu0 %v1823_v21  ;;  %v1847_v37 = vld [vmem:[%s2396_s7 + $0x1e4] ss:$16 sps:$4 sm:$0xff]   ;;  %v1851_v39 = vld [vmem:[%s2396_s7 + $0x1e0] ss:$16 sps:$4 sm:$0xff]   ;;  %v1914_v20 = vld [vmem:[%s2396_s7 + $0x2a8] ss:$16 sps:$4 sm:$0xff]  }
  0x6b   : > { %1345 = vmatprep.subr.bf16.mxu1 %v1825_v22  ;;  %v1849_v38 = vld [vmem:[%s2396_s7 + $0x3e4] ss:$16 sps:$4 sm:$0xff]   ;;  %v1852_v40 = vld [vmem:[%s2396_s7 + $0x3e0] ss:$16 sps:$4 sm:$0xff]   ;;  %v1919_v21 = vld [vmem:[%s2396_s7 + $0x8c] ss:$16 sps:$4 sm:$0xff]  }
  0x6c   : > { %v1853_v41 = vld [vmem:[%s2396_s7 + $0x1c4] ss:$16 sps:$4 sm:$0xff]   ;;  %v1857_v43 = vld [vmem:[%s2396_s7 + $0x1c0] ss:$16 sps:$4 sm:$0xff]   ;;  %v1922_v22 = vld [vmem:[%s2396_s7 + $0x28c] ss:$16 sps:$4 sm:$0xff]  }
  0x6d   : > { %1305 = vmatpush1.bf16.msra.mxu0 %v1827_v23  ;;  %v1855_v42 = vld [vmem:[%s2396_s7 + $0x3c4] ss:$16 sps:$4 sm:$0xff]   ;;  %v1858_v44 = vld [vmem:[%s2396_s7 + $0x3c0] ss:$16 sps:$4 sm:$0xff]   ;;  %v1917_v23 = vld [vmem:[%s2396_s7 + $0x88] ss:$16 sps:$4 sm:$0xff]  }
  0x6e   : > { %1346 = vmatpush1.bf16.msra.mxu1 %v1828_v24  ;;  %1306 = vmatprep.subr.bf16.mxu0 %v1829_v25  ;;  %v1859_v45 = vld [vmem:[%s2396_s7 + $0x1a4] ss:$16 sps:$4 sm:$0xff]   ;;  %v1863_v47 = vld [vmem:[%s2396_s7 + $0x1a0] ss:$16 sps:$4 sm:$0xff]   ;;  %v1920_v24 = vld [vmem:[%s2396_s7 + $0x288] ss:$16 sps:$4 sm:$0xff]  }
  0x6f   : > { %1347 = vmatprep.subr.bf16.mxu1 %v1831_v26  ;;  %v1861_v46 = vld [vmem:[%s2396_s7 + $0x3a4] ss:$16 sps:$4 sm:$0xff]   ;;  %v1864_v48 = vld [vmem:[%s2396_s7 + $0x3a0] ss:$16 sps:$4 sm:$0xff]   ;;  %v1923_v25 = vld [vmem:[%s2396_s7 + $0x68] ss:$16 sps:$4 sm:$0xff]  }
  0x70   : > { %v1865_v49 = vld [vmem:[%s2396_s7 + $0x184] ss:$16 sps:$4 sm:$0xff]   ;;  %v1869_v51 = vld [vmem:[%s2396_s7 + $0x180] ss:$16 sps:$4 sm:$0xff]   ;;  %v1926_v26 = vld [vmem:[%s2396_s7 + $0x268] ss:$16 sps:$4 sm:$0xff]  }
  0x71   : > { %1307 = vmatpush1.bf16.msra.mxu0 %v1833_v27  ;;  %v1867_v50 = vld [vmem:[%s2396_s7 + $0x384] ss:$16 sps:$4 sm:$0xff]   ;;  %v1870_v52 = vld [vmem:[%s2396_s7 + $0x380] ss:$16 sps:$4 sm:$0xff]   ;;  %v1931_v27 = vld [vmem:[%s2396_s7 + $0x4c] ss:$16 sps:$4 sm:$0xff]  }
  0x72   : > { %1348 = vmatpush1.bf16.msra.mxu1 %v1834_v28  ;;  %1308 = vmatprep.subr.bf16.mxu0 %v1835_v29  ;;  %v1871_v53 = vld [vmem:[%s2396_s7 + $0x164] ss:$16 sps:$4 sm:$0xff]   ;;  %v1875_v55 = vld [vmem:[%s2396_s7 + $0x160] ss:$16 sps:$4 sm:$0xff]   ;;  %v1934_v28 = vld [vmem:[%s2396_s7 + $0x24c] ss:$16 sps:$4 sm:$0xff]  }
  0x73   : > { %1349 = vmatprep.subr.bf16.mxu1 %v1837_v30  ;;  %v1873_v54 = vld [vmem:[%s2396_s7 + $0x364] ss:$16 sps:$4 sm:$0xff]   ;;  %v1876_v56 = vld [vmem:[%s2396_s7 + $0x360] ss:$16 sps:$4 sm:$0xff]   ;;  %v1929_v29 = vld [vmem:[%s2396_s7 + $0x48] ss:$16 sps:$4 sm:$0xff]  }
  0x74   : > { %v1877_v57 = vld [vmem:[%s2396_s7 + $0x144] ss:$16 sps:$4 sm:$0xff]   ;;  %v1881_v59 = vld [vmem:[%s2396_s7 + $0x140] ss:$16 sps:$4 sm:$0xff]   ;;  %v1932_v30 = vld [vmem:[%s2396_s7 + $0x248] ss:$16 sps:$4 sm:$0xff]  }
  0x75   : > { %1309 = vmatpush1.bf16.msra.mxu0 %v1839_v31  ;;  %v1879_v58 = vld [vmem:[%s2396_s7 + $0x344] ss:$16 sps:$4 sm:$0xff]   ;;  %v1882_v60 = vld [vmem:[%s2396_s7 + $0x340] ss:$16 sps:$4 sm:$0xff]   ;;  %v1937_v31 = vld [vmem:[%s2396_s7 + $0x2c] ss:$16 sps:$4 sm:$0xff]  }
  0x76   : > { %1350 = vmatpush1.bf16.msra.mxu1 %v1840_v32  ;;  %1310 = vmatprep.subr.bf16.mxu0 %v1841_v33  ;;  %v1883_v61 = vld [vmem:[%s2396_s7 + $0x124] ss:$16 sps:$4 sm:$0xff]   ;;  %v1887_v63 = vld [vmem:[%s2396_s7 + $0x120] ss:$16 sps:$4 sm:$0xff]   ;;  %v1940_v32 = vld [vmem:[%s2396_s7 + $0x22c] ss:$16 sps:$4 sm:$0xff]  }
  0x77   : > { %1351 = vmatprep.subr.bf16.mxu1 %v1843_v34  ;;  %v1885_v62 = vld [vmem:[%s2396_s7 + $0x324] ss:$16 sps:$4 sm:$0xff]   ;;  %v1888_v4 = vld [vmem:[%s2396_s7 + $0x320] ss:$16 sps:$4 sm:$0xff]   ;;  %v1935_v34 = vld [vmem:[%s2396_s7 + $0x28] ss:$16 sps:$4 sm:$0xff]  }
  0x78   : > { %v1889_v5 = vld [vmem:[%s2396_s7 + $0x104] ss:$16 sps:$4 sm:$0xff]   ;;  %v1893_v7 = vld [vmem:[%s2396_s7 + $0x100] ss:$16 sps:$4 sm:$0xff]  }
  0x79   : > { %1311 = vmatpush1.bf16.msra.mxu0 %v1845_v35  ;;  %v1891_v6 = vld [vmem:[%s2396_s7 + $0x304] ss:$16 sps:$4 sm:$0xff]   ;;  %v1894_v8 = vld [vmem:[%s2396_s7 + $0x300] ss:$16 sps:$4 sm:$0xff]   ;;  %v1938_v35 = vld [vmem:[%s2396_s7 + $0x228] ss:$16 sps:$4 sm:$0xff]  }
  0x7a   : > { %1352 = vmatpush1.bf16.msra.mxu1 %v1846_v36  ;;  %1312 = vmatprep.subr.bf16.mxu0 %v1847_v37  ;;  %v636_v33 = vld [vmem:[%s2566_s2] sm:$0xff]  ;;  %v1943_v36 = vld [vmem:[%s2396_s7 + $0xc] ss:$16 sps:$4 sm:$0xff]  }
  0x7b   : > { %1353 = vmatprep.subr.bf16.mxu1 %v1849_v38  ;;  %639 = vperm.xlu0 %1798, %v636_v33   ;;  %v1946_v37 = vld [vmem:[%s2396_s7 + $0x20c] ss:$16 sps:$4 sm:$0xff]   ;;  %v1941_v38 = vld [vmem:[%s2396_s7 + $0x8] ss:$16 sps:$4 sm:$0xff]  }
  0x7d   : > { %1313 = vmatpush2.bf16.msra.mxu0 %v1851_v39  ;;  %v1944_v39 = vld [vmem:[%s2396_s7 + $0x208] ss:$16 sps:$4 sm:$0xff]  }
  0x7e   : > { %1354 = vmatpush2.bf16.msra.mxu1 %v1852_v40  ;;  %1314 = vmatprep.subr.bf16.mxu0 %v1853_v41  ;;  %v1949_v40 = vld [vmem:[%s2396_s7 + $0x1ec] ss:$16 sps:$4 sm:$0xff]  }
  0x7f   : > { %1355 = vmatprep.subr.bf16.mxu1 %v1855_v42  ;;  %v1952_v41 = vld [vmem:[%s2396_s7 + $0x3ec] ss:$16 sps:$4 sm:$0xff]   ;;  %v1947_v42 = vld [vmem:[%s2396_s7 + $0x1e8] ss:$16 sps:$4 sm:$0xff]  }
  0x81   : > { %1315 = vmatpush2.bf16.msra.mxu0 %v1857_v43  ;;  %v1950_v43 = vld [vmem:[%s2396_s7 + $0x3e8] ss:$16 sps:$4 sm:$0xff]  }
  0x82   : > { %1356 = vmatpush2.bf16.msra.mxu1 %v1858_v44  ;;  %1316 = vmatprep.subr.bf16.mxu0 %v1859_v45  ;;  %v1955_v44 = vld [vmem:[%s2396_s7 + $0x1cc] ss:$16 sps:$4 sm:$0xff]  }
  0x83   : > { %1357 = vmatprep.subr.bf16.mxu1 %v1861_v46  ;;  %v1958_v45 = vld [vmem:[%s2396_s7 + $0x3cc] ss:$16 sps:$4 sm:$0xff]   ;;  %v1953_v46 = vld [vmem:[%s2396_s7 + $0x1c8] ss:$16 sps:$4 sm:$0xff]  }
  0x85   : > { %1317 = vmatpush2.bf16.msra.mxu0 %v1863_v47  ;;  %v1956_v47 = vld [vmem:[%s2396_s7 + $0x3c8] ss:$16 sps:$4 sm:$0xff]  }
  0x86   : > { %1358 = vmatpush2.bf16.msra.mxu1 %v1864_v48  ;;  %1318 = vmatprep.subr.bf16.mxu0 %v1865_v49  ;;  %v1961_v48 = vld [vmem:[%s2396_s7 + $0x1ac] ss:$16 sps:$4 sm:$0xff]  }
  0x87   : > { %1359 = vmatprep.subr.bf16.mxu1 %v1867_v50  ;;  %v1964_v49 = vld [vmem:[%s2396_s7 + $0x3ac] ss:$16 sps:$4 sm:$0xff]   ;;  %v1959_v50 = vld [vmem:[%s2396_s7 + $0x1a8] ss:$16 sps:$4 sm:$0xff]  }
  0x89   : > { %1319 = vmatpush2.bf16.msra.mxu0 %v1869_v51  ;;  %v1962_v51 = vld [vmem:[%s2396_s7 + $0x3a8] ss:$16 sps:$4 sm:$0xff]  }
  0x8a   : > { %1360 = vmatpush2.bf16.msra.mxu1 %v1870_v52  ;;  %1320 = vmatprep.subr.bf16.mxu0 %v1871_v53  ;;  %v1967_v52 = vld [vmem:[%s2396_s7 + $0x18c] ss:$16 sps:$4 sm:$0xff]  }
  0x8b   : > { %1361 = vmatprep.subr.bf16.mxu1 %v1873_v54  ;;  %v1970_v53 = vld [vmem:[%s2396_s7 + $0x38c] ss:$16 sps:$4 sm:$0xff]   ;;  %v1965_v54 = vld [vmem:[%s2396_s7 + $0x188] ss:$16 sps:$4 sm:$0xff]  }
  0x8d   : > { %1321 = vmatpush2.bf16.msra.mxu0 %v1875_v55  ;;  %v1968_v55 = vld [vmem:[%s2396_s7 + $0x388] ss:$16 sps:$4 sm:$0xff]  }
  0x8e   : > { %1362 = vmatpush2.bf16.msra.mxu1 %v1876_v56  ;;  %1322 = vmatprep.subr.bf16.mxu0 %v1877_v57  ;;  %v1973_v56 = vld [vmem:[%s2396_s7 + $0x16c] ss:$16 sps:$4 sm:$0xff]  }
  0x8f   : > { %1363 = vmatprep.subr.bf16.mxu1 %v1879_v58  ;;  %v1976_v57 = vld [vmem:[%s2396_s7 + $0x36c] ss:$16 sps:$4 sm:$0xff]   ;;  %v1971_v58 = vld [vmem:[%s2396_s7 + $0x168] ss:$16 sps:$4 sm:$0xff]  }
  0x91   : > { %1323 = vmatpush2.bf16.msra.mxu0 %v1881_v59  ;;  %v1974_v59 = vld [vmem:[%s2396_s7 + $0x368] ss:$16 sps:$4 sm:$0xff]  }
  0x92   : > { %1364 = vmatpush2.bf16.msra.mxu1 %v1882_v60  ;;  %1324 = vmatprep.subr.bf16.mxu0 %v1883_v61  ;;  %v1979_v60 = vld [vmem:[%s2396_s7 + $0x14c] ss:$16 sps:$4 sm:$0xff]  }
  0x93   : > { %1365 = vmatprep.subr.bf16.mxu1 %v1885_v62  ;;  %v1982_v61 = vld [vmem:[%s2396_s7 + $0x34c] ss:$16 sps:$4 sm:$0xff]   ;;  %v1977_v62 = vld [vmem:[%s2396_s7 + $0x148] ss:$16 sps:$4 sm:$0xff]  }
  0x95   : > { %1325 = vmatpush2.bf16.msra.mxu0 %v1887_v63  ;;  %v1980_v63 = vld [vmem:[%s2396_s7 + $0x348] ss:$16 sps:$4 sm:$0xff]  }
  0x96   : > { %1366 = vmatpush2.bf16.msra.mxu1 %v1888_v4  ;;  %1326 = vmatprep.subr.bf16.mxu0 %v1889_v5  ;;  %v1985_v4 = vld [vmem:[%s2396_s7 + $0x12c] ss:$16 sps:$4 sm:$0xff]  }
  0x97   : > { %1367 = vmatprep.subr.bf16.mxu1 %v1891_v6  ;;  %v1988_v5 = vld [vmem:[%s2396_s7 + $0x32c] ss:$16 sps:$4 sm:$0xff]   ;;  %v1983_v6 = vld [vmem:[%s2396_s7 + $0x128] ss:$16 sps:$4 sm:$0xff]  }
  0x99   : > { %1327 = vmatpush2.bf16.msra.mxu0 %v1893_v7  ;;  %v1986_v7 = vld [vmem:[%s2396_s7 + $0x328] ss:$16 sps:$4 sm:$0xff]  }
  0x9a   : > { %1368 = vmatpush2.bf16.msra.mxu1 %v1894_v8  ;;  %1378 = vmatprep.subr.bf16.mxu0 %v1901_v9  ;;  %v1991_v8 = vld [vmem:[%s2396_s7 + $0x10c] ss:$16 sps:$4 sm:$0xff]  }
  0x9b   : > { %1419 = vmatprep.subr.bf16.mxu1 %v1904_v10  ;;  %v1994_v9 = vld [vmem:[%s2396_s7 + $0x30c] ss:$16 sps:$4 sm:$0xff]   ;;  %v1989_v10 = vld [vmem:[%s2396_s7 + $0x108] ss:$16 sps:$4 sm:$0xff]  }
  0x9c   : > { %1329 = vmatmul.mubr.bf16.vlgmr.msra.gmra.mxu0 %v2468_v11 }
  0x9d   : > { %1370 = vmatmul.mubr.bf16.vlgmr.msra.gmra.mxu1 %v2472_v12  ;;  %1379 = vmatpush1.bf16.msra.mxu0 %v1899_v13  ;;  %v1992_v13 = vld [vmem:[%s2396_s7 + $0x308] ss:$16 sps:$4 sm:$0xff]  }
  0x9e   : > { %1420 = vmatpush1.bf16.msra.mxu1 %v1902_v14  ;;  %1380 = vmatprep.subr.bf16.mxu0 %v1907_v15 }
  0x9f   : > { %1421 = vmatprep.subr.bf16.mxu1 %v1910_v16  ;;  %1410 = vmatprep.mubr.bf16.mxu0 %v2390_v2  ;;  %v1925_v2 = vld [vmem:[%s2396_s7 + $0x6c] ss:$16 sps:$4 sm:$0xff]  }
  0xa0   : > { %1451 = vmatprep.mubr.bf16.mxu1 %v2394_v3  ;;  %v1928_v3 = vld [vmem:[%s2396_s7 + $0x26c] ss:$16 sps:$4 sm:$0xff]  }
  0xa1   : > { %1381 = vmatpush1.bf16.msra.mxu0 %v1905_v0 }
  0xa2   : > { %1422 = vmatpush1.bf16.msra.mxu1 %v1908_v17  ;;  %1382 = vmatprep.subr.bf16.mxu0 %v1913_v1 }
  0xa3   : > { %1423 = vmatprep.subr.bf16.mxu1 %v1916_v18 }
  0xa5   : > { %1383 = vmatpush1.bf16.msra.mxu0 %v1911_v19 }
  0xa6   : > { %1424 = vmatpush1.bf16.msra.mxu1 %v1914_v20  ;;  %1384 = vmatprep.subr.bf16.mxu0 %v1919_v21 }
  0xa7   : > { %1425 = vmatprep.subr.bf16.mxu1 %v1922_v22 }
  0xa9   : > { %1385 = vmatpush1.bf16.msra.mxu0 %v1917_v23 }
  0xaa   : > { %1426 = vmatpush1.bf16.msra.mxu1 %v1920_v24  ;;  %1386 = vmatprep.subr.bf16.mxu0 %v1925_v2 }
  0xab   : > { %1427 = vmatprep.subr.bf16.mxu1 %v1928_v3 }
  0xad   : > { %1387 = vmatpush1.bf16.msra.mxu0 %v1923_v25 }
  0xae   : > { %1428 = vmatpush1.bf16.msra.mxu1 %v1926_v26  ;;  %1388 = vmatprep.subr.bf16.mxu0 %v1931_v27 }
  0xaf   : > { %1429 = vmatprep.subr.bf16.mxu1 %v1934_v28 }
  0xb1   : > { %1389 = vmatpush1.bf16.msra.mxu0 %v1929_v29 }
  0xb2   : > { %1430 = vmatpush1.bf16.msra.mxu1 %v1932_v30  ;;  %1390 = vmatprep.subr.bf16.mxu0 %v1937_v31 }
  0xb3   : > { %1431 = vmatprep.subr.bf16.mxu1 %v1940_v32 }
  0xb5   : > { %1391 = vmatpush1.bf16.msra.mxu0 %v1935_v34 }
  0xb6   : > { %1432 = vmatpush1.bf16.msra.mxu1 %v1938_v35  ;;  %1392 = vmatprep.subr.bf16.mxu0 %v1943_v36 }
  0xb7   : > { %1433 = vmatprep.subr.bf16.mxu1 %v1946_v37 }
  0xb9   : > { %1393 = vmatpush1.bf16.msra.mxu0 %v1941_v38 }
  0xba   : > { %1434 = vmatpush1.bf16.msra.mxu1 %v1944_v39  ;;  %1394 = vmatprep.subr.bf16.mxu0 %v1949_v40 }
  0xbb   : > { %1435 = vmatprep.subr.bf16.mxu1 %v1952_v41 }
  0xbd   : > { %1395 = vmatpush2.bf16.msra.mxu0 %v1947_v42 }
  0xbe   : > { %1436 = vmatpush2.bf16.msra.mxu1 %v1950_v43  ;;  %1396 = vmatprep.subr.bf16.mxu0 %v1955_v44 }
  0xbf   : > { %1437 = vmatprep.subr.bf16.mxu1 %v1958_v45 }
  0xc1   : > { %1397 = vmatpush2.bf16.msra.mxu0 %v1953_v46 }
  0xc2   : > { %1438 = vmatpush2.bf16.msra.mxu1 %v1956_v47  ;;  %1398 = vmatprep.subr.bf16.mxu0 %v1961_v48 }
  0xc3   : > { %1439 = vmatprep.subr.bf16.mxu1 %v1964_v49 }
  0xc5   : > { %1399 = vmatpush2.bf16.msra.mxu0 %v1959_v50 }
  0xc6   : > { %1440 = vmatpush2.bf16.msra.mxu1 %v1962_v51  ;;  %1400 = vmatprep.subr.bf16.mxu0 %v1967_v52 }
  0xc7   : > { %1441 = vmatprep.subr.bf16.mxu1 %v1970_v53 }
  0xc9   : > { %1401 = vmatpush2.bf16.msra.mxu0 %v1965_v54 }
  0xca   : > { %1442 = vmatpush2.bf16.msra.mxu1 %v1968_v55  ;;  %1402 = vmatprep.subr.bf16.mxu0 %v1973_v56 }
  0xcb   : > { %1443 = vmatprep.subr.bf16.mxu1 %v1976_v57 }
  0xcd   : > { %1403 = vmatpush2.bf16.msra.mxu0 %v1971_v58 }
  0xce   : > { %1444 = vmatpush2.bf16.msra.mxu1 %v1974_v59  ;;  %1404 = vmatprep.subr.bf16.mxu0 %v1979_v60 }
  0xcf   : > { %1445 = vmatprep.subr.bf16.mxu1 %v1982_v61 }
  0xd1   : > { %1405 = vmatpush2.bf16.msra.mxu0 %v1977_v62 }
  0xd2   : > { %1446 = vmatpush2.bf16.msra.mxu1 %v1980_v63  ;;  %1406 = vmatprep.subr.bf16.mxu0 %v1985_v4 }
  0xd3   : > { %1447 = vmatprep.subr.bf16.mxu1 %v1988_v5 }
  0xd5   : > { %1407 = vmatpush2.bf16.msra.mxu0 %v1983_v6 }
  0xd6   : > { %1448 = vmatpush2.bf16.msra.mxu1 %v1986_v7  ;;  %1408 = vmatprep.subr.bf16.mxu0 %v1991_v8 }
  0xd7   : > { %1449 = vmatprep.subr.bf16.mxu1 %v1994_v9 }
  0xd9   : > { %1409 = vmatpush2.bf16.msra.mxu0 %v1989_v10 }
  0xda   : > { %1450 = vmatpush2.bf16.msra.mxu1 %v1992_v13 }
  0xdc   : > { %1411 = vmatmul.mubr.bf16.vlgmr.msra.gmra.mxu0 %v2468_v11 }
  0xdd   : > { %1452 = vmatmul.mubr.bf16.vlgmr.msra.gmra.mxu1 %v2472_v12 }
  0xf6   : > { %v640_v14 = vpop.permute.xlu0 %639 }
 0x15c   : > { %v1330_v15 = vpop.f32.mrf.mxu0 }
 0x15d   : > { %v1371_v16 = vpop.f32.mrf.mxu1  ;;  %v1331_v0 = vadd.f32 %v1330_v15, %v640_v14 }
 0x15e   : > { %v1332_v17 = vpop.f32.mrf.mxu0 }
 0x15f   : > { %v1373_v1 = vpop.f32.mrf.mxu1  ;;  %v1372_v18 = vadd.f32 %v1371_v16, %v1331_v0  ;;  %v1333_v19 = vadd.f32 %v1332_v17, %v640_v14 }
 0x160   : > { %v1334_v20 = vpop.f32.mrf.mxu0 }
 0x161   : > { %v1375_v21 = vpop.f32.mrf.mxu1  ;;  %v1750_v22 = vmul.f32 -1.442695, %v1372_v18  ;;  %v1374_v23 = vadd.f32 %v1373_v1, %v1333_v19 }
 0x162   : > { %v1335_v24 = vpop.f32.mrf.mxu0 }
 0x163   : > { %v1376_v2 = vpop.f32.mrf.mxu1  ;;  %1995 = vpow2.f32 %v1750_v22  ;;  %v1751_v3 = vmul.f32 -1.442695, %v1374_v23 }
 0x165   : > { %1997 = vpow2.f32 %v1751_v3 }
 0x170   : > { %v1996_v11 = vpop.eup %1995 }
 0x171   : > { %v1472_v12 = vadd.f32 1.0, %v1996_v11 }
 0x172   : > { %v1998_v25 = vpop.eup %1997 }
 0x173   : > { %1999 = vrcp.f32 %v1472_v12  ;;  %v1473_v26 = vadd.f32 1.0, %v1998_v25 }
 0x175   : > { %2001 = vrcp.f32 %v1473_v26 }
 0x180   : > { %v2000_v27 = vpop.eup %1999 }
 0x181   : > { %1484 = vst [vmem:[%s504_s19] sm:$0xff] %v2000_v27 }
 0x182   : > { %v2002_v28 = vpop.eup %2001 }
 0x183   : > { %1485 = vst [vmem:[%s504_s19 + $0x8] sm:$0xff] %v2002_v28 }
 0x19c   : > { %v1412_v29 = vpop.f32.mrf.mxu0 }
 0x19d   : > { %v1453_v30 = vpop.f32.mrf.mxu1  ;;  %v1413_v31 = vadd.f32 %v1412_v29, %v640_v14 }
 0x19e   : > { %v1414_v32 = vpop.f32.mrf.mxu0 }
 0x19f   : > { %v1455_v33 = vpop.f32.mrf.mxu1  ;;  %v1454_v34 = vadd.f32 %v1453_v30, %v1413_v31  ;;  %v1415_v35 = vadd.f32 %v1414_v32, %v640_v14 }
 0x1a0   : > { %v1416_v36 = vpop.f32.mrf.mxu0 }
 0x1a1   : > { %v1457_v37 = vpop.f32.mrf.mxu1  ;;  %v1752_v38 = vmul.f32 -1.442695, %v1454_v34  ;;  %v1456_v39 = vadd.f32 %v1455_v33, %v1415_v35 }
 0x1a2   : > { %v1417_v40 = vpop.f32.mrf.mxu0 }
 0x1a3   : > { %v1458_v41 = vpop.f32.mrf.mxu1  ;;  %2003 = vpow2.f32 %v1752_v38  ;;  %v1753_v42 = vmul.f32 -1.442695, %v1456_v39 }
 0x1a5   : > { %2005 = vpow2.f32 %v1753_v42 }
 0x1b0   : > { %v2004_v43 = vpop.eup %2003 }
 0x1b1   : > { %v1474_v44 = vadd.f32 1.0, %v2004_v43 }
 0x1b2   : > { %v2006_v45 = vpop.eup %2005 }
 0x1b3   : > { %2007 = vrcp.f32 %v1474_v44  ;;  %v1475_v46 = vadd.f32 1.0, %v2006_v45 }
 0x1b5   : > { %2009 = vrcp.f32 %v1475_v46 }
 0x1c0   : > { %v2008_v47 = vpop.eup %2007 }
 0x1c1   : > { %1486 = vst [vmem:[%s504_s19 + $0x10] sm:$0xff] %v2008_v47 }
 0x1c2   : > { %v2010_v48 = vpop.eup %2009 }
 0x1c3   : > { %1487 = vst [vmem:[%s504_s19 + $0x18] sm:$0xff] %v2010_v48 }
 0x1c4 PF: > { %s13_s16 = sadd.s32 1, %s2049_s16   ;;  %s2568_s12 = smov %s2037_s13 }
 0x1c5   : > { %p10_p10 = scmp.ge.s32.totalorder %s13_s16, 4   ;;  %s2569_s13 = smov %s2107_s20 }
 0x1c6   : > { %s2570_s14 = smov %s2045_s15  ;;  %s2571_s15 = smov %s2573_s17 }
 0x1c7   :  { %12 = sbr.rel (!%p10_p10) target bundleno = 3 (0x3), region = 96 }

</bundles_post_ra>
